<compile_context>
chip_gen: v6e
topology: v6e:2x2x1
jax: 0.10.0
libtpu: 0.0.40
codegen_flags: <defaults>
</compile_context>

<pallas_src>
import functools

import jax
import jax.numpy as jnp
from jax.experimental import pallas as pl
from jax.experimental.pallas import tpu as pltpu

EPS = 1e-5      # nn.BatchNorm2d default eps
LANE = 128      # TPU lane width


# --------------------------------------------------------------------------------------
# Pallas kernel: direct 3x3 conv + folded BN affine + (Leaky)ReLU on one halo'd row tile.
# --------------------------------------------------------------------------------------
def _conv3x3_bn_act_kernel(x_ref, w_ref, scale_ref, bias_ref, o_ref, *, bh, wp, neg_slope):
    """
    x_ref:      ((bh + 3) * wp, Cin)  bf16  row-block of the padded image, rows flattened
                                            together with the (padded) width wp.
    w_ref:      (9, Cin, Coutp)       bf16  conv weights, tap-major (dy * 3 + dx).
    scale/bias: (1, Coutp)            f32   folded BatchNorm(eval) + conv-bias affine.
    o_ref:      (bh * wp, Coutp)      bf16  lane-dense output tile (Coutp % 128 == 0).
    """
    m = bh * wp
    coutp = o_ref.shape[-1]
    acc = jnp.zeros((m, coutp), jnp.float32)
    for dy in range(3):
        for dx in range(3):
            # Shifting the flat row index by dy*wp + dx == a (dy, dx) shift in 2-D, so each
            # tap is a plain contiguous 2-D slice -> one MXU matmul, f32 accumulation.
            xs = x_ref[pl.ds(dy * wp + dx, m), :]                    # (m, Cin) bf16
            acc = acc + jnp.dot(xs, w_ref[3 * dy + dx],
                                preferred_element_type=jnp.float32)
    y = acc * scale_ref[...] + bias_ref[...]           # BN(eval) + conv bias, folded
    y = jnp.where(y > 0, y, neg_slope * y)             # ReLU (neg_slope=0) / LeakyReLU(0.2)
    o_ref[...] = y.astype(o_ref.dtype)


# --------------------------------------------------------------------------------------
# Tiling / parameter-folding helpers (plain JAX glue, all cheap views / tiny arrays).
# --------------------------------------------------------------------------------------
def _choose_tiles(N, H, W, max_tile_pixels=2048, min_grid=4):
    """Pick output row-block height `bh` (divides H) and padded width `wp` (>= W + 2)
    such that the output tile (bh * wp rows) is sublane-aligned (multiple of 8), big
    enough to amortize per-grid-step overhead, and still leaves >= min_grid grid steps
    (keeps both v7x TensorCores busy)."""
    wp = W + 2
    divisors = [d for d in range(1, H + 1) if H % d == 0]
    ok = [d for d in divisors if (d * wp) % 8 == 0]
    while not ok:          # widen the right zero-pad until a sublane-aligned tile exists
        wp += 1
        ok = [d for d in divisors if (d * wp) % 8 == 0]
    cand = ([d for d in ok if d * wp <= max_tile_pixels and N * (H // d) >= min_grid]
            or [d for d in ok if d * wp <= max_tile_pixels]
            or [min(ok)])
    return max(cand), wp


def _fold_bn_and_pad(p, cin_in):
    """Fold eval-mode BatchNorm (running stats) + conv bias into a per-channel affine and
    zero-pad channels: Cin -> cin_in (to match the incoming activation) and Cout -> multiple
    of 128 (lane-dense stores; padded channels get scale=0, bias=0 -> exactly zero output).
    # TODO(synk): PyTorch BatchNorm2d in training mode uses batch statistics; this
    # implements eval-mode semantics with fixed running stats."""
    w = p["w"]                                             # (3, 3, cin, cout) f32, HWIO
    _, _, cin, cout = w.shape
    coutp = ((cout + LANE - 1) // LANE) * LANE
    scale = p["gamma"] / jnp.sqrt(p["var"] + EPS)          # (cout,)
    bias = (p["b"] - p["mean"]) * scale + p["beta"]        # conv bias folded into BN shift
    w = jnp.pad(w, ((0, 0), (0, 0), (0, cin_in - cin), (0, coutp - cout)))
    w_mat = w.reshape(9, cin_in, coutp).astype(jnp.bfloat16)
    scale = jnp.pad(scale, (0, coutp - cout)).reshape(1, coutp).astype(jnp.float32)
    bias = jnp.pad(bias, (0, coutp - cout)).reshape(1, coutp).astype(jnp.float32)
    return w_mat, scale, bias


def conv3x3_bn_act(x_nhwc, w_mat, scale, bias, *, neg_slope=0.0,
                   max_tile_pixels=2048, min_grid=4, out_dtype=jnp.bfloat16):
    """3x3 'same' conv -> BN(eval) -> (Leaky)ReLU; all compute inside one Pallas kernel.

    Returns (N, H, W, Coutp) with Coutp = channels padded to a multiple of 128 (extra
    channels are exactly zero) so the next block can consume it without repacking."""
    N, H, W, Cin = x_nhwc.shape
    Coutp = w_mat.shape[-1]
    bh, wp = _choose_tiles(N, H, W, max_tile_pixels, min_grid)
    nb = H // bh

    # Spatial zero-pad: 1 row top, 2 rows bottom (1 halo + 1 wrap guard), 1 col left,
    # (wp - 1 - W) cols right. bf16 halves all DMA bytes; the MXU accumulates in f32.
    xp = jnp.pad(x_nhwc, ((0, 0), (1, 2), (1, wp - 1 - W), (0, 0))).astype(jnp.bfloat16)
    if nb == 1:
        xwin = xp.reshape(N, (H + 3) * wp, Cin)
    else:
        # Overlapping row-block windows (halo of 3 rows): ~ (bh+3)/bh input duplication,
        # vs. the 9x inflation of a full im2col.
        xwin = jnp.stack([xp[:, j * bh: j * bh + bh + 3] for j in range(nb)], axis=1)
        xwin = xwin.reshape(N * nb, (bh + 3) * wp, Cin)

    m_out = bh * wp
    kern = functools.partial(_conv3x3_bn_act_kernel, bh=bh, wp=wp, neg_slope=neg_slope)
    out = pl.pallas_call(
        kern,
        out_shape=jax.ShapeDtypeStruct((N * nb * m_out, Coutp), out_dtype),
        grid=(N * nb,),
        in_specs=[
            # one halo'd row-block window per grid step (leading dim squeezed)
            pl.BlockSpec((None, (bh + 3) * wp, Cin), lambda i: (i, 0, 0)),
            # loop-invariant operands, resident across the grid
            pl.BlockSpec((9, Cin, Coutp), lambda i: (0, 0, 0)),
            pl.BlockSpec((1, Coutp), lambda i: (0, 0)),
            pl.BlockSpec((1, Coutp), lambda i: (0, 0)),
        ],
        # lane-dense (Coutp % 128 == 0), sublane-aligned (m_out % 8 == 0) output tiles
        out_specs=pl.BlockSpec((m_out, Coutp), lambda i: (i, 0)),
        compiler_params=pltpu.CompilerParams(
            dimension_semantics=("parallel",),
            vmem_limit_bytes=32 * 1024 * 1024,   # valid on v5e/v6e/v7x; tiles sized to fit
        ),
    )(xwin, w_mat, scale, bias)

    # (N*nb*bh*wp, Coutp) -> (N, H, wp, Coutp); drop the right-edge wrap/garbage columns.
    # TODO(synk): for UNet-deep blocks (Cin*Cout very large) add a Cout/K grid axis with a
    # VMEM f32 accumulator instead of keeping the whole (9, Cin, Coutp) weight resident.
    return out.reshape(N, H, wp, Coutp)[:, :, :W, :]


# --------------------------------------------------------------------------------------
# DoubleConv forward + synthetic params + pure-JAX reference.
# --------------------------------------------------------------------------------------
def init_double_conv_params(key, in_channels, out_channels, mid_channels=None):
    """Deterministic synthetic parameters matching DoubleConv.__init__ shapes."""
    if not mid_channels:
        mid_channels = out_channels
    ks = jax.random.split(key, 12)

    def conv_block(k0, k1, k2, k3, k4, k5, cin, cout):
        return dict(
            w=jax.random.normal(k0, (3, 3, cin, cout), jnp.float32) * 0.1,   # HWIO
            b=jax.random.normal(k1, (cout,), jnp.float32) * 0.05,
            gamma=1.0 + 0.1 * jax.random.normal(k2, (cout,), jnp.float32),
            beta=0.1 * jax.random.normal(k3, (cout,), jnp.float32),
            mean=0.1 * jax.random.normal(k4, (cout,), jnp.float32),
            var=jax.random.uniform(k5, (cout,), jnp.float32, 0.5, 1.5),
        )

    return dict(
        block1=conv_block(*ks[0:6], in_channels, mid_channels),
        block2=conv_block(*ks[6:12], mid_channels, out_channels),
    )


def double_conv_forward(x_nchw, params, use_leaky=False):
    """(conv3x3 => BN => ReLU/LeakyReLU(0.2)) * 2, matching DoubleConv.forward (eval BN)."""
    neg_slope = 0.2 if use_leaky else 0.0
    out_channels = params["block2"]["w"].shape[-1]
    x = jnp.transpose(x_nchw, (0, 2, 3, 1))                 # NCHW -> NHWC
    for blk in ("block1", "block2"):
        p = params[blk]
        w_mat, scale, bias = _fold_bn_and_pad(p, cin_in=x.shape[-1])
        # Output stays bf16 with 128-padded channels (padded channels are exactly zero),
        # so block2 consumes it directly with a zero-padded-Cin weight: no repacking and
        # no lane-sparse intermediate in HBM.
        x = conv3x3_bn_act(x, w_mat, scale, bias, neg_slope=neg_slope)
    # TODO(synk): optionally fuse both conv blocks into a single pallas_call keeping the
    # mid activation tile in VMEM to remove this intermediate HBM round-trip entirely.
    x = x[..., :out_channels].astype(jnp.float32)
    return jnp.transpose(x, (0, 3, 1, 2))                   # NHWC -> NCHW


def _reference_forward(x_nchw, params, use_leaky=False):
    """Pure-JAX reference (lax conv) with matching precision (bf16 inputs, f32 accum)."""
    neg_slope = 0.2 if use_leaky else 0.0
    x = jnp.transpose(x_nchw, (0, 2, 3, 1)).astype(jnp.bfloat16)
    for blk in ("block1", "block2"):
        p = params[blk]
        y = jax.lax.conv_general_dilated(
            x, p["w"].astype(jnp.bfloat16), window_strides=(1, 1), padding="SAME",
            dimension_numbers=("NHWC", "HWIO", "NHWC"),
            preferred_element_type=jnp.float32)
        scale = p["gamma"] / jnp.sqrt(p["var"] + EPS)
        y = (y + p["b"] - p["mean"]) * scale + p["beta"]
        y = jnp.where(y > 0, y, neg_slope * y)
        x = y.astype(jnp.bfloat16)
    return jnp.transpose(x, (0, 3, 1, 2)).astype(jnp.float32)


if __name__ == "__main__":
    key = jax.random.PRNGKey(0)
    k_x, k_p = jax.random.split(key)

    N, C_in, H, W = 2, 4, 16, 16
    C_out = 8
    x = jax.random.normal(k_x, (N, C_in, H, W), jnp.float32)    # NCHW, like PyTorch
    params = init_double_conv_params(k_p, C_in, C_out)

    fwd = jax.jit(double_conv_forward, static_argnames=("use_leaky",))
    ref_fn = jax.jit(_reference_forward, static_argnames=("use_leaky",))

    for use_leaky in (False, True):                              # ReLU and LeakyReLU(0.2)
        out = jax.block_until_ready(fwd(x, params, use_leaky=use_leaky))
        assert out.shape == (N, C_out, H, W), out.shape
        ref = jax.block_until_ready(ref_fn(x, params, use_leaky=use_leaky))
        max_err = float(jnp.max(jnp.abs(out - ref)))
        assert jnp.allclose(out, ref, atol=3e-2, rtol=3e-2), (
            "mismatch vs pure-JAX reference", max_err)

    print("KERNEL_OK")
</pallas_src>

<mosaic_0001>
module attributes {stable_mosaic.version = 11 : i64} {
  func.func @_conv3x3_bn_act_kernel(%arg0: i32, %arg1: memref<1x198x4xbf16, #tpu.memory_space<vmem>>, %arg2: memref<9x4x128xbf16, #tpu.memory_space<vmem>>, %arg3: memref<1x128xf32, #tpu.memory_space<vmem>>, %arg4: memref<1x128xf32, #tpu.memory_space<vmem>>, %arg5: memref<144x128xbf16, #tpu.memory_space<vmem>>) attributes {dimension_semantics = [#tpu.dimension_semantics<parallel>], iteration_bounds = array<i64: 4>, scalar_prefetch = 0 : i64, scratch_operands = 0 : i64, tpu.core_type = #tpu.core_type<tc>, window_params = [{transform_indices = @transform_0, window_bounds = array<i64: 1, 198, 4>}, {pipeline_mode = #tpu.pipeline_mode<synchronous>, transform_indices = @transform_1, window_bounds = array<i64: 9, 4, 128>}, {pipeline_mode = #tpu.pipeline_mode<synchronous>, transform_indices = @transform_2, window_bounds = array<i64: 1, 128>}, {pipeline_mode = #tpu.pipeline_mode<synchronous>, transform_indices = @transform_3, window_bounds = array<i64: 1, 128>}, {transform_indices = @transform_4, window_bounds = array<i64: 144, 128>}]} {
    %cst = arith.constant 0.000000e+00 : f32
    %0 = vector.broadcast %cst : f32 to vector<144x128xf32>
    %c0 = arith.constant 0 : index
    %c0_0 = arith.constant 0 : index
    %c0_1 = arith.constant 0 : index
    %1 = vector.load %arg1[%c0, %c0_0, %c0_1] : memref<1x198x4xbf16, #tpu.memory_space<vmem>>, vector<1x144x4xbf16>
    %2 = vector.shape_cast %1 : vector<1x144x4xbf16> to vector<144x4xbf16>
    %c0_2 = arith.constant 0 : index
    %c0_3 = arith.constant 0 : index
    %c0_4 = arith.constant 0 : index
    %3 = vector.load %arg2[%c0_2, %c0_3, %c0_4] : memref<9x4x128xbf16, #tpu.memory_space<vmem>>, vector<1x4x128xbf16>
    %4 = vector.shape_cast %3 : vector<1x4x128xbf16> to vector<4x128xbf16>
    %cst_5 = arith.constant dense<0.000000e+00> : vector<144x128xf32>
    %5 = tpu.matmul %2, %4, %cst_5 {dimension_numbers = #tpu.dot_dimension_numbers<[1], [0], [0], [1], [0, 0, 1, 1], [], []>} : vector<144x4xbf16>, vector<4x128xbf16>, vector<144x128xf32> -> vector<144x128xf32>
    %6 = arith.addf %0, %5 : vector<144x128xf32>
    %c0_6 = arith.constant 0 : index
    %c1 = arith.constant 1 : index
    %c0_7 = arith.constant 0 : index
    %7 = vector.load %arg1[%c0_6, %c1, %c0_7] : memref<1x198x4xbf16, #tpu.memory_space<vmem>>, vector<1x144x4xbf16>
    %8 = vector.shape_cast %7 : vector<1x144x4xbf16> to vector<144x4xbf16>
    %c1_8 = arith.constant 1 : index
    %c0_9 = arith.constant 0 : index
    %c0_10 = arith.constant 0 : index
    %9 = vector.load %arg2[%c1_8, %c0_9, %c0_10] : memref<9x4x128xbf16, #tpu.memory_space<vmem>>, vector<1x4x128xbf16>
    %10 = vector.shape_cast %9 : vector<1x4x128xbf16> to vector<4x128xbf16>
    %cst_11 = arith.constant dense<0.000000e+00> : vector<144x128xf32>
    %11 = tpu.matmul %8, %10, %cst_11 {dimension_numbers = #tpu.dot_dimension_numbers<[1], [0], [0], [1], [0, 0, 1, 1], [], []>} : vector<144x4xbf16>, vector<4x128xbf16>, vector<144x128xf32> -> vector<144x128xf32>
    %12 = arith.addf %6, %11 : vector<144x128xf32>
    %c0_12 = arith.constant 0 : index
    %c2 = arith.constant 2 : index
    %c0_13 = arith.constant 0 : index
    %13 = vector.load %arg1[%c0_12, %c2, %c0_13] : memref<1x198x4xbf16, #tpu.memory_space<vmem>>, vector<1x144x4xbf16>
    %14 = vector.shape_cast %13 : vector<1x144x4xbf16> to vector<144x4xbf16>
    %c2_14 = arith.constant 2 : index
    %c0_15 = arith.constant 0 : index
    %c0_16 = arith.constant 0 : index
    %15 = vector.load %arg2[%c2_14, %c0_15, %c0_16] : memref<9x4x128xbf16, #tpu.memory_space<vmem>>, vector<1x4x128xbf16>
    %16 = vector.shape_cast %15 : vector<1x4x128xbf16> to vector<4x128xbf16>
    %cst_17 = arith.constant dense<0.000000e+00> : vector<144x128xf32>
    %17 = tpu.matmul %14, %16, %cst_17 {dimension_numbers = #tpu.dot_dimension_numbers<[1], [0], [0], [1], [0, 0, 1, 1], [], []>} : vector<144x4xbf16>, vector<4x128xbf16>, vector<144x128xf32> -> vector<144x128xf32>
    %18 = arith.addf %12, %17 : vector<144x128xf32>
    %c0_18 = arith.constant 0 : index
    %c18 = arith.constant 18 : index
    %c0_19 = arith.constant 0 : index
    %19 = vector.load %arg1[%c0_18, %c18, %c0_19] : memref<1x198x4xbf16, #tpu.memory_space<vmem>>, vector<1x144x4xbf16>
    %20 = vector.shape_cast %19 : vector<1x144x4xbf16> to vector<144x4xbf16>
    %c3 = arith.constant 3 : index
    %c0_20 = arith.constant 0 : index
    %c0_21 = arith.constant 0 : index
    %21 = vector.load %arg2[%c3, %c0_20, %c0_21] : memref<9x4x128xbf16, #tpu.memory_space<vmem>>, vector<1x4x128xbf16>
    %22 = vector.shape_cast %21 : vector<1x4x128xbf16> to vector<4x128xbf16>
    %cst_22 = arith.constant dense<0.000000e+00> : vector<144x128xf32>
    %23 = tpu.matmul %20, %22, %cst_22 {dimension_numbers = #tpu.dot_dimension_numbers<[1], [0], [0], [1], [0, 0, 1, 1], [], []>} : vector<144x4xbf16>, vector<4x128xbf16>, vector<144x128xf32> -> vector<144x128xf32>
    %24 = arith.addf %18, %23 : vector<144x128xf32>
    %c0_23 = arith.constant 0 : index
    %c19 = arith.constant 19 : index
    %c0_24 = arith.constant 0 : index
    %25 = vector.load %arg1[%c0_23, %c19, %c0_24] : memref<1x198x4xbf16, #tpu.memory_space<vmem>>, vector<1x144x4xbf16>
    %26 = vector.shape_cast %25 : vector<1x144x4xbf16> to vector<144x4xbf16>
    %c4 = arith.constant 4 : index
    %c0_25 = arith.constant 0 : index
    %c0_26 = arith.constant 0 : index
    %27 = vector.load %arg2[%c4, %c0_25, %c0_26] : memref<9x4x128xbf16, #tpu.memory_space<vmem>>, vector<1x4x128xbf16>
    %28 = vector.shape_cast %27 : vector<1x4x128xbf16> to vector<4x128xbf16>
    %cst_27 = arith.constant dense<0.000000e+00> : vector<144x128xf32>
    %29 = tpu.matmul %26, %28, %cst_27 {dimension_numbers = #tpu.dot_dimension_numbers<[1], [0], [0], [1], [0, 0, 1, 1], [], []>} : vector<144x4xbf16>, vector<4x128xbf16>, vector<144x128xf32> -> vector<144x128xf32>
    %30 = arith.addf %24, %29 : vector<144x128xf32>
    %c0_28 = arith.constant 0 : index
    %c20 = arith.constant 20 : index
    %c0_29 = arith.constant 0 : index
    %31 = vector.load %arg1[%c0_28, %c20, %c0_29] : memref<1x198x4xbf16, #tpu.memory_space<vmem>>, vector<1x144x4xbf16>
    %32 = vector.shape_cast %31 : vector<1x144x4xbf16> to vector<144x4xbf16>
    %c5 = arith.constant 5 : index
    %c0_30 = arith.constant 0 : index
    %c0_31 = arith.constant 0 : index
    %33 = vector.load %arg2[%c5, %c0_30, %c0_31] : memref<9x4x128xbf16, #tpu.memory_space<vmem>>, vector<1x4x128xbf16>
    %34 = vector.shape_cast %33 : vector<1x4x128xbf16> to vector<4x128xbf16>
    %cst_32 = arith.constant dense<0.000000e+00> : vector<144x128xf32>
    %35 = tpu.matmul %32, %34, %cst_32 {dimension_numbers = #tpu.dot_dimension_numbers<[1], [0], [0], [1], [0, 0, 1, 1], [], []>} : vector<144x4xbf16>, vector<4x128xbf16>, vector<144x128xf32> -> vector<144x128xf32>
    %36 = arith.addf %30, %35 : vector<144x128xf32>
    %c0_33 = arith.constant 0 : index
    %c36 = arith.constant 36 : index
    %c0_34 = arith.constant 0 : index
    %37 = vector.load %arg1[%c0_33, %c36, %c0_34] : memref<1x198x4xbf16, #tpu.memory_space<vmem>>, vector<1x144x4xbf16>
    %38 = vector.shape_cast %37 : vector<1x144x4xbf16> to vector<144x4xbf16>
    %c6 = arith.constant 6 : index
    %c0_35 = arith.constant 0 : index
    %c0_36 = arith.constant 0 : index
    %39 = vector.load %arg2[%c6, %c0_35, %c0_36] : memref<9x4x128xbf16, #tpu.memory_space<vmem>>, vector<1x4x128xbf16>
    %40 = vector.shape_cast %39 : vector<1x4x128xbf16> to vector<4x128xbf16>
    %cst_37 = arith.constant dense<0.000000e+00> : vector<144x128xf32>
    %41 = tpu.matmul %38, %40, %cst_37 {dimension_numbers = #tpu.dot_dimension_numbers<[1], [0], [0], [1], [0, 0, 1, 1], [], []>} : vector<144x4xbf16>, vector<4x128xbf16>, vector<144x128xf32> -> vector<144x128xf32>
    %42 = arith.addf %36, %41 : vector<144x128xf32>
    %c0_38 = arith.constant 0 : index
    %c37 = arith.constant 37 : index
    %c0_39 = arith.constant 0 : index
    %43 = vector.load %arg1[%c0_38, %c37, %c0_39] : memref<1x198x4xbf16, #tpu.memory_space<vmem>>, vector<1x144x4xbf16>
    %44 = vector.shape_cast %43 : vector<1x144x4xbf16> to vector<144x4xbf16>
    %c7 = arith.constant 7 : index
    %c0_40 = arith.constant 0 : index
    %c0_41 = arith.constant 0 : index
    %45 = vector.load %arg2[%c7, %c0_40, %c0_41] : memref<9x4x128xbf16, #tpu.memory_space<vmem>>, vector<1x4x128xbf16>
    %46 = vector.shape_cast %45 : vector<1x4x128xbf16> to vector<4x128xbf16>
    %cst_42 = arith.constant dense<0.000000e+00> : vector<144x128xf32>
    %47 = tpu.matmul %44, %46, %cst_42 {dimension_numbers = #tpu.dot_dimension_numbers<[1], [0], [0], [1], [0, 0, 1, 1], [], []>} : vector<144x4xbf16>, vector<4x128xbf16>, vector<144x128xf32> -> vector<144x128xf32>
    %48 = arith.addf %42, %47 : vector<144x128xf32>
    %c0_43 = arith.constant 0 : index
    %c38 = arith.constant 38 : index
    %c0_44 = arith.constant 0 : index
    %49 = vector.load %arg1[%c0_43, %c38, %c0_44] : memref<1x198x4xbf16, #tpu.memory_space<vmem>>, vector<1x144x4xbf16>
    %50 = vector.shape_cast %49 : vector<1x144x4xbf16> to vector<144x4xbf16>
    %c8 = arith.constant 8 : index
    %c0_45 = arith.constant 0 : index
    %c0_46 = arith.constant 0 : index
    %51 = vector.load %arg2[%c8, %c0_45, %c0_46] : memref<9x4x128xbf16, #tpu.memory_space<vmem>>, vector<1x4x128xbf16>
    %52 = vector.shape_cast %51 : vector<1x4x128xbf16> to vector<4x128xbf16>
    %cst_47 = arith.constant dense<0.000000e+00> : vector<144x128xf32>
    %53 = tpu.matmul %50, %52, %cst_47 {dimension_numbers = #tpu.dot_dimension_numbers<[1], [0], [0], [1], [0, 0, 1, 1], [], []>} : vector<144x4xbf16>, vector<4x128xbf16>, vector<144x128xf32> -> vector<144x128xf32>
    %54 = arith.addf %48, %53 : vector<144x128xf32>
    %c0_48 = arith.constant 0 : index
    %c0_49 = arith.constant 0 : index
    %55 = vector.load %arg3[%c0_48, %c0_49] : memref<1x128xf32, #tpu.memory_space<vmem>>, vector<1x128xf32>
    %56 = vector.broadcast %55 : vector<1x128xf32> to vector<144x128xf32>
    %57 = arith.mulf %54, %56 : vector<144x128xf32>
    %c0_50 = arith.constant 0 : index
    %c0_51 = arith.constant 0 : index
    %58 = vector.load %arg4[%c0_50, %c0_51] : memref<1x128xf32, #tpu.memory_space<vmem>>, vector<1x128xf32>
    %59 = vector.broadcast %58 : vector<1x128xf32> to vector<144x128xf32>
    %60 = arith.addf %57, %59 : vector<144x128xf32>
    %cst_52 = arith.constant 0.000000e+00 : f32
    %61 = vector.broadcast %cst_52 : f32 to vector<144x128xf32>
    %62 = arith.cmpf ogt, %60, %61 : vector<144x128xf32>
    %cst_53 = arith.constant 0.000000e+00 : f32
    %63 = vector.broadcast %cst_53 : f32 to vector<144x128xf32>
    %64 = arith.mulf %63, %60 : vector<144x128xf32>
    %65 = arith.select %62, %60, %64 : vector<144x128xi1>, vector<144x128xf32>
    %66 = arith.truncf %65 : vector<144x128xf32> to vector<144x128xbf16>
    %c0_54 = arith.constant 0 : index
    %c0_55 = arith.constant 0 : index
    %67 = vector.load %arg5[%c0_54, %c0_55] : memref<144x128xbf16, #tpu.memory_space<vmem>>, vector<144x128xbf16>
    tpu.vector_store %arg5[%c0_54, %c0_55], %66 {strides = array<i32>} : memref<144x128xbf16, #tpu.memory_space<vmem>>, vector<144x128xbf16>,
    return
  }
  func.func @transform_0(%arg0: i32) -> (i32, i32, i32) {
    %c0_i32 = arith.constant 0 : i32
    %c0_i32_0 = arith.constant 0 : i32
    %c0_i32_1 = arith.constant 0 : i32
    return %arg0, %c0_i32, %c0_i32_0 : i32, i32, i32
  }
  func.func @transform_1(%arg0: i32) -> (i32, i32, i32) {
    %c0_i32 = arith.constant 0 : i32
    %c0_i32_0 = arith.constant 0 : i32
    %c0_i32_1 = arith.constant 0 : i32
    %c0_i32_2 = arith.constant 0 : i32
    return %c0_i32, %c0_i32_0, %c0_i32_1 : i32, i32, i32
  }
  func.func @transform_2(%arg0: i32) -> (i32, i32) {
    %c0_i32 = arith.constant 0 : i32
    %c0_i32_0 = arith.constant 0 : i32
    %c0_i32_1 = arith.constant 0 : i32
    return %c0_i32, %c0_i32_0 : i32, i32
  }
  func.func @transform_3(%arg0: i32) -> (i32, i32) {
    %c0_i32 = arith.constant 0 : i32
    %c0_i32_0 = arith.constant 0 : i32
    %c0_i32_1 = arith.constant 0 : i32
    return %c0_i32, %c0_i32_0 : i32, i32
  }
  func.func @transform_4(%arg0: i32) -> (i32, i32) {
    %c0_i32 = arith.constant 0 : i32
    %c0_i32_0 = arith.constant 0 : i32
    return %arg0, %c0_i32 : i32, i32
  }
}

module attributes {stable_mosaic.version = 11 : i64} {
  func.func @_conv3x3_bn_act_kernel(%arg0: i32, %arg1: memref<1x198x128xbf16, #tpu.memory_space<vmem>>, %arg2: memref<9x128x128xbf16, #tpu.memory_space<vmem>>, %arg3: memref<1x128xf32, #tpu.memory_space<vmem>>, %arg4: memref<1x128xf32, #tpu.memory_space<vmem>>, %arg5: memref<144x128xbf16, #tpu.memory_space<vmem>>) attributes {dimension_semantics = [#tpu.dimension_semantics<parallel>], iteration_bounds = array<i64: 4>, scalar_prefetch = 0 : i64, scratch_operands = 0 : i64, tpu.core_type = #tpu.core_type<tc>, window_params = [{transform_indices = @transform_0, window_bounds = array<i64: 1, 198, 128>}, {pipeline_mode = #tpu.pipeline_mode<synchronous>, transform_indices = @transform_1, window_bounds = array<i64: 9, 128, 128>}, {pipeline_mode = #tpu.pipeline_mode<synchronous>, transform_indices = @transform_2, window_bounds = array<i64: 1, 128>}, {pipeline_mode = #tpu.pipeline_mode<synchronous>, transform_indices = @transform_3, window_bounds = array<i64: 1, 128>}, {transform_indices = @transform_4, window_bounds = array<i64: 144, 128>}]} {
    %cst = arith.constant 0.000000e+00 : f32
    %0 = vector.broadcast %cst : f32 to vector<144x128xf32>
    %c0 = arith.constant 0 : index
    %c0_0 = arith.constant 0 : index
    %c0_1 = arith.constant 0 : index
    %1 = vector.load %arg1[%c0, %c0_0, %c0_1] : memref<1x198x128xbf16, #tpu.memory_space<vmem>>, vector<1x144x128xbf16>
    %2 = vector.shape_cast %1 : vector<1x144x128xbf16> to vector<144x128xbf16>
    %c0_2 = arith.constant 0 : index
    %c0_3 = arith.constant 0 : index
    %c0_4 = arith.constant 0 : index
    %3 = vector.load %arg2[%c0_2, %c0_3, %c0_4] : memref<9x128x128xbf16, #tpu.memory_space<vmem>>, vector<1x128x128xbf16>
    %4 = vector.shape_cast %3 : vector<1x128x128xbf16> to vector<128x128xbf16>
    %cst_5 = arith.constant dense<0.000000e+00> : vector<144x128xf32>
    %5 = tpu.matmul %2, %4, %cst_5 {dimension_numbers = #tpu.dot_dimension_numbers<[1], [0], [0], [1], [0, 0, 1, 1], [], []>} : vector<144x128xbf16>, vector<128x128xbf16>, vector<144x128xf32> -> vector<144x128xf32>
    %6 = arith.addf %0, %5 : vector<144x128xf32>
    %c0_6 = arith.constant 0 : index
    %c1 = arith.constant 1 : index
    %c0_7 = arith.constant 0 : index
    %7 = vector.load %arg1[%c0_6, %c1, %c0_7] : memref<1x198x128xbf16, #tpu.memory_space<vmem>>, vector<1x144x128xbf16>
    %8 = vector.shape_cast %7 : vector<1x144x128xbf16> to vector<144x128xbf16>
    %c1_8 = arith.constant 1 : index
    %c0_9 = arith.constant 0 : index
    %c0_10 = arith.constant 0 : index
    %9 = vector.load %arg2[%c1_8, %c0_9, %c0_10] : memref<9x128x128xbf16, #tpu.memory_space<vmem>>, vector<1x128x128xbf16>
    %10 = vector.shape_cast %9 : vector<1x128x128xbf16> to vector<128x128xbf16>
    %cst_11 = arith.constant dense<0.000000e+00> : vector<144x128xf32>
    %11 = tpu.matmul %8, %10, %cst_11 {dimension_numbers = #tpu.dot_dimension_numbers<[1], [0], [0], [1], [0, 0, 1, 1], [], []>} : vector<144x128xbf16>, vector<128x128xbf16>, vector<144x128xf32> -> vector<144x128xf32>
    %12 = arith.addf %6, %11 : vector<144x128xf32>
    %c0_12 = arith.constant 0 : index
    %c2 = arith.constant 2 : index
    %c0_13 = arith.constant 0 : index
    %13 = vector.load %arg1[%c0_12, %c2, %c0_13] : memref<1x198x128xbf16, #tpu.memory_space<vmem>>, vector<1x144x128xbf16>
    %14 = vector.shape_cast %13 : vector<1x144x128xbf16> to vector<144x128xbf16>
    %c2_14 = arith.constant 2 : index
    %c0_15 = arith.constant 0 : index
    %c0_16 = arith.constant 0 : index
    %15 = vector.load %arg2[%c2_14, %c0_15, %c0_16] : memref<9x128x128xbf16, #tpu.memory_space<vmem>>, vector<1x128x128xbf16>
    %16 = vector.shape_cast %15 : vector<1x128x128xbf16> to vector<128x128xbf16>
    %cst_17 = arith.constant dense<0.000000e+00> : vector<144x128xf32>
    %17 = tpu.matmul %14, %16, %cst_17 {dimension_numbers = #tpu.dot_dimension_numbers<[1], [0], [0], [1], [0, 0, 1, 1], [], []>} : vector<144x128xbf16>, vector<128x128xbf16>, vector<144x128xf32> -> vector<144x128xf32>
    %18 = arith.addf %12, %17 : vector<144x128xf32>
    %c0_18 = arith.constant 0 : index
    %c18 = arith.constant 18 : index
    %c0_19 = arith.constant 0 : index
    %19 = vector.load %arg1[%c0_18, %c18, %c0_19] : memref<1x198x128xbf16, #tpu.memory_space<vmem>>, vector<1x144x128xbf16>
    %20 = vector.shape_cast %19 : vector<1x144x128xbf16> to vector<144x128xbf16>
    %c3 = arith.constant 3 : index
    %c0_20 = arith.constant 0 : index
    %c0_21 = arith.constant 0 : index
    %21 = vector.load %arg2[%c3, %c0_20, %c0_21] : memref<9x128x128xbf16, #tpu.memory_space<vmem>>, vector<1x128x128xbf16>
    %22 = vector.shape_cast %21 : vector<1x128x128xbf16> to vector<128x128xbf16>
    %cst_22 = arith.constant dense<0.000000e+00> : vector<144x128xf32>
    %23 = tpu.matmul %20, %22, %cst_22 {dimension_numbers = #tpu.dot_dimension_numbers<[1], [0], [0], [1], [0, 0, 1, 1], [], []>} : vector<144x128xbf16>, vector<128x128xbf16>, vector<144x128xf32> -> vector<144x128xf32>
    %24 = arith.addf %18, %23 : vector<144x128xf32>
    %c0_23 = arith.constant 0 : index
    %c19 = arith.constant 19 : index
    %c0_24 = arith.constant 0 : index
    %25 = vector.load %arg1[%c0_23, %c19, %c0_24] : memref<1x198x128xbf16, #tpu.memory_space<vmem>>, vector<1x144x128xbf16>
    %26 = vector.shape_cast %25 : vector<1x144x128xbf16> to vector<144x128xbf16>
    %c4 = arith.constant 4 : index
    %c0_25 = arith.constant 0 : index
    %c0_26 = arith.constant 0 : index
    %27 = vector.load %arg2[%c4, %c0_25, %c0_26] : memref<9x128x128xbf16, #tpu.memory_space<vmem>>, vector<1x128x128xbf16>
    %28 = vector.shape_cast %27 : vector<1x128x128xbf16> to vector<128x128xbf16>
    %cst_27 = arith.constant dense<0.000000e+00> : vector<144x128xf32>
    %29 = tpu.matmul %26, %28, %cst_27 {dimension_numbers = #tpu.dot_dimension_numbers<[1], [0], [0], [1], [0, 0, 1, 1], [], []>} : vector<144x128xbf16>, vector<128x128xbf16>, vector<144x128xf32> -> vector<144x128xf32>
    %30 = arith.addf %24, %29 : vector<144x128xf32>
    %c0_28 = arith.constant 0 : index
    %c20 = arith.constant 20 : index
    %c0_29 = arith.constant 0 : index
    %31 = vector.load %arg1[%c0_28, %c20, %c0_29] : memref<1x198x128xbf16, #tpu.memory_space<vmem>>, vector<1x144x128xbf16>
    %32 = vector.shape_cast %31 : vector<1x144x128xbf16> to vector<144x128xbf16>
    %c5 = arith.constant 5 : index
    %c0_30 = arith.constant 0 : index
    %c0_31 = arith.constant 0 : index
    %33 = vector.load %arg2[%c5, %c0_30, %c0_31] : memref<9x128x128xbf16, #tpu.memory_space<vmem>>, vector<1x128x128xbf16>
    %34 = vector.shape_cast %33 : vector<1x128x128xbf16> to vector<128x128xbf16>
    %cst_32 = arith.constant dense<0.000000e+00> : vector<144x128xf32>
    %35 = tpu.matmul %32, %34, %cst_32 {dimension_numbers = #tpu.dot_dimension_numbers<[1], [0], [0], [1], [0, 0, 1, 1], [], []>} : vector<144x128xbf16>, vector<128x128xbf16>, vector<144x128xf32> -> vector<144x128xf32>
    %36 = arith.addf %30, %35 : vector<144x128xf32>
    %c0_33 = arith.constant 0 : index
    %c36 = arith.constant 36 : index
    %c0_34 = arith.constant 0 : index
    %37 = vector.load %arg1[%c0_33, %c36, %c0_34] : memref<1x198x128xbf16, #tpu.memory_space<vmem>>, vector<1x144x128xbf16>
    %38 = vector.shape_cast %37 : vector<1x144x128xbf16> to vector<144x128xbf16>
    %c6 = arith.constant 6 : index
    %c0_35 = arith.constant 0 : index
    %c0_36 = arith.constant 0 : index
    %39 = vector.load %arg2[%c6, %c0_35, %c0_36] : memref<9x128x128xbf16, #tpu.memory_space<vmem>>, vector<1x128x128xbf16>
    %40 = vector.shape_cast %39 : vector<1x128x128xbf16> to vector<128x128xbf16>
    %cst_37 = arith.constant dense<0.000000e+00> : vector<144x128xf32>
    %41 = tpu.matmul %38, %40, %cst_37 {dimension_numbers = #tpu.dot_dimension_numbers<[1], [0], [0], [1], [0, 0, 1, 1], [], []>} : vector<144x128xbf16>, vector<128x128xbf16>, vector<144x128xf32> -> vector<144x128xf32>
    %42 = arith.addf %36, %41 : vector<144x128xf32>
    %c0_38 = arith.constant 0 : index
    %c37 = arith.constant 37 : index
    %c0_39 = arith.constant 0 : index
    %43 = vector.load %arg1[%c0_38, %c37, %c0_39] : memref<1x198x128xbf16, #tpu.memory_space<vmem>>, vector<1x144x128xbf16>
    %44 = vector.shape_cast %43 : vector<1x144x128xbf16> to vector<144x128xbf16>
    %c7 = arith.constant 7 : index
    %c0_40 = arith.constant 0 : index
    %c0_41 = arith.constant 0 : index
    %45 = vector.load %arg2[%c7, %c0_40, %c0_41] : memref<9x128x128xbf16, #tpu.memory_space<vmem>>, vector<1x128x128xbf16>
    %46 = vector.shape_cast %45 : vector<1x128x128xbf16> to vector<128x128xbf16>
    %cst_42 = arith.constant dense<0.000000e+00> : vector<144x128xf32>
    %47 = tpu.matmul %44, %46, %cst_42 {dimension_numbers = #tpu.dot_dimension_numbers<[1], [0], [0], [1], [0, 0, 1, 1], [], []>} : vector<144x128xbf16>, vector<128x128xbf16>, vector<144x128xf32> -> vector<144x128xf32>
    %48 = arith.addf %42, %47 : vector<144x128xf32>
    %c0_43 = arith.constant 0 : index
    %c38 = arith.constant 38 : index
    %c0_44 = arith.constant 0 : index
    %49 = vector.load %arg1[%c0_43, %c38, %c0_44] : memref<1x198x128xbf16, #tpu.memory_space<vmem>>, vector<1x144x128xbf16>
    %50 = vector.shape_cast %49 : vector<1x144x128xbf16> to vector<144x128xbf16>
    %c8 = arith.constant 8 : index
    %c0_45 = arith.constant 0 : index
    %c0_46 = arith.constant 0 : index
    %51 = vector.load %arg2[%c8, %c0_45, %c0_46] : memref<9x128x128xbf16, #tpu.memory_space<vmem>>, vector<1x128x128xbf16>
    %52 = vector.shape_cast %51 : vector<1x128x128xbf16> to vector<128x128xbf16>
    %cst_47 = arith.constant dense<0.000000e+00> : vector<144x128xf32>
    %53 = tpu.matmul %50, %52, %cst_47 {dimension_numbers = #tpu.dot_dimension_numbers<[1], [0], [0], [1], [0, 0, 1, 1], [], []>} : vector<144x128xbf16>, vector<128x128xbf16>, vector<144x128xf32> -> vector<144x128xf32>
    %54 = arith.addf %48, %53 : vector<144x128xf32>
    %c0_48 = arith.constant 0 : index
    %c0_49 = arith.constant 0 : index
    %55 = vector.load %arg3[%c0_48, %c0_49] : memref<1x128xf32, #tpu.memory_space<vmem>>, vector<1x128xf32>
    %56 = vector.broadcast %55 : vector<1x128xf32> to vector<144x128xf32>
    %57 = arith.mulf %54, %56 : vector<144x128xf32>
    %c0_50 = arith.constant 0 : index
    %c0_51 = arith.constant 0 : index
    %58 = vector.load %arg4[%c0_50, %c0_51] : memref<1x128xf32, #tpu.memory_space<vmem>>, vector<1x128xf32>
    %59 = vector.broadcast %58 : vector<1x128xf32> to vector<144x128xf32>
    %60 = arith.addf %57, %59 : vector<144x128xf32>
    %cst_52 = arith.constant 0.000000e+00 : f32
    %61 = vector.broadcast %cst_52 : f32 to vector<144x128xf32>
    %62 = arith.cmpf ogt, %60, %61 : vector<144x128xf32>
    %cst_53 = arith.constant 0.000000e+00 : f32
    %63 = vector.broadcast %cst_53 : f32 to vector<144x128xf32>
    %64 = arith.mulf %63, %60 : vector<144x128xf32>
    %65 = arith.select %62, %60, %64 : vector<144x128xi1>, vector<144x128xf32>
    %66 = arith.truncf %65 : vector<144x128xf32> to vector<144x128xbf16>
    %c0_54 = arith.constant 0 : index
    %c0_55 = arith.constant 0 : index
    %67 = vector.load %arg5[%c0_54, %c0_55] : memref<144x128xbf16, #tpu.memory_space<vmem>>, vector<144x128xbf16>
    tpu.vector_store %arg5[%c0_54, %c0_55], %66 {strides = array<i32>} : memref<144x128xbf16, #tpu.memory_space<vmem>>, vector<144x128xbf16>,
    return
  }
  func.func @transform_0(%arg0: i32) -> (i32, i32, i32) {
    %c0_i32 = arith.constant 0 : i32
    %c0_i32_0 = arith.constant 0 : i32
    %c0_i32_1 = arith.constant 0 : i32
    return %arg0, %c0_i32, %c0_i32_0 : i32, i32, i32
  }
  func.func @transform_1(%arg0: i32) -> (i32, i32, i32) {
    %c0_i32 = arith.constant 0 : i32
    %c0_i32_0 = arith.constant 0 : i32
    %c0_i32_1 = arith.constant 0 : i32
    %c0_i32_2 = arith.constant 0 : i32
    return %c0_i32, %c0_i32_0, %c0_i32_1 : i32, i32, i32
  }
  func.func @transform_2(%arg0: i32) -> (i32, i32) {
    %c0_i32 = arith.constant 0 : i32
    %c0_i32_0 = arith.constant 0 : i32
    %c0_i32_1 = arith.constant 0 : i32
    return %c0_i32, %c0_i32_0 : i32, i32
  }
  func.func @transform_3(%arg0: i32) -> (i32, i32) {
    %c0_i32 = arith.constant 0 : i32
    %c0_i32_0 = arith.constant 0 : i32
    %c0_i32_1 = arith.constant 0 : i32
    return %c0_i32, %c0_i32_0 : i32, i32
  }
  func.func @transform_4(%arg0: i32) -> (i32, i32) {
    %c0_i32 = arith.constant 0 : i32
    %c0_i32_0 = arith.constant 0 : i32
    return %arg0, %c0_i32 : i32, i32
  }
}

</mosaic_0001>

<bundles_post_ra>
// kernel: double_conv_forward.2
= control target key start
LH: loop header
LB: loop body
LE: loop exit
PB: predicated region body
PF: predicated region fallthrough
CT: control target
= control target key end

     0   :  { %s3116_s15 = smov 0   ;;  %s4009_s0 = inlined_call_operand.vmem [shape: bf16[4,198,4], index: 0, kind: input, shape index: {}]   ;;  %s4010_s1 = inlined_call_operand.vmem [shape: bf16[9,4,128], index: 1, kind: input, shape index: {}]   ;;  %s4011_s2 = inlined_call_operand.vmem [shape: f32[1,128], index: 2, kind: input, shape index: {}]   ;;  %s4012_s3 = inlined_call_operand.vmem [shape: f32[1,128], index: 3, kind: input, shape index: {}]   ;;  %s4013_s4 = inlined_call_operand.vmem [shape: bf16[576,128], index: 4, kind: output, shape index: {}]  }
   0x1 LB: > { %s3122_s16 = sadd.s32 4294967295, %s3087_s15   ;;  %p2381_p0 = scmp.ge.s32.totalorder %s3087_s15, 1  ;;  %s3087_s15 = sphi %s3116_s15, %s14_s15  }
   0x2   : > { %p162_p1 = scmp.lt.s32.totalorder %s3087_s15, 5 }
   0x4   : > { %p163_p2 = pnand %p2381_p0, %p162_p1 }
   0x5   : > { %p188_p3 = scmp.lt.s32.totalorder (!%p163_p2), %s3122_s16, 3  ;;  %s193_s14 = smul.u32 (!%p163_p2), 18, %s3122_s16 }
   0x6   : > { %166 = sbr.rel (%p163_p2) target bundleno = 555 (0x22b), region = 36 }
   0x7   : > { %p194_p4 = scmp.lt.s32.totalorder (!%p163_p2), %s193_s14, 71 }
   0xb   : > { %v2384_v0 = vld [vmem:[%s4010_s1 + $0x2] sm:$0x3]  ;;  %vm375_vm0 = vcmask 1041408   ;;  %v3089_v1 = vmov 0.0   ;;  %s189_s19 = scalar_select %p188_p3, %s3122_s16, 3  ;;  %vm3090_vm1 = vmmov 0  }
   0xc   : > { %2691 = vmatprep.subr.bf16.mxu0 %v3089_v1  ;;  %3033 = vmatprep.subr.bf16.mxu1 %v3089_v1  ;;  %v377_v2 = vsel %vm375_vm0, %v2384_v0, 0  ;;  %vm270_vm2 = vsmask.f32 7424  ;;  %v2413_v12 = vld [vmem:[%s4010_s1 + $0x4] sm:$0x3]  ;;  %vm347_vm3 = vcmask 31744  }
   0xd   : > { %2692 = vmatpush3.bf16.msra.mxu0 %v377_v2  ;;  %3034 = vmatpush3.bf16.msra.mxu1 %v377_v2  ;;  %s3035_s20 = smul.u32 100, %s189_s19  ;;  %v218_v20 = vld [vmem:[%s4010_s1] sm:$0x3]  ;;  %v664_v26 = vsel %vm375_vm0, %v2413_v12, 0  ;;  %vm616_vm4 = vcmask 1046528   ;;  %vm1285_vm5 = vcmask 1045504  }
   0xe   : > { %2693 = vmatprep.mubr.msk.bf16.mxu0 %vm3090_vm1, %v3089_v1  ;;  %2713 = vmatprep.mubr.msk.bf16.mxu1 %vm3090_vm1, %v3089_v1  ;;  %v503_v31 = vsel %vm375_vm0, %v218_v20, 0  ;;  %v2424_v12 = vld [vmem:[%s4010_s1 + $0x6] sm:$0x3]  ;;  %vm1036_vm6 = vsmask.f32 6400  ;;  %vm1954_vm8 = vcmask 1044480  }
   0xf   : > { %2767 = vmatprep.subr.bf16.mxu0 %v3089_v1  ;;  %2729 = vmatprep.subr.bf16.mxu1 %v3089_v1  ;;  %s3143_s23 = scalar_lea.vmem %s4009_s0, %s3035_s20  ;;  %vm1705_vm7 = vsmask.f32 5376  ;;  %s4015_s14 = smov (!%p194_p4, %s193_s14), 71 }
  0x10   : > { %v200_v3 = vld [vmem:[%s3143_s23] sm:$0xf]  ;;  %v3147_v4 = vld [vmem:[%s3143_s23 + $0x4] sm:$0xf]  ;;  %v3153_v6 = vld [vmem:[%s3143_s23 + $0x8] sm:$0xff]   ;;  %s2383_s16 = sshll.u32 %s4015_s14, 2 }
  0x11   : > { %v3150_v5 = vcombine.low %v200_v3, %v3147_v4  ;;  %v279_v9 = vshll.u32 %v3153_v6, 16  ;;  %v3159_v10 = vld [vmem:[%s3143_s23 + $0x28] sm:$0xff]   ;;  %v3162_v11 = vld [vmem:[%s3143_s23 + $0x30] sm:$0xff]   ;;  %v3171_v14 = vld [vmem:[%s3143_s23 + $0x38] sm:$0xff]   ;;  %v283_v21 = vshrl.u32 %v3153_v6, 16 }
  0x12   : > { %v3168_v13 = vld [vmem:[%s3143_s23 + $0x10] sm:$0xff]   ;;  %v311_v17 = vshll.u32 %v3159_v10, 16  ;;  %v315_v18 = vshrl.u32 %v3159_v10, 16  ;;  %v319_v19 = vshll.u32 %v3162_v11, 16  ;;  %v323_v29 = vshrl.u32 %v3162_v11, 16  ;;  %v3191_v32 = vld [vmem:[%s3143_s23 + $0x18] sm:$0xff]  }
  0x13   : > { %v272_v7 = vshrl.u32 %v3150_v5, 16  ;;  %v274_v8 = vshll.u32 %v3150_v5, 16  ;;  %v281_v16 = vrot.slane %v279_v9, 1  ;;  %v287_v24 = vshll.u32 %v3168_v13, 16  ;;  %v3201_v38 = vld [vmem:[%s3143_s23 + $0x40] sm:$0xff]  }
  0x14   : > { %v3180_v23 = vrot.slane %v311_v17, 1  ;;  %v321_v25 = vrot.slane %v319_v19, 1  ;;  %v327_v30 = vshll.u32 %v3171_v14, 16  ;;  %v295_v39 = vshll.u32 %v3191_v32, 16  ;;  %v3213_v47 = vld [vmem:[%s3143_s23 + $0x20] sm:$0xff]  }
  0x15   : > { %v276_v15 = vrot.slane %v274_v8, 1  ;;  %v285_v34 = vor.u32 %v283_v21, %v281_v16  ;;  %v289_v35 = vrot.slane %v287_v24, 1  ;;  %v291_v41 = vshrl.u32 %v3168_v13, 16  ;;  %v3055_v42 = vld [vmem:[%s3143_s23 + $0x48] ss:$0 sps:$4 sm:$0x11]  }
  0x16   : > { %v317_v28 = vor.u32 %v315_v18, %v3180_v23  ;;  %v325_v36 = vor.u32 %v323_v29, %v321_v25  ;;  %v329_v37 = vrot.slane %v327_v30, 1  ;;  %v331_v44 = vshrl.u32 %v3171_v14, 16  ;;  %v610_v8 = vld [vmem:[%s3143_s23] sm:$0xe]  ;;  %v790_v21 = vld [vmem:[%s3143_s23 + $0xc] sm:$0xf] }
  0x17   : > { %v277_v22 = vor.u32 %v276_v15, %v272_v7  ;;  %v290_v40 = vsel %vm270_vm2, %v285_v34, %v289_v35  ;;  %v335_v45 = vshll.u32 %v3201_v38, 16  ;;  %v297_v46 = vrot.slane %v295_v39, 1  ;;  %v3281_v24 = vld [vmem:[%s3143_s23 + $0x10] sm:$0xff]  }
  0x18   : > { %v322_v33 = vsel %vm270_vm2, %v317_v28, %v321_v25  ;;  %v330_v43 = vsel %vm270_vm2, %v325_v36, %v329_v37  ;;  %v293_v48 = vor.u32 %v291_v41, %v289_v35  ;;  %v632_v49 = vrot.slane %v3201_v38, 1  ;;  %v3289_v28 = vld [vmem:[%s3143_s23 + $0x18] sm:$0xff]   ;;  %v3313_v35 = vld [vmem:[%s3143_s23 + $0x20] sm:$0xff]  }
  0x19   : > { %v282_v27 = vsel %vm270_vm2, %v277_v22, %v281_v16  ;;  %2714 = vmatmul.mubr.msk.bf16.vlgmr.msra.gmra.mxu1 %vm347_vm3, %v322_v33  ;;  %v634_v50 = vrot.slane %v3055_v42, 1  ;;  %v333_v51 = vor.u32 %v331_v44, %v329_v37  ;;  %v337_v52 = vrot.slane %v335_v45, 1  ;;  %v1279_v22 = vld [vmem:[%s3143_s23 + $0x8] sm:$0xc]  ;;  %v3345_v45 = vld [vmem:[%s3143_s23 + $0x30] sm:$0xff]  }
  0x1a   : > { %2694 = vmatmul.mubr.msk.bf16.vlgmr.msra.gmra.mxu0 %vm347_vm3, %v282_v27  ;;  %2730 = vmatpush3.bf16.msra.mxu1 %v503_v31  ;;  %v298_v54 = vsel %vm270_vm2, %v293_v48, %v297_v46  ;;  %v299_v55 = vshrl.u32 %v3191_v32, 16  ;;  %v303_v56 = vshll.u32 %v3213_v47, 16  ;;  %v339_v58 = vshrl.u32 %v3201_v38, 16 }
  0x1b   : > { %2768 = vmatpush3.bf16.msra.mxu0 %v664_v26  ;;  %2697 = vmatprep.mubr.msk.bf16.mxu0 %vm3090_vm1, %v3089_v1  ;;  %v3224_v53 = vsel %vm616_vm4, %v632_v49, %v634_v50  ;;  %v338_v57 = vsel %vm270_vm2, %v333_v51, %v337_v52  ;;  %v343_v59 = vshll.u32 %v3055_v42, 16  ;;  %v307_v2 = vshrl.u32 %v3213_v47, 16  ;;  %v789_v50 = vld [vmem:[%s3143_s23 + $0x8] sm:$0xe] }
  0x1c   : > { %2843 = vmatprep.subr.bf16.mxu0 %v3089_v1  ;;  %2717 = vmatprep.mubr.msk.bf16.mxu1 %vm3090_vm1, %v3089_v1  ;;  %v301_v60 = vor.u32 %v299_v55, %v297_v46  ;;  %v305_v61 = vrot.slane %v303_v56, 1  ;;  %v341_v62 = vor.u32 %v339_v58, %v337_v52  ;;  %v2414_v15 = vcombine.low %v610_v8, %v3147_v4  ;;  %v2444_v4 = vld [vmem:[%s4010_s1 + $0x8] sm:$0x3] }
  0x1d   : > { %2805 = vmatprep.subr.bf16.mxu1 %v3089_v1  ;;  %v345_v63 = vrot.slane %v343_v59, 1  ;;  %v905_v16 = vsel %vm375_vm0, %v2424_v12, 0  ;;  %v618_v18 = vrot.slane %v3153_v6, 1  ;;  %v1154_v20 = vsel %vm375_vm0, %v2444_v4, 0 }
  0x1e   : > { %v306_v0 = vsel %vm270_vm2, %v301_v60, %v305_v61  ;;  %v309_v7 = vor.u32 %v307_v2, %v305_v61  ;;  %v617_v17 = vrot.slane %v2414_v15, 1  ;;  %v2456_v25 = vcombine.low %v1279_v22, %v790_v21 }
  0x1f   : > { %v346_v3 = vsel %vm270_vm2, %v341_v62, %v345_v63  ;;  %v1287_v27 = vrot.slane %v3281_v24, 2  ;;  %v1289_v30 = vrot.slane %v3289_v28, 2  ;;  %v624_v34 = vrot.slane %v3213_v47, 1 }
  0x20   : > { %v314_v9 = vsel %vm270_vm2, %v309_v7, %v3180_v23  ;;  %v619_v19 = vsel %vm616_vm4, %v617_v17, %v618_v18  ;;  %v1286_v26 = vrot.slane %v2456_v25, 2  ;;  %v1291_v36 = vrot.slane %v3313_v35, 2  ;;  %v2466_v7 = vld [vmem:[%s4010_s1 + $0xc] sm:$0x3] }
  0x21   : > { %2718 = vmatmul.mubr.msk.bf16.gmra.mxu1 %vm347_vm3, %v330_v43  ;;  %v3301_v33 = vsel %vm1285_vm5, %v1287_v27, %v1289_v30  ;;  %v626_v37 = vrot.slane %v3159_v10, 1  ;;  %v628_v42 = vrot.slane %v3162_v11, 1  ;;  %v1295_v46 = vrot.slane %v3345_v45, 2 }
  0x22   : > { %2698 = vmatmul.mubr.msk.bf16.gmra.mxu0 %vm347_vm3, %v290_v40  ;;  %2721 = vmatprep.mubr.msk.bf16.mxu1 %vm3090_vm1, %v3089_v1  ;;  %v3292_v29 = vsel %vm1285_vm5, %v1286_v26, %v1287_v27  ;;  %v3321_v39 = vsel %vm1285_vm5, %v1289_v30, %v1291_v36  ;;  %v3329_v40 = vld [vmem:[%s3143_s23 + $0x28] sm:$0xff]   ;;  %v2425_v51 = vcombine.low %v789_v50, %v790_v21  ;;  %v1046_v55 = vshrl.u32 %v3281_v24, 16 }
  0x23   : > { %2701 = vmatprep.mubr.msk.bf16.mxu0 %vm3090_vm1, %v3089_v1  ;;  %v1293_v41 = vrot.slane %v3329_v40, 2  ;;  %v629_v44 = vsel %vm616_vm4, %v626_v37, %v628_v42  ;;  %v1055_v2 = vshrl.u32 %v3289_v28, 16  ;;  %v1574_v15 = vsel %vm375_vm0, %v2466_v7, 0  ;;  %v3481_v7 = vld [vmem:[%s3143_s23 + $0x50] ss:$0 sps:$4 sm:$0x33]  }
  0x24   : > { %v1038_v52 = vshrl.u32 %v2425_v51, 16  ;;  %v858_v56 = vrot.slane %v2425_v51, 1  ;;  %v1048_v60 = vrot.slane %v1046_v55, 1  ;;  %v1067_v4 = vshll.u32 %v3313_v35, 16 }
  0x25   : > { %v3337_v43 = vsel %vm1285_vm5, %v1291_v36, %v1293_v41  ;;  %v1076_v25 = vshll.u32 %v3329_v40, 16  ;;  %v865_v26 = vrot.slane %v3329_v40, 1 }
  0x26   : > { %v1040_v58 = vrot.slane %v1038_v52, 1  ;;  %v1069_v21 = vrot.slane %v1067_v4, 2 }
  0x29   : > { %2722 = vmatmul.mubr.msk.bf16.gmra.mxu1 %vm347_vm3, %v338_v57  ;;  %v2455_v57 = vld [vmem:[%s4010_s1 + $0xa] sm:$0x3] }
  0x2a   : > { %2702 = vmatmul.mubr.msk.bf16.gmra.mxu0 %vm347_vm3, %v298_v54  ;;  %2725 = vmatprep.mubr.msk.bf16.mxu1 %vm3090_vm1, %v3089_v1  ;;  %v1041_v54 = vshll.u32 %v2425_v51, 16 }
  0x2b   : > { %2705 = vmatprep.mubr.msk.bf16.mxu0 %vm3090_vm1, %v3089_v1 }
  0x2c   : > { %v1043_v59 = vrot.slane %v1041_v54, 2  ;;  %v3454_v54 = vld [vmem:[%s3143_s23 + $0x40] sm:$0xff]  }
  0x2e   : > { %v1044_v63 = vor.u32 %v1043_v59, %v1040_v58 }
  0x31   : > { %2726 = vmatmul.mubr.msk.bf16.gmra.mxu1 %vm347_vm3, %v346_v3  ;;  %v1058_v3 = vshll.u32 %v3289_v28, 16 }
  0x32   : > { %2706 = vmatmul.mubr.msk.bf16.gmra.mxu0 %vm347_vm3, %v306_v0  ;;  %2731 = vmatprep.mubr.msk.bf16.mxu1 %vm3090_vm1, %v3089_v1 }
  0x33   : > { %2709 = vmatprep.mubr.msk.bf16.mxu0 %vm3090_vm1, %v3089_v1  ;;  %v1060_v12 = vrot.slane %v1058_v3, 2 }
  0x39   : > { %2732 = vmatmul.mubr.msk.bf16.vlgmr.msra.gmra.mxu1 %vm347_vm3, %v3150_v5  ;;  %v620_v5 = vrot.slane %v3168_v13, 1 }
  0x3a   : > { %2710 = vmatmul.mubr.msk.bf16.gmra.mxu0 %vm347_vm3, %v314_v9  ;;  %2806 = vmatpush3.bf16.msra.mxu1 %v905_v16  ;;  %v1057_v9 = vrot.slane %v1055_v2, 1 }
  0x3b   : > { %2769 = vmatprep.mubr.msk.bf16.mxu0 %vm3090_vm1, %v3089_v1  ;;  %2735 = vmatprep.mubr.msk.bf16.mxu1 %vm3090_vm1, %v3089_v1  ;;  %v621_v23 = vsel %vm616_vm4, %v618_v18, %v620_v5  ;;  %v1064_v18 = vshrl.u32 %v3313_v35, 16 }
  0x3c   : > { %2881 = vmatprep.subr.bf16.mxu1 %v3089_v1  ;;  %v1061_v17 = vor.u32 %v1060_v12, %v1057_v9  ;;  %v3066_v9 = vld [vmem:[%s3143_s23 + $0x50] ss:$0 sps:$4 sm:$0x11]  }
  0x41   : > { %2736 = vmatmul.mubr.msk.bf16.gmra.mxu1 %vm347_vm3, %v3153_v6  ;;  %v622_v6 = vrot.slane %v3191_v32, 1 }
  0x42   : > { %2770 = vmatmul.mubr.msk.bf16.vlgmr.msra.gmra.mxu0 %vm347_vm3, %v619_v19  ;;  %2739 = vmatprep.mubr.msk.bf16.mxu1 %vm3090_vm1, %v3089_v1  ;;  %v863_v19 = vrot.slane %v3313_v35, 1  ;;  %v867_v35 = vrot.slane %v3345_v45, 1 }
  0x43   : > { %2844 = vmatpush3.bf16.msra.mxu0 %v1154_v20  ;;  %2773 = vmatprep.mubr.msk.bf16.mxu0 %vm3090_vm1, %v3089_v1  ;;  %v623_v31 = vsel %vm616_vm4, %v620_v5, %v622_v6  ;;  %v1066_v5 = vrot.slane %v1064_v18, 1 }
  0x44   : > { %2919 = vmatprep.subr.bf16.mxu0 %v3089_v1  ;;  %v866_v30 = vsel %vm616_vm4, %v863_v19, %v865_v26 }
  0x49   : > { %2740 = vmatmul.mubr.msk.bf16.gmra.mxu1 %vm347_vm3, %v3168_v13  ;;  %v625_v13 = vsel %vm616_vm4, %v622_v6, %v624_v34 }
  0x4a   : > { %2774 = vmatmul.mubr.msk.bf16.gmra.mxu0 %vm347_vm3, %v621_v23  ;;  %2743 = vmatprep.mubr.msk.bf16.mxu1 %vm3090_vm1, %v3089_v1  ;;  %v1070_v23 = vor.u32 %v1069_v21, %v1066_v5  ;;  %v1458_v21 = vld [vmem:[%s3143_s23 + $0x10] sm:$0xc] }
  0x4b   : > { %2777 = vmatprep.mubr.msk.bf16.mxu0 %vm3090_vm1, %v3089_v1 }
  0x4c   : > { %v1071_v27 = vsel %vm1036_vm6, %v1061_v17, %v1070_v23 }
  0x51   : > { %2744 = vmatmul.mubr.msk.bf16.gmra.mxu1 %vm347_vm3, %v3191_v32  ;;  %v627_v32 = vsel %vm616_vm4, %v624_v34, %v626_v37  ;;  %v1082_v34 = vshrl.u32 %v3345_v45, 16 }
  0x52   : > { %2778 = vmatmul.mubr.msk.bf16.gmra.mxu0 %vm347_vm3, %v623_v31  ;;  %2747 = vmatprep.mubr.msk.bf16.mxu1 %vm3090_vm1, %v3089_v1 }
  0x53   : > { %2781 = vmatprep.mubr.msk.bf16.mxu0 %vm3090_vm1, %v3089_v1  ;;  %v1084_v37 = vrot.slane %v1082_v34, 1  ;;  %v3530_v34 = vld [vmem:[%s3143_s23 + $0x20] sm:$0xff]  }
  0x59   : > { %2748 = vmatmul.mubr.msk.bf16.gmra.mxu1 %vm347_vm3, %v3213_v47  ;;  %v630_v47 = vrot.slane %v3171_v14, 1 }
  0x5a   : > { %2782 = vmatmul.mubr.msk.bf16.gmra.mxu0 %vm347_vm3, %v625_v13  ;;  %2751 = vmatprep.mubr.msk.bf16.mxu1 %vm3090_vm1, %v3089_v1  ;;  %v1085_v13 = vshll.u32 %v3345_v45, 16  ;;  %v1299_v45 = vrot.slane %v3454_v54, 2 }
  0x5b   : > { %2785 = vmatprep.mubr.msk.bf16.mxu0 %vm3090_vm1, %v3089_v1  ;;  %v631_v48 = vsel %vm616_vm4, %v628_v42, %v630_v47 }
  0x61   : > { %2752 = vmatmul.mubr.msk.bf16.gmra.mxu1 %vm347_vm3, %v3159_v10  ;;  %v3355_v10 = vsel %vm1285_vm5, %v1293_v41, %v1295_v46  ;;  %v3440_v41 = vld [vmem:[%s3143_s23 + $0x38] sm:$0xff]  }
  0x62   : > { %2786 = vmatmul.mubr.msk.bf16.gmra.mxu0 %vm347_vm3, %v627_v32  ;;  %2755 = vmatprep.mubr.msk.bf16.mxu1 %vm3090_vm1, %v3089_v1  ;;  %v1087_v32 = vrot.slane %v1085_v13, 2 }
  0x63   : > { %2789 = vmatprep.mubr.msk.bf16.mxu0 %vm3090_vm1, %v3089_v1 }
  0x64   : > { %v1088_v42 = vor.u32 %v1087_v32, %v1084_v37 }
  0x69   : > { %2756 = vmatmul.mubr.msk.bf16.gmra.mxu1 %vm347_vm3, %v3162_v11  ;;  %v633_v11 = vsel %vm616_vm4, %v630_v47, %v632_v49  ;;  %v859_v49 = vrot.slane %v3281_v24, 1  ;;  %v1094_v47 = vshll.u32 %v3440_v41, 16 }
  0x6a   : > { %2790 = vmatmul.mubr.msk.bf16.gmra.mxu0 %vm347_vm3, %v629_v44  ;;  %2759 = vmatprep.mubr.msk.bf16.mxu1 %vm3090_vm1, %v3089_v1  ;;  %v1091_v44 = vshrl.u32 %v3440_v41, 16 }
  0x6b   : > { %2793 = vmatprep.mubr.msk.bf16.mxu0 %vm3090_vm1, %v3089_v1  ;;  %v860_v62 = vsel %vm616_vm4, %v858_v56, %v859_v49  ;;  %v1096_v51 = vrot.slane %v1094_v47, 2  ;;  %v1103_v56 = vshll.u32 %v3454_v54, 16 }
  0x6d   : > { %v1105_v59 = vrot.slane %v1103_v56, 2 }
  0x71   : > { %2760 = vmatmul.mubr.msk.bf16.gmra.mxu1 %vm347_vm3, %v3171_v14  ;;  %v1049_v14 = vshll.u32 %v3281_v24, 16  ;;  %v1073_v24 = vshrl.u32 %v3329_v40, 16  ;;  %v868_v40 = vsel %vm616_vm4, %v865_v26, %v867_v35  ;;  %v3513_v26 = vld [vmem:[%s3143_s23 + $0x18] sm:$0xff]  }
  0x72   : > { %2794 = vmatmul.mubr.msk.bf16.gmra.mxu0 %vm347_vm3, %v631_v48  ;;  %2763 = vmatprep.mubr.msk.bf16.mxu1 %vm3090_vm1, %v3089_v1  ;;  %v869_v48 = vrot.slane %v3440_v41, 1 }
  0x73   : > { %2797 = vmatprep.mubr.msk.bf16.mxu0 %vm3090_vm1, %v3089_v1  ;;  %v1051_v61 = vrot.slane %v1049_v14, 2  ;;  %v1075_v6 = vrot.slane %v1073_v24, 1  ;;  %v1100_v14 = vshrl.u32 %v3454_v54, 16  ;;  %v2486_v24 = vld [vmem:[%s4010_s1 + $0xe] sm:$0x3] }
  0x74   : > { %v870_v52 = vsel %vm616_vm4, %v867_v35, %v869_v48 }
  0x75   : > { %v1052_v0 = vor.u32 %v1051_v61, %v1048_v60  ;;  %v1102_v58 = vrot.slane %v1100_v14, 1  ;;  %v3468_v61 = vld [vmem:[%s3143_s23 + $0x48] sm:$0xff]  }
  0x77   : > { %v1053_v8 = vsel %vm1036_vm6, %v1044_v63, %v1052_v0  ;;  %v1062_v20 = vsel %vm1036_vm6, %v1052_v0, %v1061_v17  ;;  %v1112_v63 = vshll.u32 %v3468_v61, 16  ;;  %v873_v0 = vrot.slane %v3468_v61, 1 }
  0x78   : > { %v875_v17 = vrot.slane %v3066_v9, 1  ;;  %v3602_v9 = vld [vmem:[%s3143_s23 + $0x40] sm:$0xff]  }
  0x79   : > { %2764 = vmatmul.mubr.msk.bf16.gmra.mxu1 %vm347_vm3, %v3201_v38  ;;  %v1333_v38 = vsel %vm375_vm0, %v2455_v57, 0 }
  0x7a   : > { %2798 = vmatmul.mubr.msk.bf16.gmra.mxu0 %vm347_vm3, %v633_v11  ;;  %2807 = vmatprep.mubr.msk.bf16.mxu1 %vm3090_vm1, %v3089_v1  ;;  %v1093_v11 = vrot.slane %v1091_v44, 1 }
  0x7b   : > { %2801 = vmatprep.mubr.msk.bf16.mxu0 %vm3090_vm1, %v3089_v1 }
  0x7c   : > { %v1097_v55 = vor.u32 %v1096_v51, %v1093_v11 }
  0x7e   : > { %v1098_v57 = vsel %vm1036_vm6, %v1088_v42, %v1097_v55 }
  0x81   : > { %2808 = vmatmul.mubr.msk.bf16.vlgmr.msra.gmra.mxu1 %vm347_vm3, %v860_v62  ;;  %v1106_v62 = vor.u32 %v1105_v59, %v1102_v58  ;;  %v3581_v58 = vld [vmem:[%s3143_s23 + $0x38] sm:$0xff]  }
  0x82   : > { %2802 = vmatmul.mubr.msk.bf16.gmra.mxu0 %vm347_vm3, %v3224_v53  ;;  %2882 = vmatpush3.bf16.msra.mxu1 %v1333_v38  ;;  %v861_v53 = vrot.slane %v3289_v28, 1  ;;  %v1078_v28 = vrot.slane %v1076_v25, 2  ;;  %v1109_v38 = vshrl.u32 %v3468_v61, 16 }
  0x83   : > { %2845 = vmatprep.mubr.msk.bf16.mxu0 %vm3090_vm1, %v3089_v1  ;;  %2811 = vmatprep.mubr.msk.bf16.mxu1 %vm3090_vm1, %v3089_v1  ;;  %v1107_v2 = vsel %vm1036_vm6, %v1097_v55, %v1106_v62 }
  0x84   : > { %2957 = vmatprep.subr.bf16.mxu1 %v3089_v1  ;;  %v862_v16 = vsel %vm616_vm4, %v859_v49, %v861_v53  ;;  %v864_v22 = vsel %vm616_vm4, %v861_v53, %v863_v19  ;;  %v1079_v31 = vor.u32 %v1078_v28, %v1075_v6  ;;  %v871_v49 = vrot.slane %v3454_v54, 1 }
  0x85   : > { %v1111_v3 = vrot.slane %v1109_v38, 1  ;;  %v1114_v53 = vrot.slane %v1112_v63, 2  ;;  %v1528_v28 = vrot.slane %v3513_v26, 2 }
  0x86   : > { %v1080_v36 = vsel %vm1036_vm6, %v1070_v23, %v1079_v31  ;;  %v1089_v50 = vsel %vm1036_vm6, %v1079_v31, %v1088_v42  ;;  %v872_v60 = vsel %vm616_vm4, %v869_v48, %v871_v49  ;;  %v3561_v48 = vld [vmem:[%s3143_s23 + $0x30] sm:$0xff]  }
  0x87   : > { %v1115_v12 = vor.u32 %v1114_v53, %v1111_v3 }
  0x89   : > { %2812 = vmatmul.mubr.msk.bf16.gmra.mxu1 %vm347_vm3, %v862_v16  ;;  %v1121_v16 = vshll.u32 %v3481_v7, 16  ;;  %v1116_v18 = vsel %vm1036_vm6, %v1106_v62, %v1115_v12 }
  0x8a   : > { %2846 = vmatmul.mubr.msk.bf16.vlgmr.msra.gmra.mxu0 %vm347_vm3, %v1053_v8  ;;  %2815 = vmatprep.mubr.msk.bf16.mxu1 %vm3090_vm1, %v3089_v1  ;;  %v874_v8 = vsel %vm616_vm4, %v871_v49, %v873_v0 }
  0x8b   : > { %2920 = vmatpush3.bf16.msra.mxu0 %v1574_v15  ;;  %2849 = vmatprep.mubr.msk.bf16.mxu0 %vm3090_vm1, %v3089_v1  ;;  %v1118_v15 = vshrl.u32 %v3481_v7, 16  ;;  %v1123_v19 = vrot.slane %v1121_v16, 2 }
  0x8c   : > { %2995 = vmatprep.subr.bf16.mxu0 %v3089_v1 }
  0x8d   : > { %v1120_v4 = vrot.slane %v1118_v15, 1 }
  0x8f   : > { %v1124_v5 = vor.u32 %v1123_v19, %v1120_v4 }
  0x91   : > { %2816 = vmatmul.mubr.msk.bf16.gmra.mxu1 %vm347_vm3, %v864_v22  ;;  %v3501_v22 = vld [vmem:[%s3143_s23 + $0x14] sm:$0xf]  ;;  %v1125_v23 = vsel %vm1036_vm6, %v1115_v12, %v1124_v5  ;;  %v3625_v5 = vld [vmem:[%s3143_s23 + $0x48] sm:$0xff]  }
  0x92   : > { %2850 = vmatmul.mubr.msk.bf16.gmra.mxu0 %vm347_vm3, %v1062_v20  ;;  %2819 = vmatprep.mubr.msk.bf16.mxu1 %vm3090_vm1, %v3089_v1  ;;  %v876_v20 = vsel %vm616_vm4, %v873_v0, %v875_v17  ;;  %v3510_v25 = vcombine.low %v1458_v21, %v3501_v22  ;;  %v1540_v54 = vrot.slane %v3625_v5, 2 }
  0x93   : > { %2853 = vmatprep.mubr.msk.bf16.mxu0 %vm3090_vm1, %v3089_v1 }
  0x94   : > { %v1527_v6 = vrot.slane %v3510_v25, 2 }
  0x96   : > { %v1529_v31 = vsel %vm1285_vm5, %v1527_v6, %v1528_v28 }
  0x99   : > { %2820 = vmatmul.mubr.msk.bf16.gmra.mxu1 %vm347_vm3, %v866_v30  ;;  %v2497_v30 = vld [vmem:[%s4010_s1 + $0x10] sm:$0x3] }
  0x9a   : > { %2854 = vmatmul.mubr.msk.bf16.gmra.mxu0 %vm347_vm3, %v1071_v27  ;;  %2823 = vmatprep.mubr.msk.bf16.mxu1 %vm3090_vm1, %v3089_v1  ;;  %v1823_v27 = vsel %vm375_vm0, %v2486_v24, 0  ;;  %v2002_v13 = vsel %vm375_vm0, %v2497_v30, 0 }
  0x9b   : > { %2857 = vmatprep.mubr.msk.bf16.mxu0 %vm3090_vm1, %v3089_v1 }
  0xa1   : > { %2824 = vmatmul.mubr.msk.bf16.gmra.mxu1 %vm347_vm3, %v868_v40 }
  0xa2   : > { %2858 = vmatmul.mubr.msk.bf16.gmra.mxu0 %vm347_vm3, %v1080_v36  ;;  %2827 = vmatprep.mubr.msk.bf16.mxu1 %vm3090_vm1, %v3089_v1  ;;  %v3543_v36 = vld [vmem:[%s3143_s23 + $0x28] sm:$0xff]  }
  0xa3   : > { %2861 = vmatprep.mubr.msk.bf16.mxu0 %vm3090_vm1, %v3089_v1  ;;  %v1532_v32 = vrot.slane %v3543_v36, 2 }
  0xa9   : > { %2828 = vmatmul.mubr.msk.bf16.gmra.mxu1 %vm347_vm3, %v870_v52 }
  0xaa   : > { %2862 = vmatmul.mubr.msk.bf16.gmra.mxu0 %vm347_vm3, %v1089_v50  ;;  %2831 = vmatprep.mubr.msk.bf16.mxu1 %vm3090_vm1, %v3089_v1 }
  0xab   : > { %2865 = vmatprep.mubr.msk.bf16.mxu0 %vm3090_vm1, %v3089_v1 }
  0xb1   : > { %2832 = vmatmul.mubr.msk.bf16.gmra.mxu1 %vm347_vm3, %v872_v60 }
  0xb2   : > { %2866 = vmatmul.mubr.msk.bf16.gmra.mxu0 %vm347_vm3, %v1098_v57  ;;  %2835 = vmatprep.mubr.msk.bf16.mxu1 %vm3090_vm1, %v3089_v1 }
  0xb3   : > { %2869 = vmatprep.mubr.msk.bf16.mxu0 %vm3090_vm1, %v3089_v1 }
  0xb9   : > { %2836 = vmatmul.mubr.msk.bf16.gmra.mxu1 %vm347_vm3, %v874_v8 }
  0xba   : > { %2870 = vmatmul.mubr.msk.bf16.gmra.mxu0 %vm347_vm3, %v1107_v2  ;;  %2839 = vmatprep.mubr.msk.bf16.mxu1 %vm3090_vm1, %v3089_v1  ;;  %v1297_v2 = vrot.slane %v3440_v41, 2  ;;  %v1538_v41 = vrot.slane %v3602_v9, 2 }
  0xbb   : > { %2873 = vmatprep.mubr.msk.bf16.mxu0 %vm3090_vm1, %v3089_v1 }
  0xbc   : > { %v1300_v24 = vsel %vm1285_vm5, %v1297_v2, %v1299_v45 }
  0xc1   : > { %2840 = vmatmul.mubr.msk.bf16.gmra.mxu1 %vm347_vm3, %v876_v20 }
  0xc2   : > { %2874 = vmatmul.mubr.msk.bf16.gmra.mxu0 %vm347_vm3, %v1116_v18  ;;  %2883 = vmatprep.mubr.msk.bf16.mxu1 %vm3090_vm1, %v3089_v1 }
  0xc3   : > { %2877 = vmatprep.mubr.msk.bf16.mxu0 %vm3090_vm1, %v3089_v1 }
  0xc9   : > { %2884 = vmatmul.mubr.msk.bf16.vlgmr.msra.gmra.mxu1 %vm347_vm3, %v3292_v29  ;;  %v1530_v29 = vrot.slane %v3530_v34, 2 }
  0xca   : > { %2878 = vmatmul.mubr.msk.bf16.gmra.mxu0 %vm347_vm3, %v1125_v23  ;;  %2958 = vmatpush3.bf16.msra.mxu1 %v1823_v27 }
  0xcb   : > { %2921 = vmatprep.mubr.msk.bf16.mxu0 %vm3090_vm1, %v3089_v1  ;;  %2887 = vmatprep.mubr.msk.bf16.mxu1 %vm3090_vm1, %v3089_v1  ;;  %v1531_v35 = vsel %vm1285_vm5, %v1528_v28, %v1530_v29  ;;  %v1533_v47 = vsel %vm1285_vm5, %v1530_v29, %v1532_v32 }
  0xd1   : > { %2888 = vmatmul.mubr.msk.bf16.gmra.mxu1 %vm347_vm3, %v3301_v33 }
  0xd2   : > { %2922 = vmatmul.mubr.msk.bf16.vlgmr.msra.gmra.mxu0 %vm347_vm3, %v1529_v31  ;;  %2891 = vmatprep.mubr.msk.bf16.mxu1 %vm3090_vm1, %v3089_v1 }
  0xd3   : > { %2996 = vmatpush3.bf16.msra.mxu0 %v2002_v13  ;;  %2925 = vmatprep.mubr.msk.bf16.mxu0 %vm3090_vm1, %v3089_v1  ;;  %v1301_v13 = vrot.slane %v3468_v61, 2 }
  0xd9   : > { %v3551_v40 = vpop.f32.mrf.mxu1  ;;  %2892 = vmatmul.mubr.msk.bf16.gmra.mxu1 %vm347_vm3, %v3321_v39  ;;  %v1534_v39 = vrot.slane %v3561_v48, 2 }
  0xda   : > { %v3545_v37 = vpop.f32.mrf.mxu0  ;;  %2926 = vmatmul.mubr.msk.bf16.gmra.mxu0 %vm347_vm3, %v1531_v35  ;;  %2895 = vmatprep.mubr.msk.bf16.mxu1 %vm3090_vm1, %v3089_v1 }
  0xdb   : > { %2929 = vmatprep.mubr.msk.bf16.mxu0 %vm3090_vm1, %v3089_v1  ;;  %v2715_v42 = vpop.f32.mrf.mxu1  ;;  %v1535_v57 = vsel %vm1285_vm5, %v1532_v32, %v1534_v39  ;;  %v1541_v32 = vsel %vm1285_vm5, %v1538_v41, %v1540_v54 }
  0xdc   : > { %v2695_v33 = vpop.f32.mrf.mxu0 }
  0xdd   : > { %v3563_v50 = vpop.f32.mrf.mxu1  ;;  %v3645_v33 = vld [vmem:[%s3143_s23 + $0x50] sm:$0xff]  }
  0xde   : > { %v3557_v44 = vpop.f32.mrf.mxu0  ;;  %v1542_v61 = vrot.slane %v3645_v33, 2 }
  0xdf   : > { %v2716_v51 = vpop.f32.mrf.mxu1 }
  0xe0   : > { %v2696_v11 = vpop.f32.mrf.mxu0  ;;  %v1302_v51 = vsel %vm1285_vm5, %v1299_v45, %v1301_v13 }
  0xe1   : > { %v3571_v55 = vpop.f32.mrf.mxu1  ;;  %2896 = vmatmul.mubr.msk.bf16.gmra.mxu1 %vm347_vm3, %v3337_v43  ;;  %v1536_v43 = vrot.slane %v3581_v58, 2 }
  0xe2   : > { %v3565_v52 = vpop.f32.mrf.mxu0  ;;  %2930 = vmatmul.mubr.msk.bf16.gmra.mxu0 %vm347_vm3, %v1533_v47  ;;  %2899 = vmatprep.mubr.msk.bf16.mxu1 %vm3090_vm1, %v3089_v1 }
  0xe3   : > { %2933 = vmatprep.mubr.msk.bf16.mxu0 %vm3090_vm1, %v3089_v1  ;;  %v2719_v56 = vpop.f32.mrf.mxu1  ;;  %v1537_v8 = vsel %vm1285_vm5, %v1534_v39, %v1536_v43  ;;  %v1539_v20 = vsel %vm1285_vm5, %v1536_v43, %v1538_v41  ;;  %v1303_v43 = vrot.slane %v3481_v7, 2 }
  0xe4   : > { %v2699_v14 = vpop.f32.mrf.mxu0 }
  0xe5   : > { %v3583_v59 = vpop.f32.mrf.mxu1  ;;  %v1304_v7 = vsel %vm1285_vm5, %v1301_v13, %v1303_v43 }
  0xe6   : > { %v3577_v49 = vpop.f32.mrf.mxu0 }
  0xe7   : > { %v2720_v62 = vpop.f32.mrf.mxu1 }
  0xe8   : > { %v2700_v60 = vpop.f32.mrf.mxu0 }
  0xe9   : > { %v3591_v63 = vpop.f32.mrf.mxu1  ;;  %2900 = vmatmul.mubr.msk.bf16.gmra.mxu1 %vm347_vm3, %v3355_v10  ;;  %v1298_v10 = vsel %vm1285_vm5, %v1295_v46, %v1297_v2  ;;  %v1710_v60 = vshll.u32 %v3510_v25, 16  ;;  %v1718_v2 = vshll.u32 %v3513_v26, 16 }
  0xea   : > { %v3585_v38 = vpop.f32.mrf.mxu0  ;;  %2934 = vmatmul.mubr.msk.bf16.gmra.mxu0 %vm347_vm3, %v1535_v57  ;;  %2903 = vmatprep.mubr.msk.bf16.mxu1 %vm3090_vm1, %v3089_v1 }
  0xeb   : > { %2937 = vmatprep.mubr.msk.bf16.mxu0 %vm3090_vm1, %v3089_v1  ;;  %v2723_v3 = vpop.f32.mrf.mxu1 }
  0xec   : > { %v2703_v0 = vpop.f32.mrf.mxu0 }
  0xed   : > { %v3604_v12 = vpop.f32.mrf.mxu1  ;;  %v1715_v0 = vshrl.u32 %v3513_v26, 16 }
  0xee   : > { %v3598_v53 = vpop.f32.mrf.mxu0 }
  0xef   : > { %v2724_v16 = vpop.f32.mrf.mxu1 }
  0xf0   : > { %v2704_v15 = vpop.f32.mrf.mxu0  ;;  %v3078_v16 = vld [vmem:[%s3143_s23 + $0x58] ss:$0 sps:$4 sm:$0x33]  }
  0xf1   : > { %v3615_v18 = vpop.f32.mrf.mxu1  ;;  %2904 = vmatmul.mubr.msk.bf16.gmra.mxu1 %vm347_vm3, %v1298_v10  ;;  %v1543_v10 = vsel %vm1285_vm5, %v1540_v54, %v1542_v61  ;;  %v1544_v54 = vrot.slane %v3078_v16, 2  ;;  %v1733_v16 = vshrl.u32 %v3543_v36, 16 }
  0xf2   : > { %v3609_v17 = vpop.f32.mrf.mxu0  ;;  %2938 = vmatmul.mubr.msk.bf16.gmra.mxu0 %vm347_vm3, %v1537_v8  ;;  %2907 = vmatprep.mubr.msk.bf16.mxu1 %vm3090_vm1, %v3089_v1 }
  0xf3   : > { %2941 = vmatprep.mubr.msk.bf16.mxu0 %vm3090_vm1, %v3089_v1  ;;  %v2727_v46 = vpop.f32.mrf.mxu1 }
  0xf4   : > { %v2707_v4 = vpop.f32.mrf.mxu0  ;;  %v1717_v46 = vrot.slane %v1715_v0, 2 }
  0xf5   : > { %v3627_v21 = vpop.f32.mrf.mxu1 }
  0xf6   : > { %v3621_v19 = vpop.f32.mrf.mxu0 }
  0xf7   : > { %v2728_v27 = vpop.f32.mrf.mxu1 }
  0xf8   : > { %v2708_v23 = vpop.f32.mrf.mxu0 }
  0xf9   : > { %v539_v28 = vpop.f32.mrf.mxu1  ;;  %2908 = vmatmul.mubr.msk.bf16.gmra.mxu1 %vm347_vm3, %v1300_v24 }
  0xfa   : > { %v3630_v6 = vpop.f32.mrf.mxu0  ;;  %2942 = vmatmul.mubr.msk.bf16.gmra.mxu0 %vm347_vm3, %v1539_v20  ;;  %v540_v31 = vadd.f32 %v539_v28, %v3545_v37  ;;  %2911 = vmatprep.mubr.msk.bf16.mxu1 %vm3090_vm1, %v3089_v1  ;;  %v1720_v20 = vrot.slane %v1718_v2, 3 }
  0xfb   : > { %2945 = vmatprep.mubr.msk.bf16.mxu0 %vm3090_vm1, %v3089_v1  ;;  %v2733_v29 = vpop.f32.mrf.mxu1 }
  0xfc   : > { %v2711_v30 = vpop.f32.mrf.mxu0  ;;  %v1721_v29 = vor.u32 %v1720_v20, %v1717_v46  ;;  %v1735_v20 = vrot.slane %v1733_v16, 2 }
  0xfd   : > { %v542_v42 = vpop.f32.mrf.mxu1 }
  0xfe   : > { %v3641_v35 = vpop.f32.mrf.mxu0  ;;  %v543_v11 = vadd.f32 %v542_v42, %v3557_v44  ;;  %v1707_v44 = vshrl.u32 %v3510_v25, 16  ;;  %v1727_v42 = vshll.u32 %v3530_v34, 16 }
  0xff   : > { %v2734_v39 = vpop.f32.mrf.mxu1 }
 0x100   : > { %v2712_v47 = vpop.f32.mrf.mxu0  ;;  %v1709_v4 = vrot.slane %v1707_v44, 2  ;;  %v1545_v39 = vsel %vm1285_vm5, %v1542_v61, %v1544_v54 }
 0x101   : > { %v547_v56 = vpop.f32.mrf.mxu1  ;;  %2912 = vmatmul.mubr.msk.bf16.gmra.mxu1 %vm347_vm3, %v1302_v51 }
 0x102   : > { %v700_v37 = vpop.f32.mrf.mxu0  ;;  %2946 = vmatmul.mubr.msk.bf16.gmra.mxu0 %vm347_vm3, %v1541_v32  ;;  %v548_v62 = vadd.f32 %v547_v56, %v3565_v52  ;;  %2915 = vmatprep.mubr.msk.bf16.mxu1 %vm3090_vm1, %v3089_v1  ;;  %v1712_v52 = vrot.slane %v1710_v60, 3  ;;  %v1724_v32 = vshrl.u32 %v3530_v34, 16 }
 0x103   : > { %v3650_v14 = vadd.f32 %v700_v37, %v540_v31  ;;  %2949 = vmatprep.mubr.msk.bf16.mxu0 %vm3090_vm1, %v3089_v1  ;;  %v2737_v3 = vpop.f32.mrf.mxu1 }
 0x104   : > { %v2771_v57 = vpop.f32.mrf.mxu0  ;;  %v1713_v31 = vor.u32 %v1712_v52, %v1709_v4  ;;  %v1726_v60 = vrot.slane %v1724_v32, 2  ;;  %v1745_v32 = vshll.u32 %v3561_v48, 16 }
 0x105   : > { %v550_v41 = vpop.f32.mrf.mxu1 }
 0x106   : > { %v703_v8 = vpop.f32.mrf.mxu0  ;;  %v551_v45 = vadd.f32 %v550_v41, %v3577_v49  ;;  %v1948_v49 = vld [vmem:[%s3143_s23 + $0x10] sm:$0x8]  ;;  %v1722_v44 = vsel %vm1705_vm7, %v1713_v31, %v1721_v29  ;;  %v1736_v41 = vshll.u32 %v3543_v36, 16 }
 0x107   : > { %v3664_v15 = vadd.f32 %v703_v8, %v543_v11  ;;  %v2738_v23 = vpop.f32.mrf.mxu1  ;;  %v2498_v37 = vcombine.low %v1948_v49, %v3501_v22  ;;  %v1956_v22 = vrot.slane %v3513_v26, 3 }
 0x108   : > { %v2772_v25 = vpop.f32.mrf.mxu0  ;;  %v1738_v23 = vrot.slane %v1736_v41, 3 }
 0x109   : > { %v555_v28 = vpop.f32.mrf.mxu1  ;;  %2916 = vmatmul.mubr.msk.bf16.gmra.mxu1 %vm347_vm3, %v1304_v7  ;;  %v1955_v61 = vrot.slane %v2498_v37, 3 }
 0x10a   : > { %v708_v24 = vpop.f32.mrf.mxu0  ;;  %2950 = vmatmul.mubr.msk.bf16.gmra.mxu0 %vm347_vm3, %v1543_v10  ;;  %v556_v13 = vadd.f32 %v555_v28, %v3585_v38  ;;  %2959 = vmatprep.mubr.msk.bf16.mxu1 %vm3090_vm1, %v3089_v1 }
 0x10b   : > { %v3671_v27 = vadd.f32 %v708_v24, %v548_v62  ;;  %2953 = vmatprep.mubr.msk.bf16.mxu0 %vm3090_vm1, %v3089_v1  ;;  %v2741_v47 = vpop.f32.mrf.mxu1  ;;  %v1729_v62 = vrot.slane %v1727_v42, 3  ;;  %v1957_v26 = vsel %vm1954_vm8, %v1955_v61, %v1956_v22 }
 0x10c   : > { %v2775_v30 = vpop.f32.mrf.mxu0 }
 0x10d   : > { %v558_v56 = vpop.f32.mrf.mxu1  ;;  %v1730_v10 = vor.u32 %v1729_v62, %v1726_v60  ;;  %v1958_v30 = vrot.slane %v3530_v34, 3 }
 0x10e   : > { %v711_v11 = vpop.f32.mrf.mxu0  ;;  %v559_v38 = vadd.f32 %v558_v56, %v3598_v53 }
 0x10f   : > { %v3682_v51 = vadd.f32 %v711_v11, %v551_v45  ;;  %v2742_v43 = vpop.f32.mrf.mxu1  ;;  %v1959_v34 = vsel %vm1954_vm8, %v1956_v22, %v1958_v30  ;;  %v1751_v22 = vshrl.u32 %v3581_v58, 16 }
 0x110   : > { %v2776_v57 = vpop.f32.mrf.mxu0  ;;  %v1960_v43 = vrot.slane %v3543_v36, 3 }
 0x111   : > { %v563_v3 = vpop.f32.mrf.mxu1  ;;  %2960 = vmatmul.mubr.msk.bf16.vlgmr.msra.gmra.mxu1 %vm347_vm3, %v1722_v44 }
 0x112   : > { %v716_v0 = vpop.f32.mrf.mxu0  ;;  %2954 = vmatmul.mubr.msk.bf16.gmra.mxu0 %vm347_vm3, %v1545_v39  ;;  %v564_v8 = vadd.f32 %v563_v3, %v3609_v17  ;;  %2963 = vmatprep.mubr.msk.bf16.mxu1 %vm3090_vm1, %v3089_v1  ;;  %v1731_v17 = vsel %vm1705_vm7, %v1721_v29, %v1730_v10  ;;  %v1742_v29 = vshrl.u32 %v3561_v48, 16  ;;  %v1754_v3 = vshll.u32 %v3581_v58, 16 }
 0x113   : > { %v3689_v2 = vadd.f32 %v716_v0, %v556_v13  ;;  %2997 = vmatprep.mubr.msk.bf16.mxu0 %vm3090_vm1, %v3089_v1  ;;  %v2745_v25 = vpop.f32.mrf.mxu1  ;;  %v1739_v13 = vor.u32 %v1738_v23, %v1735_v20  ;;  %v1961_v16 = vsel %vm1954_vm8, %v1958_v30, %v1960_v43  ;;  %v1962_v20 = vrot.slane %v3561_v48, 3 }
 0x114   : > { %v2779_v53 = vpop.f32.mrf.mxu0  ;;  %v1744_v57 = vrot.slane %v1742_v29, 2  ;;  %v1760_v30 = vshrl.u32 %v3602_v9, 16 }
 0x115   : > { %v566_v45 = vpop.f32.mrf.mxu1  ;;  %v1963_v48 = vsel %vm1954_vm8, %v1960_v43, %v1962_v20  ;;  %v1772_v43 = vshll.u32 %v3625_v5, 16 }
 0x116   : > { %v719_v4 = vpop.f32.mrf.mxu0  ;;  %v567_v46 = vadd.f32 %v566_v45, %v3621_v19  ;;  %v1756_v45 = vrot.slane %v1754_v3, 3 }
 0x117   : > { %v3700_v52 = vadd.f32 %v719_v4, %v559_v38  ;;  %v2746_v24 = vpop.f32.mrf.mxu1  ;;  %v1747_v38 = vrot.slane %v1745_v32, 3 }
 0x118   : > { %v2780_v7 = vpop.f32.mrf.mxu0 }
 0x119   : > { %v571_v31 = vpop.f32.mrf.mxu1  ;;  %2964 = vmatmul.mubr.msk.bf16.gmra.mxu1 %vm347_vm3, %v1731_v17 }
 0x11a   : > { %v724_v54 = vpop.f32.mrf.mxu0  ;;  %2998 = vmatmul.mubr.msk.bf16.vlgmr.msra.gmra.mxu0 %vm347_vm3, %v1957_v26  ;;  %v572_v19 = vadd.f32 %v571_v31, %v3630_v6  ;;  %2967 = vmatprep.mubr.msk.bf16.mxu1 %vm3090_vm1, %v3089_v1  ;;  %v1740_v6 = vsel %vm1705_vm7, %v1730_v10, %v1739_v13  ;;  %v1753_v26 = vrot.slane %v1751_v22, 2  ;;  %v1763_v31 = vshll.u32 %v3602_v9, 16 }
 0x11b   : > { %v3706_v28 = vadd.f32 %v724_v54, %v564_v8  ;;  %3001 = vmatprep.mubr.msk.bf16.mxu0 %vm3090_vm1, %v3089_v1  ;;  %v2749_v42 = vpop.f32.mrf.mxu1 }
 0x11c   : > { %v2783_v49 = vpop.f32.mrf.mxu0  ;;  %v1757_v54 = vor.u32 %v1756_v45, %v1753_v26 }
 0x11d   : > { %v574_v39 = vpop.f32.mrf.mxu1 }
 0x11e   : > { %v727_v47 = vpop.f32.mrf.mxu0  ;;  %v575_v56 = vadd.f32 %v574_v39, %v3641_v35  ;;  %v1748_v35 = vor.u32 %v1747_v38, %v1744_v57 }
 0x11f   : > { %v3717_v11 = vadd.f32 %v727_v47, %v567_v46  ;;  %v2750_v44 = vpop.f32.mrf.mxu1  ;;  %v1762_v47 = vrot.slane %v1760_v30, 2 }
 0x120   : > { %v2784_v37 = vpop.f32.mrf.mxu0  ;;  %v1749_v4 = vsel %vm1705_vm7, %v1739_v13, %v1748_v35 }
 0x121   : > { %v579_v0 = vpop.f32.mrf.mxu1  ;;  %2968 = vmatmul.mubr.msk.bf16.gmra.mxu1 %vm347_vm3, %v1740_v6  ;;  %v1964_v6 = vrot.slane %v3581_v58, 3 }
 0x122   : > { %v732_v60 = vpop.f32.mrf.mxu0  ;;  %3002 = vmatmul.mubr.msk.bf16.gmra.mxu0 %vm347_vm3, %v1959_v34  ;;  %2971 = vmatprep.mubr.msk.bf16.mxu1 %vm3090_vm1, %v3089_v1  ;;  %v580_v25 = vadd.f32 %v579_v0, %v3551_v40  ;;  %v1765_v34 = vrot.slane %v1763_v31, 3 }
 0x123   : > { %v3723_v62 = vadd.f32 %v732_v60, %v572_v19  ;;  %3005 = vmatprep.mubr.msk.bf16.mxu0 %vm3090_vm1, %v3089_v1  ;;  %v2753_v53 = vpop.f32.mrf.mxu1  ;;  %v1769_v60 = vshrl.u32 %v3625_v5, 16  ;;  %v1965_v58 = vsel %vm1954_vm8, %v1962_v20, %v1964_v6 }
 0x124   : > { %v2787_v61 = vpop.f32.mrf.mxu0  ;;  %v1766_v44 = vor.u32 %v1765_v34, %v1762_v47 }
 0x125   : > { %v582_v41 = vpop.f32.mrf.mxu1 }
 0x126   : > { %v735_v8 = vpop.f32.mrf.mxu0  ;;  %v583_v40 = vadd.f32 %v582_v41, %v3563_v50  ;;  %v1758_v50 = vsel %vm1705_vm7, %v1748_v35, %v1757_v54 }
 0x127   : > { %v3733_v10 = vadd.f32 %v735_v8, %v575_v56  ;;  %v2754_v7 = vpop.f32.mrf.mxu1  ;;  %v1771_v8 = vrot.slane %v1769_v60, 2 }
 0x128   : > { %v2788_v36 = vpop.f32.mrf.mxu0  ;;  %v1781_v7 = vshll.u32 %v3645_v33, 16 }
 0x129   : > { %v587_v23 = vpop.f32.mrf.mxu1  ;;  %2972 = vmatmul.mubr.msk.bf16.gmra.mxu1 %vm347_vm3, %v1749_v4  ;;  %v1966_v4 = vrot.slane %v3602_v9, 3 }
 0x12a   : > { %v740_v46 = vpop.f32.mrf.mxu0  ;;  %3006 = vmatmul.mubr.msk.bf16.gmra.mxu0 %vm347_vm3, %v1961_v16  ;;  %2975 = vmatprep.mubr.msk.bf16.mxu1 %vm3090_vm1, %v3089_v1  ;;  %v588_v42 = vadd.f32 %v587_v23, %v3571_v55  ;;  %v1774_v16 = vrot.slane %v1772_v43, 3 }
 0x12b   : > { %v3739_v17 = vadd.f32 %v740_v46, %v580_v25  ;;  %3009 = vmatprep.mubr.msk.bf16.mxu0 %vm3090_vm1, %v3089_v1  ;;  %v2757_v49 = vpop.f32.mrf.mxu1  ;;  %v1967_v9 = vsel %vm1954_vm8, %v1964_v6, %v1966_v4 }
 0x12c   : > { %v2791_v24 = vpop.f32.mrf.mxu0  ;;  %v1775_v20 = vor.u32 %v1774_v16, %v1771_v8  ;;  %v1783_v49 = vrot.slane %v1781_v7, 3 }
 0x12d   : > { %v590_v29 = vpop.f32.mrf.mxu1 }
 0x12e   : > { %v743_v19 = vpop.f32.mrf.mxu0  ;;  %v591_v55 = vadd.f32 %v590_v29, %v3583_v59  ;;  %v1767_v59 = vsel %vm1705_vm7, %v1757_v54, %v1766_v44  ;;  %v3080_v29 = vld [vmem:[%s3143_s23 + $0x58] ss:$0 sps:$4 sm:$0x77]   ;;  %s3950_s23 = scalar_lea.vmem %s4013_s4, %s2383_s16 }
 0x12f   : > { %v3750_v13 = vadd.f32 %v743_v19, %v583_v40  ;;  %v2758_v39 = vpop.f32.mrf.mxu1  ;;  %v1787_v6 = vshrl.u32 %v3080_v29, 16 }
 0x130   : > { %v2792_v32 = vpop.f32.mrf.mxu0 }
 0x131   : > { %v595_v57 = vpop.f32.mrf.mxu1  ;;  %2976 = vmatmul.mubr.msk.bf16.gmra.mxu1 %vm347_vm3, %v1758_v50  ;;  %v1968_v50 = vrot.slane %v3625_v5, 3 }
 0x132   : > { %v748_v37 = vpop.f32.mrf.mxu0  ;;  %3010 = vmatmul.mubr.msk.bf16.gmra.mxu0 %vm347_vm3, %v1963_v48  ;;  %2979 = vmatprep.mubr.msk.bf16.mxu1 %vm3090_vm1, %v3089_v1  ;;  %v596_v53 = vadd.f32 %v595_v57, %v3591_v63  ;;  %v1778_v63 = vshrl.u32 %v3645_v33, 16  ;;  %v1776_v48 = vsel %vm1705_vm7, %v1766_v44, %v1775_v20  ;;  %v1790_v57 = vshll.u32 %v3080_v29, 16 }
 0x133   : > { %v3756_v56 = vadd.f32 %v748_v37, %v588_v42  ;;  %3013 = vmatprep.mubr.msk.bf16.mxu0 %vm3090_vm1, %v3089_v1  ;;  %v2761_v0 = vpop.f32.mrf.mxu1  ;;  %v1969_v5 = vsel %vm1954_vm8, %v1966_v4, %v1968_v50 }
 0x134   : > { %v2795_v38 = vpop.f32.mrf.mxu0  ;;  %v1780_v31 = vrot.slane %v1778_v63, 2 }
 0x135   : > { %v598_v22 = vpop.f32.mrf.mxu1 }
 0x136   : > { %v751_v61 = vpop.f32.mrf.mxu0  ;;  %v599_v46 = vadd.f32 %v598_v22, %v3604_v12  ;;  %v1784_v39 = vor.u32 %v1783_v49, %v1780_v31 }
 0x137   : > { %v3767_v35 = vadd.f32 %v751_v61, %v591_v55  ;;  %v2762_v41 = vpop.f32.mrf.mxu1 }
 0x138   : > { %v2796_v3 = vpop.f32.mrf.mxu0  ;;  %v1785_v61 = vsel %vm1705_vm7, %v1775_v20, %v1784_v39 }
 0x139   : > { %v603_v26 = vpop.f32.mrf.mxu1  ;;  %2980 = vmatmul.mubr.msk.bf16.gmra.mxu1 %vm347_vm3, %v1767_v59 }
 0x13a   : > { %v756_v36 = vpop.f32.mrf.mxu0  ;;  %3014 = vmatmul.mubr.msk.bf16.gmra.mxu0 %vm347_vm3, %v1965_v58  ;;  %2983 = vmatprep.mubr.msk.bf16.mxu1 %vm3090_vm1, %v3089_v1  ;;  %v604_v19 = vadd.f32 %v603_v26, %v3615_v18  ;;  %v1792_v58 = vrot.slane %v1790_v57, 3 }
 0x13b   : > { %v3773_v25 = vadd.f32 %v756_v36, %v596_v53  ;;  %3017 = vmatprep.mubr.msk.bf16.mxu0 %vm3090_vm1, %v3089_v1  ;;  %v2765_v23 = vpop.f32.mrf.mxu1  ;;  %v1970_v53 = vrot.slane %v3645_v33, 3 }
 0x13c   : > { %v2799_v45 = vpop.f32.mrf.mxu0  ;;  %v1972_v23 = vrot.slane %v3080_v29, 3 }
 0x13d   : > { %v606_v54 = vpop.f32.mrf.mxu1  ;;  %v1971_v26 = vsel %vm1954_vm8, %v1968_v50, %v1970_v53 }
 0x13e   : > { %v759_v24 = vpop.f32.mrf.mxu0  ;;  %v607_v18 = vadd.f32 %v606_v54, %v3627_v21  ;;  %v1789_v21 = vrot.slane %v1787_v6, 2  ;;  %v1973_v49 = vsel %vm1954_vm8, %v1970_v53, %v1972_v23 }
 0x13f   : > { %v3784_v40 = vadd.f32 %v759_v24, %v599_v46  ;;  %v2766_v12 = vpop.f32.mrf.mxu1 }
 0x140   : > { %v2800_v30 = vpop.f32.mrf.mxu0  ;;  %v1793_v16 = vor.u32 %v1792_v58, %v1789_v21 }
 0x141   : > { %v941_v47 = vpop.f32.mrf.mxu1  ;;  %2984 = vmatmul.mubr.msk.bf16.gmra.mxu1 %vm347_vm3, %v1776_v48 }
 0x142   : > { %v764_v32 = vpop.f32.mrf.mxu0  ;;  %3018 = vmatmul.mubr.msk.bf16.gmra.mxu0 %vm347_vm3, %v1967_v9  ;;  %v1012_v37 = vadd.f32 %v941_v47, %v3650_v14  ;;  %2987 = vmatprep.mubr.msk.bf16.mxu1 %vm3090_vm1, %v3089_v1  ;;  %v1794_v7 = vsel %vm1705_vm7, %v1784_v39, %v1793_v16 }
 0x143   : > { %v3791_v42 = vadd.f32 %v764_v32, %v604_v19  ;;  %3021 = vmatprep.mubr.msk.bf16.mxu0 %vm3090_vm1, %v3089_v1  ;;  %v2809_v38 = vpop.f32.mrf.mxu1 }
 0x144   : > { %v2803_v34 = vpop.f32.mrf.mxu0 }
 0x145   : > { %v944_v60 = vpop.f32.mrf.mxu1 }
 0x146   : > { %v767_v55 = vpop.f32.mrf.mxu0  ;;  %v1013_v0 = vadd.f32 %v944_v60, %v3664_v15 }
 0x147   : > { %v3801_v44 = vadd.f32 %v767_v55, %v607_v18  ;;  %v2810_v14 = vpop.f32.mrf.mxu1 }
 0x148   : > { %v2804_v43 = vpop.f32.mrf.mxu0 }
 0x149   : > { %v949_v59 = vpop.f32.mrf.mxu1  ;;  %2988 = vmatmul.mubr.msk.bf16.gmra.mxu1 %vm347_vm3, %v1785_v61 }
 0x14a   : > { %v1190_v22 = vpop.f32.mrf.mxu0  ;;  %3022 = vmatmul.mubr.msk.bf16.gmra.mxu0 %vm347_vm3, %v1969_v5  ;;  %v1014_v15 = vadd.f32 %v949_v59, %v3671_v27  ;;  %2991 = vmatprep.mubr.msk.bf16.mxu1 %vm3090_vm1, %v3089_v1 }
 0x14b   : > { %v3807_v3 = vadd.f32 %v1190_v22, %v1012_v37  ;;  %3025 = vmatprep.mubr.msk.bf16.mxu0 %vm3090_vm1, %v3089_v1  ;;  %v2813_v41 = vpop.f32.mrf.mxu1 }
 0x14c   : > { %v2847_v8 = vpop.f32.mrf.mxu0 }
 0x14d   : > { %v952_v45 = vpop.f32.mrf.mxu1 }
 0x14e   : > { %v1193_v36 = vpop.f32.mrf.mxu0  ;;  %v1015_v33 = vadd.f32 %v952_v45, %v3682_v51 }
 0x14f   : > { %v3816_v4 = vadd.f32 %v1193_v36, %v1013_v0  ;;  %v2814_v46 = vpop.f32.mrf.mxu1 }
 0x150   : > { %v2848_v63 = vpop.f32.mrf.mxu0 }
 0x151   : > { %v957_v24 = vpop.f32.mrf.mxu1  ;;  %2992 = vmatmul.mubr.msk.bf16.gmra.mxu1 %vm347_vm3, %v1794_v7 }
 0x152   : > { %v1198_v20 = vpop.f32.mrf.mxu0  ;;  %3026 = vmatmul.mubr.msk.bf16.gmra.mxu0 %vm347_vm3, %v1971_v26  ;;  %v1016_v54 = vadd.f32 %v957_v24, %v3689_v2 }
 0x153   : > { %v3822_v27 = vadd.f32 %v1198_v20, %v1014_v15  ;;  %3029 = vmatprep.mubr.msk.bf16.mxu0 %vm3090_vm1, %v3089_v1  ;;  %v2817_v30 = vpop.f32.mrf.mxu1 }
 0x154   : > { %v2851_v9 = vpop.f32.mrf.mxu0 }
 0x155   : > { %v960_v19 = vpop.f32.mrf.mxu1 }
 0x156   : > { %v1201_v51 = vpop.f32.mrf.mxu0  ;;  %v1017_v12 = vadd.f32 %v960_v19, %v3700_v52 }
 0x157   : > { %v3828_v31 = vadd.f32 %v1201_v51, %v1015_v33  ;;  %v2818_v32 = vpop.f32.mrf.mxu1 }
 0x158   : > { %v2852_v48 = vpop.f32.mrf.mxu0 }
 0x159   : > { %v965_v29 = vpop.f32.mrf.mxu1 }
 0x15a   : > { %v1206_v50 = vpop.f32.mrf.mxu0  ;;  %3030 = vmatmul.mubr.msk.bf16.gmra.mxu0 %vm347_vm3, %v1973_v49  ;;  %v1018_v2 = vadd.f32 %v965_v29, %v3706_v28 }
 0x15b   : > { %v3833_v1 = vadd.f32 %v1206_v50, %v1016_v54  ;;  %v2821_v34 = vpop.f32.mrf.mxu1 }
 0x15c   : > { %v2855_v47 = vpop.f32.mrf.mxu0 }
 0x15d   : > { %v968_v37 = vpop.f32.mrf.mxu1 }
 0x15e   : > { %v1209_v39 = vpop.f32.mrf.mxu0  ;;  %v1019_v57 = vadd.f32 %v968_v37, %v3717_v11 }
 0x15f   : > { %v3836_v18 = vadd.f32 %v1209_v39, %v1017_v12  ;;  %v2822_v38 = vpop.f32.mrf.mxu1 }
 0x160   : > { %v2856_v6 = vpop.f32.mrf.mxu0 }
 0x161   : > { %v973_v5 = vpop.f32.mrf.mxu1 }
 0x162   : > { %v1214_v52 = vpop.f32.mrf.mxu0  ;;  %v1020_v43 = vadd.f32 %v973_v5, %v3723_v62 }
 0x163   : > { %v3839_v55 = vadd.f32 %v1214_v52, %v1018_v2  ;;  %v2825_v0 = vpop.f32.mrf.mxu1 }
 0x164   : > { %v2859_v60 = vpop.f32.mrf.mxu0 }
 0x165   : > { %v976_v28 = vpop.f32.mrf.mxu1 }
 0x166   : > { %v1217_v61 = vpop.f32.mrf.mxu0  ;;  %v1021_v14 = vadd.f32 %v976_v28, %v3733_v10 }
 0x167   : > { %v3842_v21 = vadd.f32 %v1217_v61, %v1019_v57  ;;  %v2826_v22 = vpop.f32.mrf.mxu1 }
 0x168   : > { %v2860_v58 = vpop.f32.mrf.mxu0 }
 0x169   : > { %v981_v11 = vpop.f32.mrf.mxu1 }
 0x16a   : > { %v1222_v53 = vpop.f32.mrf.mxu0  ;;  %v1022_v15 = vadd.f32 %v981_v11, %v3739_v17 }
 0x16b   : > { %v3845_v59 = vadd.f32 %v1222_v53, %v1020_v43  ;;  %v2829_v16 = vpop.f32.mrf.mxu1 }
 0x16c   : > { %v2863_v8 = vpop.f32.mrf.mxu0 }
 0x16d   : > { %v984_v62 = vpop.f32.mrf.mxu1 }
 0x16e   : > { %v1225_v41 = vpop.f32.mrf.mxu0  ;;  %v1023_v45 = vadd.f32 %v984_v62, %v3750_v13 }
 0x16f   : > { %v3848_v36 = vadd.f32 %v1225_v41, %v1021_v14  ;;  %v2830_v63 = vpop.f32.mrf.mxu1 }
 0x170   : > { %v2864_v26 = vpop.f32.mrf.mxu0 }
 0x171   : > { %v989_v10 = vpop.f32.mrf.mxu1 }
 0x172   : > { %v1230_v33 = vpop.f32.mrf.mxu0  ;;  %v1024_v20 = vadd.f32 %v989_v10, %v3756_v56 }
 0x173   : > { %v3851_v7 = vadd.f32 %v1230_v33, %v1022_v15  ;;  %v2833_v23 = vpop.f32.mrf.mxu1 }
 0x174   : > { %v2867_v46 = vpop.f32.mrf.mxu0 }
 0x175   : > { %v992_v17 = vpop.f32.mrf.mxu1 }
 0x176   : > { %v1233_v24 = vpop.f32.mrf.mxu0  ;;  %v1025_v30 = vadd.f32 %v992_v17, %v3767_v35 }
 0x177   : > { %v3854_v9 = vadd.f32 %v1233_v24, %v1023_v45  ;;  %v2834_v51 = vpop.f32.mrf.mxu1 }
 0x178   : > { %v2868_v54 = vpop.f32.mrf.mxu0 }
 0x179   : > { %v997_v13 = vpop.f32.mrf.mxu1 }
 0x17a   : > { %v1238_v49 = vpop.f32.mrf.mxu0  ;;  %v1026_v12 = vadd.f32 %v997_v13, %v3773_v25 }
 0x17b   : > { %v3857_v19 = vadd.f32 %v1238_v49, %v1024_v20  ;;  %v2837_v32 = vpop.f32.mrf.mxu1 }
 0x17c   : > { %v2871_v48 = vpop.f32.mrf.mxu0 }
 0x17d   : > { %v1000_v56 = vpop.f32.mrf.mxu1 }
 0x17e   : > { %v1241_v50 = vpop.f32.mrf.mxu0  ;;  %v1027_v2 = vadd.f32 %v1000_v56, %v3784_v40 }
 0x17f   : > { %v3860_v29 = vadd.f32 %v1241_v50, %v1025_v30  ;;  %v2838_v34 = vpop.f32.mrf.mxu1 }
 0x180   : > { %v2872_v47 = vpop.f32.mrf.mxu0 }
 0x181   : > { %v1005_v35 = vpop.f32.mrf.mxu1 }
 0x182   : > { %v1246_v39 = vpop.f32.mrf.mxu0  ;;  %v1028_v57 = vadd.f32 %v1005_v35, %v3791_v42 }
 0x183   : > { %v3863_v37 = vadd.f32 %v1246_v39, %v1026_v12  ;;  %v2841_v38 = vpop.f32.mrf.mxu1 }
 0x184   : > { %v2875_v6 = vpop.f32.mrf.mxu0 }
 0x185   : > { %v1008_v25 = vpop.f32.mrf.mxu1 }
 0x186   : > { %v1249_v52 = vpop.f32.mrf.mxu0  ;;  %v1029_v43 = vadd.f32 %v1008_v25, %v3801_v44 }
 0x187   : > { %v3866_v5 = vadd.f32 %v1249_v52, %v1027_v2  ;;  %v2842_v0 = vpop.f32.mrf.mxu1 }
 0x188   : > { %v2876_v60 = vpop.f32.mrf.mxu0 }
 0x189   : > { %v1369_v40 = vpop.f32.mrf.mxu1 }
 0x18a   : > { %v1254_v61 = vpop.f32.mrf.mxu0  ;;  %v1440_v14 = vadd.f32 %v1369_v40, %v3807_v3 }
 0x18b   : > { %v3869_v28 = vadd.f32 %v1254_v61, %v1028_v57  ;;  %v2885_v22 = vpop.f32.mrf.mxu1 }
 0x18c   : > { %v2879_v58 = vpop.f32.mrf.mxu0 }
 0x18d   : > { %v1372_v42 = vpop.f32.mrf.mxu1 }
 0x18e   : > { %v1257_v53 = vpop.f32.mrf.mxu0  ;;  %v1441_v15 = vadd.f32 %v1372_v42, %v3816_v4 }
 0x18f   : > { %v3872_v11 = vadd.f32 %v1257_v53, %v1029_v43  ;;  %v2886_v16 = vpop.f32.mrf.mxu1 }
 0x190   : > { %v2880_v8 = vpop.f32.mrf.mxu0 }
 0x191   : > { %v1377_v44 = vpop.f32.mrf.mxu1 }
 0x192   : > { %v1610_v41 = vpop.f32.mrf.mxu0  ;;  %v1442_v45 = vadd.f32 %v1377_v44, %v3822_v27 }
 0x193   : > { %v3875_v62 = vadd.f32 %v1610_v41, %v1440_v14  ;;  %v2889_v63 = vpop.f32.mrf.mxu1 }
 0x194   : > { %v2923_v26 = vpop.f32.mrf.mxu0 }
 0x195   : > { %v1380_v3 = vpop.f32.mrf.mxu1 }
 0x196   : > { %v1613_v33 = vpop.f32.mrf.mxu0  ;;  %v1443_v20 = vadd.f32 %v1380_v3, %v3828_v31 }
 0x197   : > { %v3878_v10 = vadd.f32 %v1613_v33, %v1441_v15  ;;  %v2890_v23 = vpop.f32.mrf.mxu1 }
 0x198   : > { %v2924_v46 = vpop.f32.mrf.mxu0 }
 0x199   : > { %v1385_v4 = vpop.f32.mrf.mxu1 }
 0x19a   : > { %v1618_v24 = vpop.f32.mrf.mxu0  ;;  %v1444_v30 = vadd.f32 %v1385_v4, %v3833_v1 }
 0x19b   : > { %v3881_v17 = vadd.f32 %v1618_v24, %v1442_v45  ;;  %v2893_v51 = vpop.f32.mrf.mxu1 }
 0x19c   : > { %v2927_v54 = vpop.f32.mrf.mxu0 }
 0x19d   : > { %v1388_v27 = vpop.f32.mrf.mxu1 }
 0x19e   : > { %v1621_v49 = vpop.f32.mrf.mxu0  ;;  %v1445_v12 = vadd.f32 %v1388_v27, %v3836_v18 }
 0x19f   : > { %v3884_v13 = vadd.f32 %v1621_v49, %v1443_v20  ;;  %v2894_v32 = vpop.f32.mrf.mxu1 }
 0x1a0   : > { %v2928_v48 = vpop.f32.mrf.mxu0 }
 0x1a1   : > { %v1393_v31 = vpop.f32.mrf.mxu1 }
 0x1a2   : > { %v1626_v50 = vpop.f32.mrf.mxu0  ;;  %v1446_v2 = vadd.f32 %v1393_v31, %v3839_v55 }
 0x1a3   : > { %v3887_v56 = vadd.f32 %v1626_v50, %v1444_v30  ;;  %v2897_v34 = vpop.f32.mrf.mxu1 }
 0x1a4   : > { %v2931_v47 = vpop.f32.mrf.mxu0 }
 0x1a5   : > { %v1396_v1 = vpop.f32.mrf.mxu1 }
 0x1a6   : > { %v1629_v39 = vpop.f32.mrf.mxu0  ;;  %v1447_v57 = vadd.f32 %v1396_v1, %v3842_v21 }
 0x1a7   : > { %v3890_v35 = vadd.f32 %v1629_v39, %v1445_v12  ;;  %v2898_v38 = vpop.f32.mrf.mxu1 }
 0x1a8   : > { %v2932_v6 = vpop.f32.mrf.mxu0 }
 0x1a9   : > { %v1401_v18 = vpop.f32.mrf.mxu1 }
 0x1aa   : > { %v1634_v52 = vpop.f32.mrf.mxu0  ;;  %v1448_v43 = vadd.f32 %v1401_v18, %v3845_v59 }
 0x1ab   : > { %v3893_v25 = vadd.f32 %v1634_v52, %v1446_v2  ;;  %v2901_v0 = vpop.f32.mrf.mxu1 }
 0x1ac   : > { %v2935_v60 = vpop.f32.mrf.mxu0 }
 0x1ad   : > { %v1404_v55 = vpop.f32.mrf.mxu1 }
 0x1ae   : > { %v1637_v61 = vpop.f32.mrf.mxu0  ;;  %v1449_v14 = vadd.f32 %v1404_v55, %v3848_v36 }
 0x1af   : > { %v3896_v40 = vadd.f32 %v1637_v61, %v1447_v57  ;;  %v2902_v22 = vpop.f32.mrf.mxu1 }
 0x1b0   : > { %v2936_v58 = vpop.f32.mrf.mxu0 }
 0x1b1   : > { %v1409_v21 = vpop.f32.mrf.mxu1 }
 0x1b2   : > { %v1642_v53 = vpop.f32.mrf.mxu0  ;;  %v1450_v15 = vadd.f32 %v1409_v21, %v3851_v7 }
 0x1b3   : > { %v3899_v42 = vadd.f32 %v1642_v53, %v1448_v43  ;;  %v2905_v16 = vpop.f32.mrf.mxu1 }
 0x1b4   : > { %v2939_v8 = vpop.f32.mrf.mxu0 }
 0x1b5   : > { %v1412_v59 = vpop.f32.mrf.mxu1 }
 0x1b6   : > { %v1645_v41 = vpop.f32.mrf.mxu0  ;;  %v1451_v45 = vadd.f32 %v1412_v59, %v3854_v9 }
 0x1b7   : > { %v3902_v44 = vadd.f32 %v1645_v41, %v1449_v14  ;;  %v2906_v63 = vpop.f32.mrf.mxu1 }
 0x1b8   : > { %v2940_v26 = vpop.f32.mrf.mxu0 }
 0x1b9   : > { %v1417_v36 = vpop.f32.mrf.mxu1  ;;  %v3937_v26 = vld [vmem:[%s4012_s3] ss:$0 sm:$0xff] }
 0x1ba   : > { %v1650_v33 = vpop.f32.mrf.mxu0  ;;  %v1452_v20 = vadd.f32 %v1417_v36, %v3857_v19 }
 0x1bb   : > { %v3905_v3 = vadd.f32 %v1650_v33, %v1450_v15  ;;  %v2909_v23 = vpop.f32.mrf.mxu1 }
 0x1bc   : > { %v2943_v46 = vpop.f32.mrf.mxu0 }
 0x1bd   : > { %v1420_v7 = vpop.f32.mrf.mxu1 }
 0x1be   : > { %v1653_v24 = vpop.f32.mrf.mxu0  ;;  %v1453_v30 = vadd.f32 %v1420_v7, %v3860_v29 }
 0x1bf   : > { %v3908_v4 = vadd.f32 %v1653_v24, %v1451_v45  ;;  %v2910_v51 = vpop.f32.mrf.mxu1 }
 0x1c0   : > { %v2944_v54 = vpop.f32.mrf.mxu0 }
 0x1c1   : > { %v1425_v9 = vpop.f32.mrf.mxu1 }
 0x1c2   : > { %v1658_v49 = vpop.f32.mrf.mxu0  ;;  %v1454_v12 = vadd.f32 %v1425_v9, %v3863_v37 }
 0x1c3   : > { %v3911_v27 = vadd.f32 %v1658_v49, %v1452_v20  ;;  %v2913_v32 = vpop.f32.mrf.mxu1 }
 0x1c4   : > { %v2947_v48 = vpop.f32.mrf.mxu0 }
 0x1c5   : > { %v1428_v19 = vpop.f32.mrf.mxu1 }
 0x1c6   : > { %v1661_v50 = vpop.f32.mrf.mxu0  ;;  %v1455_v2 = vadd.f32 %v1428_v19, %v3866_v5 }
 0x1c7   : > { %v3914_v31 = vadd.f32 %v1661_v50, %v1453_v30  ;;  %v2914_v34 = vpop.f32.mrf.mxu1 }
 0x1c8   : > { %v2948_v47 = vpop.f32.mrf.mxu0 }
 0x1c9   : > { %v1433_v29 = vpop.f32.mrf.mxu1 }
 0x1ca   : > { %v1666_v39 = vpop.f32.mrf.mxu0  ;;  %v1456_v57 = vadd.f32 %v1433_v29, %v3869_v28 }
 0x1cb   : > { %v3917_v1 = vadd.f32 %v1666_v39, %v1454_v12  ;;  %v2917_v38 = vpop.f32.mrf.mxu1 }
 0x1cc   : > { %v2951_v6 = vpop.f32.mrf.mxu0 }
 0x1cd   : > { %v1436_v18 = vpop.f32.mrf.mxu1 }
 0x1ce   : > { %v1669_v52 = vpop.f32.mrf.mxu0  ;;  %v1457_v43 = vadd.f32 %v1436_v18, %v3872_v11  ;;  %v3932_v11 = vld [vmem:[%s4011_s2] ss:$0 sm:$0xff] }
 0x1cf   : > { %v3920_v37 = vadd.f32 %v1669_v52, %v1455_v2  ;;  %v2918_v0 = vpop.f32.mrf.mxu1 }
 0x1d0   : > { %v2952_v60 = vpop.f32.mrf.mxu0 }
 0x1d1   : > { %v1859_v55 = vpop.f32.mrf.mxu1 }
 0x1d2   : > { %v1674_v61 = vpop.f32.mrf.mxu0  ;;  %v1930_v8 = vadd.f32 %v1859_v55, %v3875_v62 }
 0x1d3   : > { %v3923_v5 = vadd.f32 %v1674_v61, %v1456_v57  ;;  %v2961_v14 = vpop.f32.mrf.mxu1 }
 0x1d4   : > { %v2955_v58 = vpop.f32.mrf.mxu0 }
 0x1d5   : > { %v1862_v28 = vpop.f32.mrf.mxu1 }
 0x1d6   : > { %v1677_v22 = vpop.f32.mrf.mxu0  ;;  %v1931_v63 = vadd.f32 %v1862_v28, %v3878_v10 }
 0x1d7   : > { %v3925_v53 = vadd.f32 %v1677_v22, %v1457_v43  ;;  %v2962_v15 = vpop.f32.mrf.mxu1 }
 0x1d8   : > { %v2956_v21 = vpop.f32.mrf.mxu0 }
 0x1d9   : > { %v1867_v59 = vpop.f32.mrf.mxu1 }
 0x1da   : > { %v2038_v16 = vpop.f32.mrf.mxu0  ;;  %v1932_v7 = vadd.f32 %v1867_v59, %v3881_v17 }
 0x1db   : > { %v2109_v41 = vadd.f32 %v2038_v16, %v1930_v8  ;;  %v2965_v33 = vpop.f32.mrf.mxu1 }
 0x1dc   : > { %v2999_v45 = vpop.f32.mrf.mxu0 }
 0x1dd   : > { %v2134_v62 = vmul.f32 %v3932_v11, %v2109_v41  ;;  %v1870_v23 = vpop.f32.mrf.mxu1 }
 0x1de   : > { %v2041_v36 = vpop.f32.mrf.mxu0  ;;  %v1933_v32 = vadd.f32 %v1870_v23, %v3884_v13 }
 0x1df   : > { %v2159_v46 = vadd.f32 %v3937_v26, %v2134_v62  ;;  %v2110_v20 = vadd.f32 %v2041_v36, %v1931_v63  ;;  %v2966_v30 = vpop.f32.mrf.mxu1 }
 0x1e0   : > { %v3000_v24 = vpop.f32.mrf.mxu0 }
 0x1e1   : > { %v2135_v54 = vmul.f32 %v3932_v11, %v2110_v20  ;;  %v2195_v49 = vmul.f32 0.0, %v2159_v46  ;;  %vm2177_vm9 = vcmp.gt.f32.partialorder %v2159_v46, 0.0  ;;  %v1875_v48 = vpop.f32.mrf.mxu1 }
 0x1e2   : > { %v2046_v51 = vpop.f32.mrf.mxu0  ;;  %v1934_v38 = vadd.f32 %v1875_v48, %v3887_v56 }
 0x1e3   : > { %v2160_v9 = vadd.f32 %v3937_v26, %v2135_v54  ;;  %v2111_v10 = vadd.f32 %v2046_v51, %v1932_v7  ;;  %v2969_v47 = vpop.f32.mrf.mxu1  ;;  %v2213_v2 = vsel %vm2177_vm9, %v2159_v46, %v2195_v49 }
 0x1e4   : > { %v3003_v12 = vpop.f32.mrf.mxu0 }
 0x1e5   : > { %vm2178_vm10 = vcmp.gt.f32.partialorder %v2160_v9, 0.0  ;;  %v2196_v50 = vmul.f32 0.0, %v2160_v9  ;;  %v2136_v19 = vmul.f32 %v3932_v11, %v2111_v10  ;;  %v1878_v57 = vpop.f32.mrf.mxu1 }
 0x1e6   : > { %v2049_v17 = vpop.f32.mrf.mxu0  ;;  %v1935_v14 = vadd.f32 %v1878_v57, %v3890_v35 }
 0x1e7   : > { %v2214_v34 = vsel %vm2178_vm10, %v2160_v9, %v2196_v50  ;;  %v2161_v39 = vadd.f32 %v3937_v26, %v2136_v19  ;;  %v2112_v29 = vadd.f32 %v2049_v17, %v1933_v32  ;;  %v2970_v18 = vpop.f32.mrf.mxu1 }
 0x1e8   : > { %v2551_v6 = vpack.c.bf16 %v2214_v34, %v2213_v2  ;;  %v3004_v13 = vpop.f32.mrf.mxu0 }
 0x1e9   : > { %v2137_v52 = vmul.f32 %v3932_v11, %v2112_v29  ;;  %v2197_v43 = vmul.f32 0.0, %v2161_v39  ;;  %vm2179_vm11 = vcmp.gt.f32.partialorder %v2161_v39, 0.0  ;;  %v1883_v55 = vpop.f32.mrf.mxu1 }
 0x1ea   : > { %2552 = vst [vmem:[%s3950_s23] sm:$0xff] %v2551_v6   ;;  %v2054_v60 = vpop.f32.mrf.mxu0  ;;  %v1936_v62 = vadd.f32 %v1883_v55, %v3893_v25 }
 0x1eb   : > { %v2162_v0 = vadd.f32 %v3937_v26, %v2137_v52  ;;  %v2113_v61 = vadd.f32 %v2054_v60, %v1934_v38  ;;  %v2973_v56 = vpop.f32.mrf.mxu1  ;;  %v2215_v8 = vsel %vm2179_vm11, %v2161_v39, %v2197_v43 }
 0x1ec   : > { %v3007_v58 = vpop.f32.mrf.mxu0 }
 0x1ed   : > { %vm2180_vm12 = vcmp.gt.f32.partialorder %v2162_v0, 0.0  ;;  %v2198_v22 = vmul.f32 0.0, %v2162_v0  ;;  %v2138_v28 = vmul.f32 %v3932_v11, %v2113_v61  ;;  %v1886_v45 = vpop.f32.mrf.mxu1 }
 0x1ee   : > { %v2057_v21 = vpop.f32.mrf.mxu0  ;;  %v1937_v54 = vadd.f32 %v1886_v45, %v3896_v40 }
 0x1ef   : > { %v2216_v15 = vsel %vm2180_vm12, %v2162_v0, %v2198_v22  ;;  %v2163_v16 = vadd.f32 %v3937_v26, %v2138_v28  ;;  %v2114_v41 = vadd.f32 %v2057_v21, %v1935_v14  ;;  %v2974_v35 = vpop.f32.mrf.mxu1 }
 0x1f0   : > { %v2556_v59 = vpack.c.bf16 %v2216_v15, %v2215_v8  ;;  %v3008_v63 = vpop.f32.mrf.mxu0 }
 0x1f1   : > { %v2139_v33 = vmul.f32 %v3932_v11, %v2114_v41  ;;  %v2199_v46 = vmul.f32 0.0, %v2163_v16  ;;  %vm2181_vm13 = vcmp.gt.f32.partialorder %v2163_v16, 0.0  ;;  %v1891_v24 = vpop.f32.mrf.mxu1 }
 0x1f2   : > { %2593 = vst [vmem:[%s3950_s23 + $0x8] sm:$0xff] %v2556_v59   ;;  %v2062_v36 = vpop.f32.mrf.mxu0  ;;  %v1938_v47 = vadd.f32 %v1891_v24, %v3899_v42 }
 0x1f3   : > { %v2164_v20 = vadd.f32 %v3937_v26, %v2139_v33  ;;  %v2115_v23 = vadd.f32 %v2062_v36, %v1936_v62  ;;  %v2977_v25 = vpop.f32.mrf.mxu1  ;;  %v2217_v9 = vsel %vm2181_vm13, %v2163_v16, %v2199_v46 }
 0x1f4   : > { %v3011_v7 = vpop.f32.mrf.mxu0 }
 0x1f5   : > { %vm2182_vm14 = vcmp.gt.f32.partialorder %v2164_v20, 0.0  ;;  %v2200_v30 = vmul.f32 0.0, %v2164_v20  ;;  %v2140_v51 = vmul.f32 %v3932_v11, %v2115_v23  ;;  %v1894_v50 = vpop.f32.mrf.mxu1 }
 0x1f6   : > { %v2065_v49 = vpop.f32.mrf.mxu0  ;;  %v1939_v13 = vadd.f32 %v1894_v50, %v3902_v44 }
 0x1f7   : > { %v2218_v10 = vsel %vm2182_vm14, %v2164_v20, %v2200_v30  ;;  %v2165_v48 = vadd.f32 %v3937_v26, %v2140_v51  ;;  %v2116_v12 = vadd.f32 %v2065_v49, %v1937_v54  ;;  %v2978_v40 = vpop.f32.mrf.mxu1 }
 0x1f8   : > { %v2561_v32 = vpack.c.bf16 %v2218_v10, %v2217_v9  ;;  %v3012_v19 = vpop.f32.mrf.mxu0 }
 0x1f9   : > { %v2141_v17 = vmul.f32 %v3932_v11, %v2116_v12  ;;  %v2201_v34 = vmul.f32 0.0, %v2165_v48  ;;  %vm2183_vm15 = vcmp.gt.f32.partialorder %v2165_v48, 0.0  ;;  %v1899_v6 = vpop.f32.mrf.mxu1 }
 0x1fa   : > { %2594 = vst [vmem:[%s3950_s23 + $0x10] sm:$0xff] %v2561_v32   ;;  %v2070_v2 = vpop.f32.mrf.mxu0  ;;  %v1940_v22 = vadd.f32 %v1899_v6, %v3905_v3 }
 0x1fb   : > { %v2166_v39 = vadd.f32 %v3937_v26, %v2141_v17  ;;  %v2117_v29 = vadd.f32 %v2070_v2, %v1938_v47  ;;  %v2981_v42 = vpop.f32.mrf.mxu1  ;;  %v2219_v60 = vsel %vm2183_vm15, %v2165_v48, %v2201_v34 }
 0x1fc   : > { %v3015_v57 = vpop.f32.mrf.mxu0 }
 0x1fd   : > { %vm2184_vm0 = vcmp.gt.f32.partialorder %v2166_v39, 0.0  ;;  %v2202_v38 = vmul.f32 0.0, %v2166_v39  ;;  %v2142_v52 = vmul.f32 %v3932_v11, %v2117_v29  ;;  %v1902_v58 = vpop.f32.mrf.mxu1 }
 0x1fe   : > { %v2073_v18 = vpop.f32.mrf.mxu0  ;;  %v1941_v59 = vadd.f32 %v1902_v58, %v3908_v4 }
 0x1ff   : > { %v2220_v43 = vsel %vm2184_vm0, %v2166_v39, %v2202_v38  ;;  %v2167_v0 = vadd.f32 %v3937_v26, %v2142_v52  ;;  %v2118_v61 = vadd.f32 %v2073_v18, %v1939_v13  ;;  %v2982_v44 = vpop.f32.mrf.mxu1 }
 0x200   : > { %v2566_v55 = vpack.c.bf16 %v2220_v43, %v2219_v60  ;;  %v3016_v14 = vpop.f32.mrf.mxu0 }
 0x201   : > { %v2143_v28 = vmul.f32 %v3932_v11, %v2118_v61  ;;  %v2203_v21 = vmul.f32 0.0, %v2167_v0  ;;  %vm2185_vm1 = vcmp.gt.f32.partialorder %v2167_v0, 0.0  ;;  %v1907_v16 = vpop.f32.mrf.mxu1 }
 0x202   : > { %2595 = vst [vmem:[%s3950_s23 + $0x18] sm:$0xff] %v2566_v55   ;;  %v2078_v56 = vpop.f32.mrf.mxu0  ;;  %v1942_v7 = vadd.f32 %v1907_v16, %v3911_v27 }
 0x203   : > { %v2168_v8 = vadd.f32 %v3937_v26, %v2143_v28  ;;  %v2119_v15 = vadd.f32 %v2078_v56, %v1940_v22  ;;  %v2985_v3 = vpop.f32.mrf.mxu1  ;;  %v2221_v33 = vsel %vm2185_vm1, %v2167_v0, %v2203_v21 }
 0x204   : > { %v3019_v41 = vpop.f32.mrf.mxu0 }
 0x205   : > { %vm2186_vm2 = vcmp.gt.f32.partialorder %v2168_v8, 0.0  ;;  %v2204_v45 = vmul.f32 0.0, %v2168_v8  ;;  %v2144_v63 = vmul.f32 %v3932_v11, %v2119_v15  ;;  %v1910_v23 = vpop.f32.mrf.mxu1 }
 0x206   : > { %v2081_v62 = vpop.f32.mrf.mxu0  ;;  %v1943_v48 = vadd.f32 %v1910_v23, %v3914_v31 }
 0x207   : > { %v2222_v35 = vsel %vm2186_vm2, %v2168_v8, %v2204_v45  ;;  %v2169_v36 = vadd.f32 %v3937_v26, %v2144_v63  ;;  %v2120_v46 = vadd.f32 %v2081_v62, %v1941_v59  ;;  %v2986_v4 = vpop.f32.mrf.mxu1 }
 0x208   : > { %v2571_v20 = vpack.c.bf16 %v2222_v35, %v2221_v33  ;;  %v3020_v24 = vpop.f32.mrf.mxu0 }
 0x209   : > { %v2145_v54 = vmul.f32 %v3932_v11, %v2120_v46  ;;  %v2205_v51 = vmul.f32 0.0, %v2169_v36  ;;  %vm2187_vm3 = vcmp.gt.f32.partialorder %v2169_v36, 0.0  ;;  %v1915_v9 = vpop.f32.mrf.mxu1 }
 0x20a   : > { %2596 = vst [vmem:[%s3950_s23 + $0x20] sm:$0xff] %v2571_v20   ;;  %v2086_v30 = vpop.f32.mrf.mxu0  ;;  %v1944_v29 = vadd.f32 %v1915_v9, %v3917_v1 }
 0x20b   : > { %v2170_v25 = vadd.f32 %v3937_v26, %v2145_v54  ;;  %v2121_v49 = vadd.f32 %v2086_v30, %v1942_v7  ;;  %v2989_v27 = vpop.f32.mrf.mxu1  ;;  %v2223_v19 = vsel %vm2187_vm3, %v2169_v36, %v2205_v51 }
 0x20c   : > { %v3023_v10 = vpop.f32.mrf.mxu0 }
 0x20d   : > { %vm2188_vm4 = vcmp.gt.f32.partialorder %v2170_v25, 0.0  ;;  %v2206_v12 = vmul.f32 0.0, %v2170_v25  ;;  %v2146_v32 = vmul.f32 %v3932_v11, %v2121_v49  ;;  %v1918_v34 = vpop.f32.mrf.mxu1 }
 0x20e   : > { %v2089_v50 = vpop.f32.mrf.mxu0  ;;  %v1945_v60 = vadd.f32 %v1918_v34, %v3920_v37 }
 0x20f   : > { %v2224_v47 = vsel %vm2188_vm4, %v2170_v25, %v2206_v12  ;;  %v2171_v17 = vadd.f32 %v3937_v26, %v2146_v32  ;;  %v2122_v40 = vadd.f32 %v2089_v50, %v1943_v48  ;;  %v2990_v31 = vpop.f32.mrf.mxu1 }
 0x210   : > { %v2576_v2 = vpack.c.bf16 %v2224_v47, %v2223_v19  ;;  %v3024_v39 = vpop.f32.mrf.mxu0 }
 0x211   : > { %v2147_v6 = vmul.f32 %v3932_v11, %v2122_v40  ;;  %v2207_v13 = vmul.f32 0.0, %v2171_v17  ;;  %vm2189_vm5 = vcmp.gt.f32.partialorder %v2171_v17, 0.0  ;;  %v1923_v42 = vpop.f32.mrf.mxu1 }
 0x212   : > { %2597 = vst [vmem:[%s3950_s23 + $0x28] sm:$0xff] %v2576_v2   ;;  %v2094_v57 = vpop.f32.mrf.mxu0  ;;  %v1946_v21 = vadd.f32 %v1923_v42, %v3923_v5 }
 0x213   : > { %v2172_v38 = vadd.f32 %v3937_v26, %v2147_v6  ;;  %v2123_v52 = vadd.f32 %v2094_v57, %v1944_v29  ;;  %v2993_v1 = vpop.f32.mrf.mxu1  ;;  %v2225_v55 = vsel %vm2189_vm5, %v2171_v17, %v2207_v13 }
 0x214   : > { %v3027_v18 = vpop.f32.mrf.mxu0 }
 0x215   : > { %vm2190_vm6 = vcmp.gt.f32.partialorder %v2172_v38, 0.0  ;;  %v2208_v43 = vmul.f32 0.0, %v2172_v38  ;;  %v2148_v0 = vmul.f32 %v3932_v11, %v2123_v52  ;;  %v1926_v44 = vpop.f32.mrf.mxu1 }
 0x216   : > { %v2097_v61 = vpop.f32.mrf.mxu0  ;;  %v1947_v63 = vadd.f32 %v1926_v44, %v3925_v53 }
 0x217   : > { %v2226_v58 = vsel %vm2190_vm6, %v2172_v38, %v2208_v43  ;;  %v2173_v14 = vadd.f32 %v3937_v26, %v2148_v0  ;;  %v2124_v22 = vadd.f32 %v2097_v61, %v1945_v60  ;;  %v2994_v37 = vpop.f32.mrf.mxu1 }
 0x218   : > { %v2581_v28 = vpack.c.bf16 %v2226_v58, %v2225_v55  ;;  %v3028_v56 = vpop.f32.mrf.mxu0 }
 0x219   : > { %v2149_v8 = vmul.f32 %v3932_v11, %v2124_v22  ;;  %v2209_v16 = vmul.f32 0.0, %v2173_v14  ;;  %vm2191_vm7 = vcmp.gt.f32.partialorder %v2173_v14, 0.0 }
 0x21a   : > { %2598 = vst [vmem:[%s3950_s23 + $0x30] sm:$0xff] %v2581_v28   ;;  %v2102_v15 = vpop.f32.mrf.mxu0 }
 0x21b   : > { %v2174_v41 = vadd.f32 %v3937_v26, %v2149_v8  ;;  %v2125_v59 = vadd.f32 %v2102_v15, %v1946_v21  ;;  %v2227_v5 = vsel %vm2191_vm7, %v2173_v14, %v2209_v16 }
 0x21c   : > { %v3031_v45 = vpop.f32.mrf.mxu0 }
 0x21d   : > { %vm2192_vm8 = vcmp.gt.f32.partialorder %v2174_v41, 0.0  ;;  %v2210_v3 = vmul.f32 0.0, %v2174_v41  ;;  %v2150_v62 = vmul.f32 %v3932_v11, %v2125_v59 }
 0x21e   : > { %v2105_v33 = vpop.f32.mrf.mxu0 }
 0x21f   : > { %v2228_v35 = vsel %vm2192_vm8, %v2174_v41, %v2210_v3  ;;  %v2175_v36 = vadd.f32 %v3937_v26, %v2150_v62  ;;  %v2126_v46 = vadd.f32 %v2105_v33, %v1947_v63 }
 0x220   : > { %v2586_v20 = vpack.c.bf16 %v2228_v35, %v2227_v5  ;;  %v3032_v23 = vpop.f32.mrf.mxu0 }
 0x221   : > { %v2151_v24 = vmul.f32 %v3932_v11, %v2126_v46  ;;  %v2211_v7 = vmul.f32 0.0, %v2175_v36  ;;  %vm2193_vm9 = vcmp.gt.f32.partialorder %v2175_v36, 0.0 }
 0x222   : > { %2599 = vst [vmem:[%s3950_s23 + $0x38] sm:$0xff] %v2586_v20  }
 0x223   : > { %v2176_v54 = vadd.f32 %v3937_v26, %v2151_v24  ;;  %v2229_v4 = vsel %vm2193_vm9, %v2175_v36, %v2211_v7 }
 0x225   : > { %vm2194_vm10 = vcmp.gt.f32.partialorder %v2176_v54, 0.0  ;;  %v2212_v53 = vmul.f32 0.0, %v2176_v54 }
 0x227   : > { %v2230_v30 = vsel %vm2194_vm10, %v2176_v54, %v2212_v53 }
 0x228   : > { %v2591_v51 = vpack.c.bf16 %v2230_v30, %v2229_v4 }
 0x22a   : > { %2600 = vst [vmem:[%s3950_s23 + $0x40] sm:$0xff] %v2591_v51  }
 0x22b PF: > { %s14_s15 = sadd.s32 1, %s3087_s15  }
 0x22c   : > { %p11_p5 = scmp.ge.s32.totalorder %s14_s15, 6  }
 0x22e   :  { %13 = sbr.rel (!%p11_p5) target bundleno = 1 (0x1), region = 74 }

// kernel: double_conv_forward.3
= control target key start
LH: loop header
LB: loop body
LE: loop exit
PB: predicated region body
PF: predicated region fallthrough
CT: control target
= control target key end

     0   :  { %s3887_s15 = smov 0   ;;  %s4962_s0 = inlined_call_operand.vmem [shape: bf16[4,198,128], index: 0, kind: input, shape index: {}]   ;;  %s4963_s1 = inlined_call_operand.vmem [shape: bf16[9,128,128], index: 1, kind: input, shape index: {}]   ;;  %s4964_s2 = inlined_call_operand.vmem [shape: f32[1,128], index: 2, kind: input, shape index: {}]   ;;  %s4965_s3 = inlined_call_operand.vmem [shape: f32[1,128], index: 3, kind: input, shape index: {}]   ;;  %s4966_s4 = inlined_call_operand.vmem [shape: bf16[576,128], index: 4, kind: output, shape index: {}]  }
   0x1 LB: > { %s3893_s16 = sadd.s32 4294967295, %s3858_s15   ;;  %p2766_p0 = scmp.ge.s32.totalorder %s3858_s15, 1  ;;  %s3858_s15 = sphi %s3887_s15, %s14_s15  }
   0x2   : > { %p162_p1 = scmp.lt.s32.totalorder %s3858_s15, 5 }
   0x4   : > { %p163_p2 = pnand %p2766_p0, %p162_p1 }
   0x5   : > { %p188_p3 = scmp.lt.s32.totalorder (!%p163_p2), %s3893_s16, 3 }
   0x6   : > { %166 = sbr.rel (%p163_p2) target bundleno = 575 (0x23f), region = 36 }
   0xb   : > { %v3745_v0 = vld [vmem:[%s4963_s1 + $0x78] sm:$0xff]   ;;  %v3860_v1 = vmov 0.0   ;;  %v3746_v2 = vld [vmem:[%s4963_s1 + $0x70] sm:$0xff]   ;;  %vm3861_vm0 = vmmov 0   ;;  %s189_s21 = scalar_select %p188_p3, %s3893_s16, 3  ;;  %v3747_v3 = vld [vmem:[%s4963_s1 + $0x68] sm:$0xff]  }
   0xc   : > { %3718 = vmatprep.subr.bf16.mxu1 %v3860_v1  ;;  %3250 = vmatprep.subr.bf16.mxu0 %v3860_v1  ;;  %v3748_v4 = vld [vmem:[%s4963_s1 + $0x60] sm:$0xff]   ;;  %v3749_v8 = vld [vmem:[%s4963_s1 + $0x58] sm:$0xff]   ;;  %v3750_v11 = vld [vmem:[%s4963_s1 + $0x50] sm:$0xff]   ;;  %vm300_vm1 = vsmask.f32 7424  ;;  %vm722_vm2 = vcmask 1046528  }
   0xd   : > { %3726 = vmatpush3.bf16.msra.mxu1 %v3745_v0  ;;  %3251 = vmatpush3.bf16.msra.mxu0 %v3745_v0  ;;  %s3734_s24 = smul.u32 100, %s189_s21  ;;  %v3751_v15 = vld [vmem:[%s4963_s1 + $0x48] sm:$0xff]   ;;  %v3752_v24 = vld [vmem:[%s4963_s1 + $0x40] sm:$0xff]   ;;  %v3755_v32 = vld [vmem:[%s4963_s1 + $0x38] sm:$0xff]   ;;  %vm1517_vm3 = vcmask 1045504   ;;  %vm2312_vm5 = vcmask 1044480  }
   0xe   : > { %3719 = vmatprep.subr.bf16.mxu1 %v3860_v1  ;;  %3252 = vmatprep.subr.bf16.mxu0 %v3860_v1  ;;  %v3759_v34 = vld [vmem:[%s4963_s1 + $0xb8] sm:$0xff]   ;;  %v3758_v37 = vld [vmem:[%s4963_s1 + $0x30] sm:$0xff]   ;;  %v3762_v45 = vld [vmem:[%s4963_s1 + $0x28] sm:$0xff]   ;;  %vm1226_vm4 = vsmask.f32 6400 }
   0xf   : > { %3282 = vmatprep.mubr.msk.bf16.mxu1 %vm3861_vm0, %v3860_v1  ;;  %3266 = vmatprep.mubr.msk.bf16.mxu0 %vm3861_vm0, %v3860_v1  ;;  %s3921_s27 = scalar_lea.vmem %s4962_s0, %s3734_s24  ;;  %v3761_v38 = vld [vmem:[%s4963_s1 + $0xb0] sm:$0xff]   ;;  %v3764_v46 = vld [vmem:[%s4963_s1 + $0xa8] sm:$0xff]   ;;  %v3766_v53 = vld [vmem:[%s4963_s1 + $0x20] sm:$0xff]   ;;  %vm2021_vm6 = vsmask.f32 5376 }
  0x10   : > { %v200_v5 = vld [vmem:[%s3921_s27] sm:$0xf]  ;;  %v3930_v6 = vld [vmem:[%s3921_s27 + $0x4] sm:$0xf]  ;;  %v3944_v10 = vld [vmem:[%s3921_s27 + $0x28] sm:$0xff]  }
  0x11   : > { %3727 = vmatpush3.bf16.msra.mxu1 %v3746_v2  ;;  %3253 = vmatpush3.bf16.msra.mxu0 %v3746_v2  ;;  %v3933_v7 = vld [vmem:[%s3921_s27 + $0x20] sm:$0xff]   ;;  %v3939_v9 = vcombine.low %v200_v5, %v3930_v6  ;;  %v3951_v13 = vld [vmem:[%s3921_s27 + $0x8] sm:$0xff]   ;;  %v341_v17 = vshll.u32 %v3944_v10, 16  ;;  %v3968_v22 = vld [vmem:[%s3921_s27 + $0x30] sm:$0xff]   ;;  %v345_v35 = vshrl.u32 %v3944_v10, 16 }
  0x12   : > { %3720 = vmatprep.subr.bf16.mxu1 %v3860_v1  ;;  %3254 = vmatprep.subr.bf16.mxu0 %v3860_v1  ;;  %v333_v12 = vshll.u32 %v3933_v7, 16  ;;  %v337_v16 = vshrl.u32 %v3933_v7, 16  ;;  %v309_v21 = vshll.u32 %v3951_v13, 16  ;;  %v3971_v23 = vld [vmem:[%s3921_s27 + $0x10] sm:$0xff]   ;;  %v349_v29 = vshll.u32 %v3968_v22, 16  ;;  %v4000_v41 = vld [vmem:[%s3921_s27 + $0x38] sm:$0xff]  }
  0x13   : > { %v304_v14 = vshll.u32 %v3939_v9, 16  ;;  %v302_v19 = vshrl.u32 %v3939_v9, 16  ;;  %v343_v26 = vrot.slane %v341_v17, 1  ;;  %v317_v30 = vshll.u32 %v3971_v23, 16  ;;  %v4003_v42 = vld [vmem:[%s3921_s27 + $0x18] sm:$0xff]   ;;  %v3767_v54 = vld [vmem:[%s4963_s1 + $0xa0] sm:$0xff]  }
  0x14   : > { %v3961_v18 = vrot.slane %v333_v12, 1  ;;  %v311_v28 = vrot.slane %v309_v21, 1  ;;  %v313_v36 = vshrl.u32 %v3951_v13, 16  ;;  %v351_v39 = vrot.slane %v349_v29, 1  ;;  %v4032_v55 = vld [vmem:[%s3921_s27 + $0x40] sm:$0xff]   ;;  %v3769_v61 = vld [vmem:[%s4963_s1 + $0x18] sm:$0xff]  }
  0x15   : > { %3728 = vmatpush3.bf16.msra.mxu1 %v3747_v3  ;;  %3255 = vmatpush3.bf16.msra.mxu0 %v3747_v3  ;;  %v306_v20 = vrot.slane %v304_v14, 1  ;;  %v319_v40 = vrot.slane %v317_v30, 1  ;;  %v347_v43 = vor.u32 %v345_v35, %v343_v26  ;;  %v353_v47 = vshrl.u32 %v3968_v22, 16  ;;  %v3776_v60 = vld [vmem:[%s3921_s27 + $0x48] ss:$0 sps:$4 sm:$0x11]  }
  0x16   : > { %3721 = vmatprep.subr.bf16.mxu1 %v3860_v1  ;;  %3256 = vmatprep.subr.bf16.mxu0 %v3860_v1  ;;  %v339_v25 = vor.u32 %v337_v16, %v3961_v18  ;;  %v315_v44 = vor.u32 %v313_v36, %v311_v28  ;;  %v321_v48 = vshrl.u32 %v3971_v23, 16  ;;  %v357_v51 = vshll.u32 %v4000_v41, 16  ;;  %v3770_v62 = vld [vmem:[%s4963_s1 + $0x98] sm:$0xff]  }
  0x17   : > { %v307_v27 = vor.u32 %v306_v20, %v302_v19  ;;  %v352_v49 = vsel %vm300_vm1, %v347_v43, %v351_v39  ;;  %v325_v52 = vshll.u32 %v4003_v42, 16  ;;  %v355_v56 = vor.u32 %v353_v47, %v351_v39  ;;  %v701_v19 = vld [vmem:[%s3921_s27] sm:$0xe]  ;;  %v3781_v35 = vld [vmem:[%s4963_s1 + $0x138] sm:$0xff]   ;;  %v3782_v43 = vld [vmem:[%s4963_s1 + $0xf0] sm:$0xff]  }
  0x18   : > { %v344_v31 = vsel %vm300_vm1, %v339_v25, %v343_v26  ;;  %v320_v50 = vsel %vm300_vm1, %v315_v44, %v319_v40  ;;  %v359_v57 = vrot.slane %v357_v51, 1  ;;  %v323_v58 = vor.u32 %v321_v48, %v319_v40  ;;  %v3774_v26 = vld [vmem:[%s4963_s1 + $0x88] sm:$0xff]   ;;  %v3789_v47 = vld [vmem:[%s4963_s1 + $0x118] sm:$0xff]  }
  0x19   : > { %3729 = vmatpush3.bf16.msra.mxu1 %v3748_v4  ;;  %3257 = vmatpush3.bf16.msra.mxu0 %v3748_v4  ;;  %v312_v33 = vsel %vm300_vm1, %v307_v27, %v311_v28  ;;  %v327_v59 = vrot.slane %v325_v52, 1  ;;  %v361_v63 = vshrl.u32 %v4000_v41, 16  ;;  %v365_v0 = vshll.u32 %v4032_v55, 16  ;;  %v3785_v40 = vld [vmem:[%s4963_s1 + $0x128] sm:$0xff]   ;;  %v3788_v51 = vld [vmem:[%s4963_s1 + $0xd8] sm:$0xff]  }
  0x1a   : > { %3722 = vmatprep.subr.bf16.mxu1 %v3860_v1  ;;  %3258 = vmatprep.subr.bf16.mxu0 %v3860_v1  ;;  %v329_v2 = vshrl.u32 %v4003_v42, 16  ;;  %v360_v3 = vsel %vm300_vm1, %v355_v56, %v359_v57  ;;  %v738_v5 = vrot.slane %v4032_v55, 1  ;;  %v373_v20 = vshll.u32 %v3776_v60, 16  ;;  %v1496_v52 = vld [vmem:[%s3921_s27 + $0x8] sm:$0xc] }
  0x1b   : > { %v328_v4 = vsel %vm300_vm1, %v323_v58, %v327_v59  ;;  %v367_v14 = vrot.slane %v365_v0, 1  ;;  %v363_v16 = vor.u32 %v361_v63, %v359_v57  ;;  %v2827_v21 = vcombine.low %v701_v19, %v3930_v6  ;;  %v3775_v6 = vld [vmem:[%s4963_s1 + $0x8] sm:$0xff]  }
  0x1c   : > { %v331_v17 = vor.u32 %v329_v2, %v327_v59  ;;  %v369_v27 = vshrl.u32 %v4032_v55, 16  ;;  %v375_v28 = vrot.slane %v373_v20, 1  ;;  %v724_v30 = vrot.slane %v3951_v13, 1  ;;  %v3790_v59 = vld [vmem:[%s4963_s1 + $0xd0] sm:$0xff]   ;;  %v3792_v63 = vld [vmem:[%s4963_s1 + $0xc8] sm:$0xff]   ;;  %v3795_v2 = vld [vmem:[%s4963_s1 + $0x100] sm:$0xff]  }
  0x1d   : > { %3730 = vmatpush3.bf16.msra.mxu1 %v3749_v8  ;;  %3259 = vmatpush3.bf16.msra.mxu0 %v3749_v8  ;;  %v740_v8 = vrot.slane %v3776_v60, 1  ;;  %v723_v29 = vrot.slane %v2827_v21, 1  ;;  %v726_v36 = vrot.slane %v3971_v23, 1  ;;  %v728_v44 = vrot.slane %v4003_v42, 1  ;;  %v3793_v60 = vld [vmem:[%s4963_s1 + $0x108] sm:$0xff]  }
  0x1e   : > { %3723 = vmatprep.subr.bf16.mxu1 %v3860_v1  ;;  %3260 = vmatprep.subr.bf16.mxu0 %v3860_v1  ;;  %v336_v25 = vsel %vm300_vm1, %v331_v17, %v3961_v18  ;;  %v3777_v18 = vld [vmem:[%s4963_s1 + $0x80] sm:$0xff]   ;;  %v730_v48 = vrot.slane %v3933_v7, 1  ;;  %v736_v17 = vrot.slane %v4000_v41, 1  ;;  %v4234_v19 = vld [vmem:[%s3921_s27 + $0x28] sm:$0xff]  }
  0x1f   : > { %v4061_v12 = vsel %vm722_vm2, %v738_v5, %v740_v8  ;;  %v727_v39 = vsel %vm722_vm2, %v724_v30, %v726_v36  ;;  %v734_v8 = vrot.slane %v3968_v22, 1  ;;  %v1525_v21 = vrot.slane %v4234_v19, 2 }
  0x21   : > { %3731 = vmatpush3.bf16.msra.mxu1 %v3750_v11  ;;  %3261 = vmatpush3.bf16.msra.mxu0 %v3750_v11  ;;  %v3772_v11 = vld [vmem:[%s4963_s1 + $0x10] sm:$0xff]   ;;  %v737_v20 = vsel %vm722_vm2, %v734_v8, %v736_v17 }
  0x22   : > { %3724 = vmatprep.subr.bf16.mxu1 %v3860_v1  ;;  %3262 = vmatprep.subr.bf16.mxu0 %v3860_v1 }
  0x25   : > { %3732 = vmatpush3.bf16.msra.mxu1 %v3751_v15  ;;  %3263 = vmatpush3.bf16.msra.mxu0 %v3751_v15  ;;  %v3773_v15 = vld [vmem:[%s4963_s1 + $0x90] sm:$0xff]  }
  0x26   : > { %3725 = vmatprep.subr.bf16.mxu1 %v3860_v1  ;;  %3264 = vmatprep.subr.bf16.mxu0 %v3860_v1 }
  0x29   : > { %3733 = vmatpush3.bf16.msra.mxu1 %v3752_v24  ;;  %3265 = vmatpush3.bf16.msra.mxu0 %v3752_v24  ;;  %v368_v24 = vsel %vm300_vm1, %v363_v16, %v367_v14 }
  0x2a   : > { %3302 = vmatprep.subr.bf16.mxu1 %v3860_v1  ;;  %3354 = vmatprep.subr.bf16.mxu0 %v3860_v1 }
  0x2c   : > { %3283 = vmatmul.mubr.bf16.vlgmr.msra.gmra.mxu1 %v344_v31  ;;  %3267 = vmatmul.mubr.bf16.vlgmr.msra.gmra.mxu0 %v312_v33  ;;  %v371_v31 = vor.u32 %v369_v27, %v367_v14  ;;  %v4217_v14 = vld [vmem:[%s3921_s27 + $0x20] sm:$0xff]   ;;  %v739_v27 = vsel %vm722_vm2, %v736_v17, %v738_v5  ;;  %v3812_v17 = vld [vmem:[%s4963_s1 + $0x198] sm:$0xff]  }
  0x2d   : > { %3303 = vmatpush3.bf16.msra.mxu1 %v3755_v32  ;;  %3355 = vmatpush3.bf16.msra.mxu0 %v3759_v34  ;;  %v3778_v32 = vld [vmem:[%s4963_s1] sm:$0xff]   ;;  %v725_v34 = vsel %vm722_vm2, %v723_v29, %v724_v30  ;;  %v4266_v30 = vld [vmem:[%s3921_s27 + $0x38] sm:$0xff]  }
  0x2e   : > { %3304 = vmatprep.subr.bf16.mxu1 %v3860_v1  ;;  %3286 = vmatprep.mubr.msk.bf16.mxu1 %vm3861_vm0, %v3860_v1  ;;  %v376_v33 = vsel %vm300_vm1, %v371_v31, %v375_v28 }
  0x2f   : > { %3356 = vmatprep.subr.bf16.mxu0 %v3860_v1  ;;  %3270 = vmatprep.mubr.msk.bf16.mxu0 %vm3861_vm0, %v3860_v1 }
  0x31   : > { %3305 = vmatpush3.bf16.msra.mxu1 %v3758_v37  ;;  %3357 = vmatpush3.bf16.msra.mxu0 %v3761_v38  ;;  %v3783_v37 = vld [vmem:[%s4963_s1 + $0x130] sm:$0xff]   ;;  %v3780_v38 = vld [vmem:[%s4963_s1 + $0xf8] sm:$0xff]  }
  0x32   : > { %3306 = vmatprep.subr.bf16.mxu1 %v3860_v1  ;;  %3358 = vmatprep.subr.bf16.mxu0 %v3860_v1 }
  0x34   : > { %3287 = vmatmul.mubr.bf16.gmra.mxu1 %v352_v49  ;;  %3271 = vmatmul.mubr.bf16.gmra.mxu0 %v320_v50  ;;  %v3786_v49 = vld [vmem:[%s4963_s1 + $0xe0] sm:$0xff]   ;;  %v4160_v50 = vld [vmem:[%s3921_s27 + $0x10] sm:$0xff]  }
  0x35   : > { %3307 = vmatpush3.bf16.msra.mxu1 %v3762_v45  ;;  %3359 = vmatpush3.bf16.msra.mxu0 %v3764_v46  ;;  %v729_v45 = vsel %vm722_vm2, %v726_v36, %v728_v44  ;;  %v3784_v46 = vld [vmem:[%s4963_s1 + $0xe8] sm:$0xff]   ;;  %v1519_v57 = vrot.slane %v4160_v50, 2  ;;  %v1236_v29 = vshrl.u32 %v4160_v50, 16  ;;  %v1239_v5 = vshll.u32 %v4160_v50, 16 }
  0x36   : > { %3290 = vmatprep.mubr.msk.bf16.mxu1 %vm3861_vm0, %v3860_v1  ;;  %3308 = vmatprep.subr.bf16.mxu1 %v3860_v1 }
  0x37   : > { %3360 = vmatprep.subr.bf16.mxu0 %v3860_v1  ;;  %3274 = vmatprep.mubr.msk.bf16.mxu0 %vm3861_vm0, %v3860_v1 }
  0x39   : > { %3309 = vmatpush3.bf16.msra.mxu1 %v3766_v53  ;;  %3361 = vmatpush3.bf16.msra.mxu0 %v3767_v54  ;;  %v731_v53 = vsel %vm722_vm2, %v728_v44, %v730_v48  ;;  %v3791_v54 = vld [vmem:[%s4963_s1 + $0x110] sm:$0xff]  }
  0x3a   : > { %3310 = vmatprep.subr.bf16.mxu1 %v3860_v1  ;;  %3362 = vmatprep.subr.bf16.mxu0 %v3860_v1 }
  0x3c   : > { %3291 = vmatmul.mubr.bf16.gmra.mxu1 %v360_v3  ;;  %3275 = vmatmul.mubr.bf16.gmra.mxu0 %v328_v4 }
  0x3d   : > { %3311 = vmatpush3.bf16.msra.mxu1 %v3769_v61  ;;  %3363 = vmatpush3.bf16.msra.mxu0 %v3770_v62  ;;  %v732_v61 = vrot.slane %v3944_v10, 1  ;;  %v4187_v62 = vld [vmem:[%s3921_s27 + $0x18] sm:$0xff]  }
  0x3e   : > { %3294 = vmatprep.mubr.msk.bf16.mxu1 %vm3861_vm0, %v3860_v1  ;;  %3312 = vmatprep.subr.bf16.mxu1 %v3860_v1  ;;  %v1521_v3 = vrot.slane %v4187_v62, 2 }
  0x3f   : > { %3364 = vmatprep.subr.bf16.mxu0 %v3860_v1  ;;  %3278 = vmatprep.mubr.msk.bf16.mxu0 %vm3861_vm0, %v3860_v1  ;;  %v733_v0 = vsel %vm722_vm2, %v730_v48, %v732_v61 }
  0x40   : > { %v4205_v4 = vsel %vm1517_vm3, %v1519_v57, %v1521_v3 }
  0x41   : > { %3313 = vmatpush3.bf16.msra.mxu1 %v3772_v11  ;;  %3365 = vmatpush3.bf16.msra.mxu0 %v3773_v15  ;;  %v3794_v11 = vld [vmem:[%s4963_s1 + $0xc0] sm:$0xff]   ;;  %v1523_v15 = vrot.slane %v4217_v14, 2 }
  0x42   : > { %3366 = vmatprep.subr.bf16.mxu0 %v3860_v1  ;;  %3314 = vmatprep.subr.bf16.mxu1 %v3860_v1 }
  0x43   : > { %v4225_v16 = vsel %vm1517_vm3, %v1521_v3, %v1523_v15  ;;  %v3809_v3 = vld [vmem:[%s4963_s1 + $0x1a0] sm:$0xff]  }
  0x44   : > { %3295 = vmatmul.mubr.bf16.gmra.mxu1 %v368_v24  ;;  %3279 = vmatmul.mubr.bf16.gmra.mxu0 %v336_v25  ;;  %v4239_v24 = vsel %vm1517_vm3, %v1523_v15, %v1525_v21  ;;  %v4248_v25 = vld [vmem:[%s3921_s27 + $0x30] sm:$0xff]  }
  0x45   : > { %3367 = vmatpush3.bf16.msra.mxu0 %v3774_v26  ;;  %3298 = vmatprep.mubr.msk.bf16.mxu1 %vm3861_vm0, %v3860_v1 }
  0x46   : > { %3315 = vmatpush3.bf16.msra.mxu1 %v3775_v6  ;;  %3368 = vmatprep.subr.bf16.mxu0 %v3860_v1  ;;  %v1527_v6 = vrot.slane %v4248_v25, 2 }
  0x47   : > { %3316 = vmatprep.subr.bf16.mxu1 %v3860_v1  ;;  %3370 = vmatprep.mubr.msk.bf16.mxu0 %vm3861_vm0, %v3860_v1 }
  0x49   : > { %3369 = vmatpush3.bf16.msra.mxu0 %v3777_v18 }
  0x4a   : > { %3317 = vmatpush3.bf16.msra.mxu1 %v3778_v32  ;;  %3458 = vmatprep.subr.bf16.mxu0 %v3860_v1 }
  0x4b   : > { %3406 = vmatprep.subr.bf16.mxu1 %v3860_v1 }
  0x4c   : > { %3299 = vmatmul.mubr.bf16.gmra.mxu1 %v376_v33  ;;  %3371 = vmatmul.mubr.bf16.vlgmr.msra.gmra.mxu0 %v725_v34  ;;  %v1238_v33 = vrot.slane %v1236_v29, 1  ;;  %v1529_v34 = vrot.slane %v4266_v30, 2  ;;  %v3811_v29 = vld [vmem:[%s4963_s1 + $0x158] sm:$0xff]  }
  0x4d   : > { %3318 = vmatprep.mubr.msk.bf16.mxu1 %vm3861_vm0, %v3860_v1  ;;  %3459 = vmatpush3.bf16.msra.mxu0 %v3781_v35 }
  0x4e   : > { %3374 = vmatprep.mubr.msk.bf16.mxu0 %vm3861_vm0, %v3860_v1  ;;  %3460 = vmatprep.subr.bf16.mxu0 %v3860_v1  ;;  %v4270_v35 = vsel %vm1517_vm3, %v1527_v6, %v1529_v34 }
  0x51   : > { %3461 = vmatpush3.bf16.msra.mxu0 %v3783_v37 }
  0x52   : > { %3462 = vmatprep.subr.bf16.mxu0 %v3860_v1 }
  0x54   : > { %3319 = vmatmul.mubr.bf16.vlgmr.msra.gmra.mxu1 %v3939_v9  ;;  %3375 = vmatmul.mubr.bf16.gmra.mxu0 %v727_v39  ;;  %v3787_v9 = vld [vmem:[%s4963_s1 + $0x120] sm:$0xff]   ;;  %v1248_v39 = vshll.u32 %v4187_v62, 16 }
  0x55   : > { %3407 = vmatpush3.bf16.msra.mxu1 %v3780_v38  ;;  %3322 = vmatprep.mubr.msk.bf16.mxu1 %vm3861_vm0, %v3860_v1  ;;  %v1245_v38 = vshrl.u32 %v4187_v62, 16 }
  0x56   : > { %3408 = vmatprep.subr.bf16.mxu1 %v3860_v1  ;;  %3378 = vmatprep.mubr.msk.bf16.mxu0 %vm3861_vm0, %v3860_v1  ;;  %v1250_v44 = vrot.slane %v1248_v39, 2 }
  0x57   : > { %3463 = vmatpush3.bf16.msra.mxu0 %v3785_v40  ;;  %v4281_v40 = vld [vmem:[%s3921_s27 + $0x40] sm:$0xff]  }
  0x58   : > { %3464 = vmatprep.subr.bf16.mxu0 %v3860_v1 }
  0x59   : > { %3409 = vmatpush3.bf16.msra.mxu1 %v3782_v43 }
  0x5a   : > { %3410 = vmatprep.subr.bf16.mxu1 %v3860_v1 }
  0x5b   : > { %3465 = vmatpush3.bf16.msra.mxu0 %v3787_v9  ;;  %v1531_v9 = vrot.slane %v4281_v40, 2 }
  0x5c   : > { %3323 = vmatmul.mubr.bf16.gmra.mxu1 %v3951_v13  ;;  %3379 = vmatmul.mubr.bf16.gmra.mxu0 %v729_v45  ;;  %v4156_v13 = vld [vmem:[%s3921_s27 + $0xc] sm:$0xf] }
  0x5d   : > { %3326 = vmatprep.mubr.msk.bf16.mxu1 %vm3861_vm0, %v3860_v1  ;;  %3411 = vmatpush3.bf16.msra.mxu1 %v3784_v46  ;;  %v2911_v56 = vcombine.low %v1496_v52, %v4156_v13  ;;  %v4289_v45 = vsel %vm1517_vm3, %v1529_v34, %v1531_v9  ;;  %v3798_v52 = vld [vmem:[%s4963_s1 + $0x178] sm:$0xff]   ;;  %v3814_v34 = vld [vmem:[%s4963_s1 + $0x150] sm:$0xff]  }
  0x5e   : > { %3382 = vmatprep.mubr.msk.bf16.mxu0 %vm3861_vm0, %v3860_v1  ;;  %3412 = vmatprep.subr.bf16.mxu1 %v3860_v1 }
  0x5f   : > { %3466 = vmatprep.subr.bf16.mxu0 %v3860_v1  ;;  %v1518_v58 = vrot.slane %v2911_v56, 2 }
  0x60   : > { %3467 = vmatpush3.bf16.msra.mxu0 %v3789_v47  ;;  %v1007_v47 = vrot.slane %v4160_v50, 1 }
  0x61   : > { %3413 = vmatpush3.bf16.msra.mxu1 %v3786_v49  ;;  %3468 = vmatprep.subr.bf16.mxu0 %v3860_v1  ;;  %v3802_v49 = vld [vmem:[%s4963_s1 + $0x1b0] sm:$0xff]  }
  0x62   : > { %3414 = vmatprep.subr.bf16.mxu1 %v3860_v1 }
  0x64   : > { %3327 = vmatmul.mubr.bf16.gmra.mxu1 %v3971_v23  ;;  %3383 = vmatmul.mubr.bf16.gmra.mxu0 %v731_v53  ;;  %v4190_v23 = vsel %vm1517_vm3, %v1518_v58, %v1519_v57  ;;  %v3806_v58 = vld [vmem:[%s4963_s1 + $0x1a8] sm:$0xff]  }
  0x65   : > { %3330 = vmatprep.mubr.msk.bf16.mxu1 %vm3861_vm0, %v3860_v1  ;;  %3386 = vmatprep.mubr.msk.bf16.mxu0 %vm3861_vm0, %v3860_v1 }
  0x66   : > { %3415 = vmatpush3.bf16.msra.mxu1 %v3788_v51  ;;  %3469 = vmatpush3.bf16.msra.mxu0 %v3791_v54  ;;  %v1257_v51 = vshll.u32 %v4217_v14, 16 }
  0x67   : > { %3416 = vmatprep.subr.bf16.mxu1 %v3860_v1  ;;  %3470 = vmatprep.subr.bf16.mxu0 %v3860_v1 }
  0x68   : > { %v1259_v56 = vrot.slane %v1257_v51, 2  ;;  %v1017_v51 = vrot.slane %v4266_v30, 1 }
  0x6a   : > { %3417 = vmatpush3.bf16.msra.mxu1 %v3790_v59  ;;  %3471 = vmatpush3.bf16.msra.mxu0 %v3793_v60  ;;  %v1009_v60 = vrot.slane %v4187_v62, 1 }
  0x6b   : > { %3418 = vmatprep.subr.bf16.mxu1 %v3860_v1  ;;  %3472 = vmatprep.subr.bf16.mxu0 %v3860_v1 }
  0x6c   : > { %3331 = vmatmul.mubr.bf16.gmra.mxu1 %v4003_v42  ;;  %3387 = vmatmul.mubr.bf16.gmra.mxu0 %v733_v0  ;;  %v735_v42 = vsel %vm722_vm2, %v732_v61, %v734_v8  ;;  %v3801_v61 = vld [vmem:[%s4963_s1 + $0x170] sm:$0xff]   ;;  %v1263_v0 = vshrl.u32 %v4234_v19, 16  ;;  %v1010_v62 = vsel %vm722_vm2, %v1007_v47, %v1009_v60 }
  0x6d   : > { %3334 = vmatprep.mubr.msk.bf16.mxu1 %vm3861_vm0, %v3860_v1  ;;  %3390 = vmatprep.mubr.msk.bf16.mxu0 %vm3861_vm0, %v3860_v1 }
  0x6e   : > { %3419 = vmatpush3.bf16.msra.mxu1 %v3792_v63  ;;  %3473 = vmatpush3.bf16.msra.mxu0 %v3795_v2  ;;  %v1266_v2 = vshll.u32 %v4234_v19, 16 }
  0x6f   : > { %3420 = vmatprep.subr.bf16.mxu1 %v3860_v1  ;;  %3562 = vmatprep.subr.bf16.mxu0 %v3860_v1 }
  0x70   : > { %v1268_v15 = vrot.slane %v1266_v2, 2 }
  0x72   : > { %3421 = vmatpush3.bf16.msra.mxu1 %v3794_v11  ;;  %v3804_v11 = vld [vmem:[%s4963_s1 + $0x168] sm:$0xff]  }
  0x73   : > { %3510 = vmatprep.subr.bf16.mxu1 %v3860_v1 }
  0x74   : > { %3335 = vmatmul.mubr.bf16.gmra.mxu1 %v3933_v7  ;;  %3391 = vmatmul.mubr.bf16.gmra.mxu0 %v735_v42  ;;  %v922_v7 = vld [vmem:[%s3921_s27 + $0x8] sm:$0xe]  ;;  %v1265_v42 = vrot.slane %v1263_v0, 1 }
  0x75   : > { %3338 = vmatprep.mubr.msk.bf16.mxu1 %vm3861_vm0, %v3860_v1  ;;  %3394 = vmatprep.mubr.msk.bf16.mxu0 %vm3861_vm0, %v3860_v1  ;;  %v2852_v26 = vcombine.low %v922_v7, %v4156_v13  ;;  %v1254_v13 = vshrl.u32 %v4217_v14, 16  ;;  %v3807_v7 = vld [vmem:[%s4963_s1 + $0x160] sm:$0xff]  }
  0x77   : > { %v1228_v28 = vshrl.u32 %v2852_v26, 16  ;;  %v1231_v18 = vshll.u32 %v2852_v26, 16  ;;  %v1006_v46 = vrot.slane %v2852_v26, 1  ;;  %v1256_v54 = vrot.slane %v1254_v13, 1 }
  0x78   : > { %v1272_v26 = vshrl.u32 %v4248_v25, 16 }
  0x79   : > { %v1230_v31 = vrot.slane %v1228_v28, 1  ;;  %v1233_v32 = vrot.slane %v1231_v18, 2  ;;  %v1008_v50 = vsel %vm722_vm2, %v1006_v46, %v1007_v47  ;;  %v1260_v63 = vor.u32 %v1259_v56, %v1256_v54  ;;  %v3821_v47 = vld [vmem:[%s4963_s1 + $0x140] sm:$0xff]  }
  0x7a   : > { %v1274_v28 = vrot.slane %v1272_v26, 1  ;;  %v1293_v46 = vshll.u32 %v4281_v40, 16 }
  0x7b   : > { %v1234_v36 = vor.u32 %v1233_v32, %v1230_v31  ;;  %v1013_v31 = vrot.slane %v4234_v19, 1 }
  0x7c   : > { %3339 = vmatmul.mubr.bf16.gmra.mxu1 %v3944_v10  ;;  %3395 = vmatmul.mubr.bf16.gmra.mxu0 %v737_v20  ;;  %v4256_v10 = vsel %vm1517_vm3, %v1525_v21, %v1527_v6  ;;  %v1011_v20 = vrot.slane %v4217_v14, 1  ;;  %v1269_v21 = vor.u32 %v1268_v15, %v1265_v42  ;;  %v1295_v13 = vrot.slane %v1293_v46, 2  ;;  %v1717_v15 = vld [vmem:[%s3921_s27 + $0x10] sm:$0xc] }
  0x7d   : > { %3342 = vmatprep.mubr.msk.bf16.mxu1 %vm3861_vm0, %v3860_v1  ;;  %3398 = vmatprep.mubr.msk.bf16.mxu0 %vm3861_vm0, %v3860_v1 }
  0x7e   : > { %v1012_v14 = vsel %vm722_vm2, %v1009_v60, %v1011_v20  ;;  %v1270_v6 = vsel %vm1226_vm4, %v1260_v63, %v1269_v21  ;;  %v1014_v19 = vsel %vm722_vm2, %v1011_v20, %v1013_v31 }
  0x84   : > { %3343 = vmatmul.mubr.bf16.gmra.mxu1 %v3968_v22  ;;  %3399 = vmatmul.mubr.bf16.gmra.mxu0 %v739_v27  ;;  %v1241_v22 = vrot.slane %v1239_v5, 2  ;;  %v1275_v27 = vshll.u32 %v4248_v25, 16  ;;  %v3815_v5 = vld [vmem:[%s4963_s1 + $0x190] sm:$0xff]  }
  0x85   : > { %3346 = vmatprep.mubr.msk.bf16.mxu1 %vm3861_vm0, %v3860_v1  ;;  %3402 = vmatprep.mubr.msk.bf16.mxu0 %vm3861_vm0, %v3860_v1 }
  0x86   : > { %v1242_v37 = vor.u32 %v1241_v22, %v1238_v33  ;;  %v1277_v18 = vrot.slane %v1275_v27, 2  ;;  %v1281_v33 = vshrl.u32 %v4266_v30, 16  ;;  %v1284_v22 = vshll.u32 %v4266_v30, 16  ;;  %v4444_v27 = vld [vmem:[%s3921_s27 + $0x18] sm:$0xff]  }
  0x87   : > { %v1019_v30 = vrot.slane %v4281_v40, 1 }
  0x88   : > { %v1243_v43 = vsel %vm1226_vm4, %v1234_v36, %v1242_v37  ;;  %v1278_v32 = vor.u32 %v1277_v18, %v1274_v28  ;;  %v3818_v36 = vld [vmem:[%s4963_s1 + $0x188] sm:$0xff]   ;;  %v1286_v39 = vrot.slane %v1284_v22, 2  ;;  %v1802_v28 = vrot.slane %v4444_v27, 2  ;;  %v3826_v22 = vld [vmem:[%s4963_s1 + $0x1f8] sm:$0xff]  }
  0x8c   : > { %3347 = vmatmul.mubr.bf16.gmra.mxu1 %v4000_v41  ;;  %3403 = vmatmul.mubr.bf16.gmra.mxu0 %v4061_v12  ;;  %v3799_v41 = vld [vmem:[%s4963_s1 + $0x1b8] sm:$0xff]   ;;  %v1247_v12 = vrot.slane %v1245_v38, 1  ;;  %v1283_v38 = vrot.slane %v1281_v33, 1  ;;  %v3830_v33 = vld [vmem:[%s4963_s1 + $0x230] sm:$0xff]  }
  0x8d   : > { %3350 = vmatprep.mubr.msk.bf16.mxu1 %vm3861_vm0, %v3860_v1  ;;  %3474 = vmatprep.mubr.msk.bf16.mxu0 %vm3861_vm0, %v3860_v1 }
  0x8e   : > { %v1251_v48 = vor.u32 %v1250_v44, %v1247_v12  ;;  %v1015_v12 = vrot.slane %v4248_v25, 1  ;;  %v1287_v44 = vor.u32 %v1286_v39, %v1283_v38 }
  0x90   : > { %v1252_v53 = vsel %vm1226_vm4, %v1242_v37, %v1251_v48  ;;  %v1261_v8 = vsel %vm1226_vm4, %v1251_v48, %v1260_v63  ;;  %v1279_v37 = vsel %vm1226_vm4, %v1269_v21, %v1278_v32  ;;  %v1016_v25 = vsel %vm722_vm2, %v1013_v31, %v1015_v12  ;;  %v4458_v31 = vld [vmem:[%s3921_s27 + $0x20] sm:$0xff]  }
  0x91   : > { %v1288_v48 = vsel %vm1226_vm4, %v1278_v32, %v1287_v44  ;;  %v1018_v54 = vsel %vm722_vm2, %v1015_v12, %v1017_v51  ;;  %v1804_v32 = vrot.slane %v4458_v31, 2 }
  0x94   : > { %3351 = vmatmul.mubr.bf16.gmra.mxu1 %v4032_v55  ;;  %3475 = vmatmul.mubr.bf16.vlgmr.msra.gmra.mxu0 %v1243_v43  ;;  %v4304_v55 = vld [vmem:[%s3921_s27 + $0x48] sm:$0xff]  }
  0x95   : > { %3422 = vmatprep.mubr.msk.bf16.mxu1 %vm3861_vm0, %v3860_v1  ;;  %3563 = vmatpush3.bf16.msra.mxu0 %v3799_v41  ;;  %v1533_v57 = vrot.slane %v4304_v55, 2  ;;  %v3817_v43 = vld [vmem:[%s4963_s1 + $0x148] sm:$0xff]   ;;  %v3822_v41 = vld [vmem:[%s4963_s1 + $0x180] sm:$0xff]  }
  0x96   : > { %3478 = vmatprep.mubr.msk.bf16.mxu0 %vm3861_vm0, %v3860_v1  ;;  %3564 = vmatprep.subr.bf16.mxu0 %v3860_v1 }
  0x97   : > { %v4319_v59 = vsel %vm1517_vm3, %v1531_v9, %v1533_v57  ;;  %v1290_v9 = vshrl.u32 %v4281_v40, 16  ;;  %v1021_v40 = vrot.slane %v4304_v55, 1 }
  0x99   : > { %3565 = vmatpush3.bf16.msra.mxu0 %v3802_v49  ;;  %v1292_v49 = vrot.slane %v1290_v9, 1  ;;  %v1022_v20 = vsel %vm722_vm2, %v1019_v30, %v1021_v40  ;;  %v3840_v9 = vld [vmem:[%s4963_s1 + $0x218] sm:$0xff]  }
  0x9a   : > { %3566 = vmatprep.subr.bf16.mxu0 %v3860_v1 }
  0x9c   : > { %3423 = vmatmul.mubr.bf16.vlgmr.msra.gmra.mxu1 %v1008_v50  ;;  %3479 = vmatmul.mubr.bf16.gmra.mxu0 %v1252_v53  ;;  %v1296_v50 = vor.u32 %v1295_v13, %v1292_v49  ;;  %v1302_v53 = vshll.u32 %v4304_v55, 16 }
  0x9d   : > { %3511 = vmatpush3.bf16.msra.mxu1 %v3798_v52  ;;  %3426 = vmatprep.mubr.msk.bf16.mxu1 %vm3861_vm0, %v3860_v1  ;;  %v1299_v52 = vshrl.u32 %v4304_v55, 16  ;;  %v2040_v55 = vshrl.u32 %v4458_v31, 16 }
  0x9e   : > { %3512 = vmatprep.subr.bf16.mxu1 %v3860_v1  ;;  %3482 = vmatprep.mubr.msk.bf16.mxu0 %vm3861_vm0, %v3860_v1  ;;  %v1297_v56 = vsel %vm1226_vm4, %v1287_v44, %v1296_v50  ;;  %v1304_v60 = vrot.slane %v1302_v53, 2  ;;  %v3839_v53 = vld [vmem:[%s4963_s1 + $0x1d8] sm:$0xff]  }
  0x9f   : > { %3567 = vmatpush3.bf16.msra.mxu0 %v3806_v58  ;;  %v1301_v58 = vrot.slane %v1299_v52, 1 }
  0xa0   : > { %3568 = vmatprep.subr.bf16.mxu0 %v3860_v1 }
  0xa1   : > { %3513 = vmatpush3.bf16.msra.mxu1 %v3801_v61  ;;  %v4417_v61 = vld [vmem:[%s3921_s27 + $0x50] ss:$0 sps:$4 sm:$0x33]   ;;  %v1305_v63 = vor.u32 %v1304_v60, %v1301_v58 }
  0xa2   : > { %3514 = vmatprep.subr.bf16.mxu1 %v3860_v1  ;;  %v1308_v0 = vshrl.u32 %v4417_v61, 16  ;;  %v1311_v2 = vshll.u32 %v4417_v61, 16 }
  0xa3   : > { %3569 = vmatpush3.bf16.msra.mxu0 %v3809_v3  ;;  %v1020_v3 = vsel %vm722_vm2, %v1017_v51, %v1019_v30  ;;  %v4526_v51 = vld [vmem:[%s3921_s27 + $0x38] sm:$0xff]  }
  0xa4   : > { %3427 = vmatmul.mubr.bf16.gmra.mxu1 %v1010_v62  ;;  %3483 = vmatmul.mubr.bf16.gmra.mxu0 %v1261_v8  ;;  %v1306_v62 = vsel %vm1226_vm4, %v1296_v50, %v1305_v63  ;;  %v1310_v8 = vrot.slane %v1308_v0, 1  ;;  %v1810_v60 = vrot.slane %v4526_v51, 2  ;;  %v3842_v0 = vld [vmem:[%s4963_s1 + $0x1d0] sm:$0xff]  }
  0xa5   : > { %3430 = vmatprep.mubr.msk.bf16.mxu1 %vm3861_vm0, %v3860_v1  ;;  %3515 = vmatpush3.bf16.msra.mxu1 %v3804_v11  ;;  %v1313_v11 = vrot.slane %v1311_v2, 2 }
  0xa6   : > { %3486 = vmatprep.mubr.msk.bf16.mxu0 %vm3861_vm0, %v3860_v1  ;;  %3516 = vmatprep.subr.bf16.mxu1 %v3860_v1 }
  0xa7   : > { %3570 = vmatprep.subr.bf16.mxu0 %v3860_v1  ;;  %v1314_v42 = vor.u32 %v1313_v11, %v1310_v8  ;;  %v4560_v8 = vld [vmem:[%s3921_s27 + $0x40] sm:$0xff]  }
  0xa8   : > { %3571 = vmatpush3.bf16.msra.mxu0 %v3812_v17  ;;  %v4435_v17 = vld [vmem:[%s3921_s27 + $0x14] sm:$0xf] }
  0xa9   : > { %3517 = vmatpush3.bf16.msra.mxu1 %v3807_v7  ;;  %3572 = vmatprep.subr.bf16.mxu0 %v3860_v1  ;;  %v1315_v21 = vsel %vm1226_vm4, %v1305_v63, %v1314_v42  ;;  %v3820_v7 = vld [vmem:[%s3921_s27 + $0x50] ss:$0 sps:$4 sm:$0x11]   ;;  %v4441_v26 = vcombine.low %v1717_v15, %v4435_v17  ;;  %v3845_v42 = vld [vmem:[%s4963_s1 + $0x1c8] sm:$0xff]   ;;  %v3849_v15 = vld [vmem:[%s4963_s1 + $0x200] sm:$0xff]  }
  0xaa   : > { %3518 = vmatprep.subr.bf16.mxu1 %v3860_v1 }
  0xac   : > { %3431 = vmatmul.mubr.bf16.gmra.mxu1 %v1012_v14  ;;  %3487 = vmatmul.mubr.bf16.gmra.mxu0 %v1270_v6  ;;  %v1023_v14 = vrot.slane %v3820_v7, 1  ;;  %v1801_v6 = vrot.slane %v4441_v26, 2  ;;  %v1812_v7 = vrot.slane %v4560_v8, 2 }
  0xad   : > { %3434 = vmatprep.mubr.msk.bf16.mxu1 %vm3861_vm0, %v3860_v1  ;;  %3490 = vmatprep.mubr.msk.bf16.mxu0 %vm3861_vm0, %v3860_v1 }
  0xae   : > { %3519 = vmatpush3.bf16.msra.mxu1 %v3811_v29  ;;  %3573 = vmatpush3.bf16.msra.mxu0 %v3815_v5  ;;  %v1024_v18 = vsel %vm722_vm2, %v1021_v40, %v1023_v14  ;;  %v1803_v29 = vsel %vm1517_vm3, %v1801_v6, %v1802_v28  ;;  %v3827_v5 = vld [vmem:[%s4963_s1 + $0x238] sm:$0xff]  }
  0xaf   : > { %3520 = vmatprep.subr.bf16.mxu1 %v3860_v1  ;;  %3574 = vmatprep.subr.bf16.mxu0 %v3860_v1 }
  0xb2   : > { %3521 = vmatpush3.bf16.msra.mxu1 %v3814_v34  ;;  %3575 = vmatpush3.bf16.msra.mxu0 %v3818_v36  ;;  %v1805_v34 = vsel %vm1517_vm3, %v1802_v28, %v1804_v32  ;;  %v4474_v36 = vld [vmem:[%s3921_s27 + $0x28] sm:$0xff]   ;;  %v3848_v28 = vld [vmem:[%s4963_s1 + $0x1c0] sm:$0xff]  }
  0xb3   : > { %3522 = vmatprep.subr.bf16.mxu1 %v3860_v1  ;;  %3576 = vmatprep.subr.bf16.mxu0 %v3860_v1  ;;  %v1806_v38 = vrot.slane %v4474_v36, 2 }
  0xb4   : > { %3435 = vmatmul.mubr.bf16.gmra.mxu1 %v1014_v19  ;;  %3491 = vmatmul.mubr.bf16.gmra.mxu0 %v1279_v37  ;;  %v3834_v19 = vld [vmem:[%s4963_s1 + $0x228] sm:$0xff]   ;;  %v3829_v37 = vld [vmem:[%s4963_s1 + $0x1f0] sm:$0xff]  }
  0xb5   : > { %3438 = vmatprep.mubr.msk.bf16.mxu1 %vm3861_vm0, %v3860_v1  ;;  %3494 = vmatprep.mubr.msk.bf16.mxu0 %vm3861_vm0, %v3860_v1  ;;  %v1807_v39 = vsel %vm1517_vm3, %v1804_v32, %v1806_v38 }
  0xb6   : > { %3523 = vmatpush3.bf16.msra.mxu1 %v3817_v43  ;;  %3577 = vmatpush3.bf16.msra.mxu0 %v3822_v41  ;;  %v3832_v43 = vld [vmem:[%s4963_s1 + $0x1e8] sm:$0xff]   ;;  %v4499_v41 = vld [vmem:[%s3921_s27 + $0x30] sm:$0xff]  }
  0xb7   : > { %3524 = vmatprep.subr.bf16.mxu1 %v3860_v1  ;;  %3666 = vmatprep.subr.bf16.mxu0 %v3860_v1  ;;  %v1808_v46 = vrot.slane %v4499_v41, 2 }
  0xb9   : > { %v1809_v13 = vsel %vm1517_vm3, %v1806_v38, %v1808_v46 }
  0xba   : > { %3525 = vmatpush3.bf16.msra.mxu1 %v3821_v47  ;;  %v3835_v47 = vld [vmem:[%s4963_s1 + $0x1e0] sm:$0xff]  }
  0xbb   : > { %3614 = vmatprep.subr.bf16.mxu1 %v3860_v1 }
  0xbc   : > { %3439 = vmatmul.mubr.bf16.gmra.mxu1 %v1016_v25  ;;  %3495 = vmatmul.mubr.bf16.gmra.mxu0 %v1288_v48 }
  0xbd   : > { %3442 = vmatprep.mubr.msk.bf16.mxu1 %vm3861_vm0, %v3860_v1  ;;  %3498 = vmatprep.mubr.msk.bf16.mxu0 %vm3861_vm0, %v3860_v1 }
  0xc4   : > { %3443 = vmatmul.mubr.bf16.gmra.mxu1 %v1018_v54  ;;  %3499 = vmatmul.mubr.bf16.gmra.mxu0 %v1297_v56  ;;  %v3843_v54 = vld [vmem:[%s4963_s1 + $0x210] sm:$0xff]  }
  0xc5   : > { %3446 = vmatprep.mubr.msk.bf16.mxu1 %vm3861_vm0, %v3860_v1  ;;  %3502 = vmatprep.mubr.msk.bf16.mxu0 %vm3861_vm0, %v3860_v1 }
  0xcc   : > { %3447 = vmatmul.mubr.bf16.gmra.mxu1 %v1020_v3  ;;  %3503 = vmatmul.mubr.bf16.gmra.mxu0 %v1306_v62  ;;  %v1811_v62 = vsel %vm1517_vm3, %v1808_v46, %v1810_v60 }
  0xcd   : > { %3450 = vmatprep.mubr.msk.bf16.mxu1 %vm3861_vm0, %v3860_v1  ;;  %3506 = vmatprep.mubr.msk.bf16.mxu0 %vm3861_vm0, %v3860_v1 }
  0xd4   : > { %3451 = vmatmul.mubr.bf16.gmra.mxu1 %v1022_v20  ;;  %3507 = vmatmul.mubr.bf16.gmra.mxu0 %v1315_v21 }
  0xd5   : > { %3454 = vmatprep.mubr.msk.bf16.mxu1 %vm3861_vm0, %v3860_v1  ;;  %3578 = vmatprep.mubr.msk.bf16.mxu0 %vm3861_vm0, %v3860_v1 }
  0xdc   : > { %3455 = vmatmul.mubr.bf16.gmra.mxu1 %v1024_v18  ;;  %3579 = vmatmul.mubr.bf16.vlgmr.msra.gmra.mxu0 %v1803_v29  ;;  %v1813_v29 = vsel %vm1517_vm3, %v1810_v60, %v1812_v7  ;;  %v3847_v60 = vld [vmem:[%s3921_s27 + $0x58] ss:$0 sps:$4 sm:$0x33]  }
  0xdd   : > { %3526 = vmatprep.mubr.msk.bf16.mxu1 %vm3861_vm0, %v3860_v1  ;;  %3667 = vmatpush3.bf16.msra.mxu0 %v3827_v5  ;;  %v4590_v5 = vld [vmem:[%s3921_s27 + $0x48] sm:$0xff]  }
  0xde   : > { %3582 = vmatprep.mubr.msk.bf16.mxu0 %vm3861_vm0, %v3860_v1  ;;  %3668 = vmatprep.subr.bf16.mxu0 %v3860_v1 }
  0xe1   : > { %3669 = vmatpush3.bf16.msra.mxu0 %v3830_v33 }
  0xe2   : > { %3670 = vmatprep.subr.bf16.mxu0 %v3860_v1 }
  0xe4   : > { %3527 = vmatmul.mubr.bf16.vlgmr.msra.gmra.mxu1 %v4190_v23  ;;  %3583 = vmatmul.mubr.bf16.gmra.mxu0 %v1805_v34  ;;  %v3837_v23 = vld [vmem:[%s4963_s1 + $0x220] sm:$0xff]  }
  0xe5   : > { %3615 = vmatpush3.bf16.msra.mxu1 %v3826_v22  ;;  %3530 = vmatprep.mubr.msk.bf16.mxu1 %vm3861_vm0, %v3860_v1 }
  0xe6   : > { %3616 = vmatprep.subr.bf16.mxu1 %v3860_v1  ;;  %3586 = vmatprep.mubr.msk.bf16.mxu0 %vm3861_vm0, %v3860_v1 }
  0xe7   : > { %3671 = vmatpush3.bf16.msra.mxu0 %v3834_v19  ;;  %v1814_v19 = vrot.slane %v4590_v5, 2 }
  0xe8   : > { %3672 = vmatprep.subr.bf16.mxu0 %v3860_v1 }
  0xe9   : > { %3617 = vmatpush3.bf16.msra.mxu1 %v3829_v37 }
  0xea   : > { %3618 = vmatprep.subr.bf16.mxu1 %v3860_v1 }
  0xeb   : > { %3673 = vmatpush3.bf16.msra.mxu0 %v3837_v23 }
  0xec   : > { %v4502_v12 = vpop.f32.mrf.mxu1  ;;  %3531 = vmatmul.mubr.bf16.gmra.mxu1 %v4205_v4  ;;  %v4505_v44 = vpop.f32.mrf.mxu0  ;;  %3587 = vmatmul.mubr.bf16.gmra.mxu0 %v1807_v39 }
  0xed   : > { %3534 = vmatprep.mubr.msk.bf16.mxu1 %vm3861_vm0, %v3860_v1  ;;  %3619 = vmatpush3.bf16.msra.mxu1 %v3832_v43  ;;  %v1815_v43 = vsel %vm1517_vm3, %v1812_v7, %v1814_v19 }
  0xee   : > { %v3284_v25 = vpop.f32.mrf.mxu1  ;;  %v3268_v4 = vpop.f32.mrf.mxu0  ;;  %3590 = vmatprep.mubr.msk.bf16.mxu0 %vm3861_vm0, %v3860_v1  ;;  %3620 = vmatprep.subr.bf16.mxu1 %v3860_v1 }
  0xef   : > { %3674 = vmatprep.subr.bf16.mxu0 %v3860_v1 }
  0xf0   : > { %v4520_v48 = vpop.f32.mrf.mxu1  ;;  %v4522_v49 = vpop.f32.mrf.mxu0  ;;  %3675 = vmatpush3.bf16.msra.mxu0 %v3840_v9 }
  0xf1   : > { %3621 = vmatpush3.bf16.msra.mxu1 %v3835_v47  ;;  %3676 = vmatprep.subr.bf16.mxu0 %v3860_v1 }
  0xf2   : > { %v3285_v50 = vpop.f32.mrf.mxu1  ;;  %v3269_v52 = vpop.f32.mrf.mxu0  ;;  %3622 = vmatprep.subr.bf16.mxu1 %v3860_v1 }
  0xf4   : > { %v4536_v56 = vpop.f32.mrf.mxu1  ;;  %3535 = vmatmul.mubr.bf16.gmra.mxu1 %v4225_v16  ;;  %v4539_v58 = vpop.f32.mrf.mxu0  ;;  %3591 = vmatmul.mubr.bf16.gmra.mxu0 %v1809_v13  ;;  %v3846_v16 = vld [vmem:[%s4963_s1 + $0x208] sm:$0xff]  }
  0xf5   : > { %3538 = vmatprep.mubr.msk.bf16.mxu1 %vm3861_vm0, %v3860_v1  ;;  %3594 = vmatprep.mubr.msk.bf16.mxu0 %vm3861_vm0, %v3860_v1 }
  0xf6   : > { %v3288_v30 = vpop.f32.mrf.mxu1  ;;  %v3272_v63 = vpop.f32.mrf.mxu0  ;;  %3623 = vmatpush3.bf16.msra.mxu1 %v3839_v53  ;;  %3677 = vmatpush3.bf16.msra.mxu0 %v3843_v54 }
  0xf7   : > { %3624 = vmatprep.subr.bf16.mxu1 %v3860_v1  ;;  %3678 = vmatprep.subr.bf16.mxu0 %v3860_v1 }
  0xf8   : > { %v4554_v2 = vpop.f32.mrf.mxu1  ;;  %v4556_v3 = vpop.f32.mrf.mxu0 }
  0xfa   : > { %v3289_v11 = vpop.f32.mrf.mxu1  ;;  %v3273_v40 = vpop.f32.mrf.mxu0  ;;  %3625 = vmatpush3.bf16.msra.mxu1 %v3842_v0  ;;  %3679 = vmatpush3.bf16.msra.mxu0 %v3846_v16 }
  0xfb   : > { %3626 = vmatprep.subr.bf16.mxu1 %v3860_v1  ;;  %3680 = vmatprep.subr.bf16.mxu0 %v3860_v1  ;;  %v2291_v11 = vld [vmem:[%s3921_s27 + $0x10] sm:$0x8] }
  0xfc   : > { %v4570_v20 = vpop.f32.mrf.mxu1  ;;  %3539 = vmatmul.mubr.bf16.gmra.mxu1 %v4239_v24  ;;  %v4573_v21 = vpop.f32.mrf.mxu0  ;;  %3595 = vmatmul.mubr.bf16.gmra.mxu0 %v1811_v62  ;;  %v1818_v62 = vrot.slane %v3847_v60, 2 }
  0xfd   : > { %3542 = vmatprep.mubr.msk.bf16.mxu1 %vm3861_vm0, %v3860_v1  ;;  %3598 = vmatprep.mubr.msk.bf16.mxu0 %vm3861_vm0, %v3860_v1 }
  0xfe   : > { %v3292_v14 = vpop.f32.mrf.mxu1  ;;  %v3276_v6 = vpop.f32.mrf.mxu0  ;;  %3627 = vmatpush3.bf16.msra.mxu1 %v3845_v42  ;;  %3681 = vmatpush3.bf16.msra.mxu0 %v3849_v15 }
  0xff   : > { %3628 = vmatprep.subr.bf16.mxu1 %v3860_v1 }
 0x100   : > { %v4584_v24 = vpop.f32.mrf.mxu1  ;;  %v4586_v18 = vpop.f32.mrf.mxu0 }
 0x102   : > { %v3293_v32 = vpop.f32.mrf.mxu1  ;;  %v3277_v33 = vpop.f32.mrf.mxu0  ;;  %3629 = vmatpush3.bf16.msra.mxu1 %v3848_v28 }
 0x103   : > { %v1535_v32 = vrot.slane %v4417_v61, 2  ;;  %v2034_v61 = vshll.u32 %v4444_v27, 16 }
 0x104   : > { %v4592_v22 = vpop.f32.mrf.mxu1  ;;  %3543 = vmatmul.mubr.bf16.gmra.mxu1 %v4256_v10  ;;  %v4595_v34 = vpop.f32.mrf.mxu0  ;;  %3599 = vmatmul.mubr.bf16.gmra.mxu0 %v1813_v29  ;;  %v4608_v10 = vld [vmem:[%s3921_s27 + $0x50] sm:$0xff]  }
 0x105   : > { %3546 = vmatprep.mubr.msk.bf16.mxu1 %vm3861_vm0, %v3860_v1  ;;  %3602 = vmatprep.mubr.msk.bf16.mxu0 %vm3861_vm0, %v3860_v1  ;;  %v1816_v4 = vrot.slane %v4608_v10, 2 }
 0x106   : > { %v3296_v37 = vpop.f32.mrf.mxu1  ;;  %v3280_v38 = vpop.f32.mrf.mxu0 }
 0x107   : > { %v1817_v54 = vsel %vm1517_vm3, %v1814_v19, %v1816_v4 }
 0x108   : > { %v4602_v23 = vpop.f32.mrf.mxu1  ;;  %v4604_v39 = vpop.f32.mrf.mxu0 }
 0x10a   : > { %v3297_v9 = vpop.f32.mrf.mxu1  ;;  %v3281_v46 = vpop.f32.mrf.mxu0 }
 0x10c   : > { %v4610_v47 = vpop.f32.mrf.mxu1  ;;  %3547 = vmatmul.mubr.bf16.gmra.mxu1 %v4270_v35  ;;  %v833_v25 = vpop.f32.mrf.mxu0  ;;  %3603 = vmatmul.mubr.bf16.gmra.mxu0 %v1815_v43  ;;  %v2314_v43 = vrot.slane %v4444_v27, 3 }
 0x10d   : > { %3550 = vmatprep.mubr.msk.bf16.mxu1 %vm3861_vm0, %v3860_v1  ;;  %3606 = vmatprep.mubr.msk.bf16.mxu0 %vm3861_vm0, %v3860_v1 }
 0x10e   : > { %v3300_v13 = vpop.f32.mrf.mxu1  ;;  %v3372_v50 = vpop.f32.mrf.mxu0 }
 0x110   : > { %v4618_v52 = vpop.f32.mrf.mxu1  ;;  %v836_v53 = vpop.f32.mrf.mxu0 }
 0x112   : > { %v3301_v35 = vpop.f32.mrf.mxu1  ;;  %v3373_v30 = vpop.f32.mrf.mxu0 }
 0x113   : > { %v2036_v30 = vrot.slane %v2034_v61, 3  ;;  %v2052_v61 = vshll.u32 %v4474_v36, 16 }
 0x114   : > { %v630_v63 = vpop.f32.mrf.mxu1  ;;  %3551 = vmatmul.mubr.bf16.gmra.mxu1 %v4289_v45  ;;  %v841_v0 = vpop.f32.mrf.mxu0  ;;  %3607 = vmatmul.mubr.bf16.gmra.mxu0 %v1817_v54  ;;  %v2995_v45 = vcombine.low %v2291_v11, %v4435_v17  ;;  %v2023_v17 = vshrl.u32 %v4441_v26, 16 }
 0x115   : > { %v631_v16 = vadd.f32 %v630_v63, %v4505_v44  ;;  %3554 = vmatprep.mubr.msk.bf16.mxu1 %vm3861_vm0, %v3860_v1  ;;  %3610 = vmatprep.mubr.msk.bf16.mxu0 %vm3861_vm0, %v3860_v1  ;;  %v1819_v44 = vsel %vm1517_vm3, %v1816_v4, %v1818_v62 }
 0x116   : > { %v3320_v40 = vpop.f32.mrf.mxu1  ;;  %v3376_v42 = vpop.f32.mrf.mxu0  ;;  %v2313_v38 = vrot.slane %v2995_v45, 3 }
 0x117   : > { %v4629_v15 = vadd.f32 %v833_v25, %v631_v16  ;;  %v2316_v42 = vrot.slane %v4458_v31, 3 }
 0x118   : > { %v633_v7 = vpop.f32.mrf.mxu1  ;;  %v844_v14 = vpop.f32.mrf.mxu0  ;;  %v2315_v50 = vsel %vm2312_vm5, %v2313_v38, %v2314_v43 }
 0x119   : > { %v634_v6 = vadd.f32 %v633_v7, %v4522_v49  ;;  %v2026_v49 = vshll.u32 %v4441_v26, 16  ;;  %v1536_v26 = vsel %vm1517_vm3, %v1533_v57, %v1535_v32  ;;  %v2043_v57 = vshll.u32 %v4458_v31, 16 }
 0x11a   : > { %v3321_v28 = vpop.f32.mrf.mxu1  ;;  %v3377_v29 = vpop.f32.mrf.mxu0 }
 0x11b   : > { %v4635_v33 = vadd.f32 %v836_v53, %v634_v6  ;;  %v2025_v53 = vrot.slane %v2023_v17, 2  ;;  %v2028_v60 = vrot.slane %v2026_v49, 3  ;;  %v2042_v28 = vrot.slane %v2040_v55, 2 }
 0x11c   : > { %v638_v19 = vpop.f32.mrf.mxu1  ;;  %3555 = vmatmul.mubr.bf16.gmra.mxu1 %v4319_v59  ;;  %v849_v37 = vpop.f32.mrf.mxu0  ;;  %3611 = vmatmul.mubr.bf16.gmra.mxu0 %v1819_v44  ;;  %v2031_v59 = vshrl.u32 %v4444_v27, 16  ;;  %v2045_v29 = vrot.slane %v2043_v57, 3  ;;  %v2320_v57 = vrot.slane %v4499_v41, 3 }
 0x11d   : > { %v639_v9 = vadd.f32 %v638_v19, %v4539_v58  ;;  %3558 = vmatprep.mubr.msk.bf16.mxu1 %vm3861_vm0, %v3860_v1  ;;  %3682 = vmatprep.mubr.msk.bf16.mxu0 %vm3861_vm0, %v3860_v1  ;;  %v2317_v19 = vsel %vm2312_vm5, %v2314_v43, %v2316_v42  ;;  %v2049_v43 = vshrl.u32 %v4474_v36, 16 }
 0x11e   : > { %v3324_v46 = vpop.f32.mrf.mxu1  ;;  %v3380_v25 = vpop.f32.mrf.mxu0  ;;  %v2033_v35 = vrot.slane %v2031_v59, 2 }
 0x11f   : > { %v4648_v4 = vadd.f32 %v841_v0, %v639_v9 }
 0x120   : > { %v641_v13 = vpop.f32.mrf.mxu1  ;;  %v852_v58 = vpop.f32.mrf.mxu0  ;;  %v2037_v40 = vor.u32 %v2036_v30, %v2033_v35 }
 0x121   : > { %v642_v54 = vadd.f32 %v641_v13, %v4556_v3  ;;  %v2029_v3 = vor.u32 %v2028_v60, %v2025_v53  ;;  %v2054_v60 = vrot.slane %v2052_v61, 3 }
 0x122   : > { %v3325_v63 = vpop.f32.mrf.mxu1  ;;  %v3381_v27 = vpop.f32.mrf.mxu0 }
 0x123   : > { %v4655_v16 = vadd.f32 %v844_v14, %v642_v54  ;;  %v2038_v32 = vsel %vm2021_vm6, %v2029_v3, %v2037_v40  ;;  %v2051_v54 = vrot.slane %v2049_v43, 2 }
 0x124   : > { %v646_v0 = vpop.f32.mrf.mxu1  ;;  %3559 = vmatmul.mubr.bf16.gmra.mxu1 %v1536_v26  ;;  %v857_v62 = vpop.f32.mrf.mxu0  ;;  %3683 = vmatmul.mubr.bf16.vlgmr.msra.gmra.mxu0 %v2315_v50 }
 0x125   : > { %v647_v11 = vadd.f32 %v646_v0, %v4573_v21  ;;  %3630 = vmatprep.mubr.msk.bf16.mxu1 %vm3861_vm0, %v3860_v1  ;;  %3686 = vmatprep.mubr.msk.bf16.mxu0 %vm3861_vm0, %v3860_v1  ;;  %v2058_v0 = vshrl.u32 %v4499_v41, 16 }
 0x126   : > { %v3328_v7 = vpop.f32.mrf.mxu1  ;;  %v3384_v14 = vpop.f32.mrf.mxu0 }
 0x127   : > { %v4665_v45 = vadd.f32 %v849_v37, %v647_v11  ;;  %v2046_v37 = vor.u32 %v2045_v29, %v2042_v28  ;;  %v2060_v14 = vrot.slane %v2058_v0, 2 }
 0x128   : > { %v649_v6 = vpop.f32.mrf.mxu1  ;;  %v860_v44 = vpop.f32.mrf.mxu0 }
 0x129   : > { %v650_v21 = vadd.f32 %v649_v6, %v4586_v18  ;;  %v2318_v18 = vrot.slane %v4474_v36, 3 }
 0x12a   : > { %v3329_v38 = vpop.f32.mrf.mxu1  ;;  %v3385_v17 = vpop.f32.mrf.mxu0 }
 0x12b   : > { %v4670_v49 = vadd.f32 %v852_v58, %v650_v21  ;;  %v2047_v58 = vsel %vm2021_vm6, %v2037_v40, %v2046_v37  ;;  %v2319_v53 = vsel %vm2312_vm5, %v2316_v42, %v2318_v18  ;;  %v2321_v28 = vsel %vm2312_vm5, %v2318_v18, %v2320_v57 }
 0x12c   : > { %v654_v31 = vpop.f32.mrf.mxu1  ;;  %3631 = vmatmul.mubr.bf16.vlgmr.msra.gmra.mxu1 %v2038_v32  ;;  %v865_v9 = vpop.f32.mrf.mxu0  ;;  %3687 = vmatmul.mubr.bf16.gmra.mxu0 %v2317_v19 }
 0x12d   : > { %v655_v59 = vadd.f32 %v654_v31, %v4595_v34  ;;  %3634 = vmatprep.mubr.msk.bf16.mxu1 %vm3861_vm0, %v3860_v1  ;;  %3690 = vmatprep.mubr.msk.bf16.mxu0 %vm3861_vm0, %v3860_v1  ;;  %v2067_v31 = vshrl.u32 %v4526_v51, 16 }
 0x12e   : > { %v3332_v46 = vpop.f32.mrf.mxu1  ;;  %v3388_v25 = vpop.f32.mrf.mxu0 }
 0x12f   : > { %v4680_v13 = vadd.f32 %v857_v62, %v655_v59  ;;  %v2061_v62 = vshll.u32 %v4499_v41, 16 }
 0x130   : > { %v657_v26 = vpop.f32.mrf.mxu1  ;;  %v868_v34 = vpop.f32.mrf.mxu0 }
 0x131   : > { %v658_v50 = vadd.f32 %v657_v26, %v4604_v39  ;;  %v2055_v39 = vor.u32 %v2054_v60, %v2051_v54  ;;  %v2063_v6 = vrot.slane %v2061_v62, 3  ;;  %v2069_v26 = vrot.slane %v2067_v31, 2 }
 0x132   : > { %v3333_v35 = vpop.f32.mrf.mxu1  ;;  %v3389_v30 = vpop.f32.mrf.mxu0  ;;  %v2076_v60 = vshrl.u32 %v4560_v8, 16 }
 0x133   : > { %v4685_v63 = vadd.f32 %v860_v44, %v658_v50  ;;  %v2064_v38 = vor.u32 %v2063_v6, %v2060_v14  ;;  %v2079_v35 = vshll.u32 %v4560_v8, 16 }
 0x134   : > { %v662_v27 = vpop.f32.mrf.mxu1  ;;  %3635 = vmatmul.mubr.bf16.gmra.mxu1 %v2047_v58  ;;  %v873_v36 = vpop.f32.mrf.mxu0  ;;  %3691 = vmatmul.mubr.bf16.gmra.mxu0 %v2319_v53 }
 0x135   : > { %v663_v55 = vadd.f32 %v662_v27, %v4502_v12  ;;  %3638 = vmatprep.mubr.msk.bf16.mxu1 %vm3861_vm0, %v3860_v1  ;;  %3694 = vmatprep.mubr.msk.bf16.mxu0 %vm3861_vm0, %v3860_v1  ;;  %v2056_v12 = vsel %vm2021_vm6, %v2046_v37, %v2055_v39  ;;  %v2065_v61 = vsel %vm2021_vm6, %v2055_v39, %v2064_v38  ;;  %v2324_v27 = vrot.slane %v4560_v8, 3 }
 0x136   : > { %v3336_v11 = vpop.f32.mrf.mxu1  ;;  %v3392_v3 = vpop.f32.mrf.mxu0 }
 0x137   : > { %v4695_v40 = vadd.f32 %v865_v9, %v663_v55  ;;  %v2070_v9 = vshll.u32 %v4526_v51, 16  ;;  %v2081_v11 = vrot.slane %v2079_v35, 3 }
 0x138   : > { %v665_v42 = vpop.f32.mrf.mxu1  ;;  %v876_v7 = vpop.f32.mrf.mxu0 }
 0x139   : > { %v666_v44 = vadd.f32 %v665_v42, %v4520_v48  ;;  %v2322_v48 = vrot.slane %v4526_v51, 3  ;;  %v2072_v58 = vrot.slane %v2070_v9, 3 }
 0x13a   : > { %v3337_v29 = vpop.f32.mrf.mxu1  ;;  %v3393_v21 = vpop.f32.mrf.mxu0 }
 0x13b   : > { %v4700_v32 = vadd.f32 %v868_v34, %v666_v44  ;;  %v2323_v25 = vsel %vm2312_vm5, %v2320_v57, %v2322_v48  ;;  %v2078_v57 = vrot.slane %v2076_v60, 2  ;;  %v2325_v42 = vsel %vm2312_vm5, %v2322_v48, %v2324_v27 }
 0x13c   : > { %v670_v19 = vpop.f32.mrf.mxu1  ;;  %3639 = vmatmul.mubr.bf16.gmra.mxu1 %v2056_v12  ;;  %v881_v41 = vpop.f32.mrf.mxu0  ;;  %3695 = vmatmul.mubr.bf16.gmra.mxu0 %v2321_v28  ;;  %v2085_v29 = vshrl.u32 %v4590_v5, 16  ;;  %v2088_v21 = vshll.u32 %v4590_v5, 16 }
 0x13d   : > { %v671_v17 = vadd.f32 %v670_v19, %v4536_v56  ;;  %3642 = vmatprep.mubr.msk.bf16.mxu1 %vm3861_vm0, %v3860_v1  ;;  %3698 = vmatprep.mubr.msk.bf16.mxu0 %vm3861_vm0, %v3860_v1  ;;  %v2082_v12 = vor.u32 %v2081_v11, %v2078_v57 }
 0x13e   : > { %v3340_v37 = vpop.f32.mrf.mxu1  ;;  %v3396_v59 = vpop.f32.mrf.mxu0 }
 0x13f   : > { %v4710_v18 = vadd.f32 %v873_v36, %v671_v17  ;;  %v2087_v37 = vrot.slane %v2085_v29, 2  ;;  %v2090_v59 = vrot.slane %v2088_v21, 3 }
 0x140   : > { %v673_v43 = vpop.f32.mrf.mxu1  ;;  %v884_v56 = vpop.f32.mrf.mxu0 }
 0x141   : > { %v674_v46 = vadd.f32 %v673_v43, %v4554_v2  ;;  %v2073_v2 = vor.u32 %v2072_v58, %v2069_v26  ;;  %v2097_v26 = vshll.u32 %v4608_v10, 16 }
 0x142   : > { %v3341_v34 = vpop.f32.mrf.mxu1  ;;  %v3397_v50 = vpop.f32.mrf.mxu0 }
 0x143   : > { %v4715_v53 = vadd.f32 %v876_v7, %v674_v46  ;;  %v2083_v48 = vsel %vm2021_vm6, %v2073_v2, %v2082_v12  ;;  %v2328_v34 = vrot.slane %v4608_v10, 3 }
 0x144   : > { %v678_v54 = vpop.f32.mrf.mxu1  ;;  %3643 = vmatmul.mubr.bf16.gmra.mxu1 %v2065_v61  ;;  %v889_v51 = vpop.f32.mrf.mxu0  ;;  %3699 = vmatmul.mubr.bf16.gmra.mxu0 %v2323_v25  ;;  %v2094_v25 = vshrl.u32 %v4608_v10, 16 }
 0x145   : > { %v679_v30 = vadd.f32 %v678_v54, %v4570_v20  ;;  %3646 = vmatprep.mubr.msk.bf16.mxu1 %vm3861_vm0, %v3860_v1  ;;  %3702 = vmatprep.mubr.msk.bf16.mxu0 %vm3861_vm0, %v3860_v1  ;;  %v2074_v20 = vsel %vm2021_vm6, %v2064_v38, %v2073_v2  ;;  %v2099_v2 = vrot.slane %v2097_v26, 3 }
 0x146   : > { %v3344_v36 = vpop.f32.mrf.mxu1  ;;  %v3400_v0 = vpop.f32.mrf.mxu0 }
 0x147   : > { %v4725_v62 = vadd.f32 %v881_v41, %v679_v30  ;;  %v2096_v30 = vrot.slane %v2094_v25, 2  ;;  %v3851_v0 = vld [vmem:[%s3921_s27 + $0x58] ss:$0 sps:$4 sm:$0x77]   ;;  %s193_s27 = smul.u32 18, %s3893_s16 }
 0x148   : > { %v681_v55 = vpop.f32.mrf.mxu1  ;;  %v892_v39 = vpop.f32.mrf.mxu0 }
 0x149   : > { %v682_v3 = vadd.f32 %v681_v55, %v4584_v24  ;;  %v2326_v24 = vrot.slane %v4590_v5, 3  ;;  %p194_p4 = scmp.lt.s32.totalorder %s193_s27, 71 }
 0x14a   : > { %v3345_v7 = vpop.f32.mrf.mxu1  ;;  %v3401_v14 = vpop.f32.mrf.mxu0 }
 0x14b   : > { %v4730_v6 = vadd.f32 %v884_v56, %v682_v3  ;;  %v2327_v9 = vsel %vm2312_vm5, %v2324_v27, %v2326_v24  ;;  %v2329_v36 = vsel %vm2312_vm5, %v2326_v24, %v2328_v34  ;;  %v2100_v3 = vor.u32 %v2099_v2, %v2096_v30  ;;  %s4968_s27 = smov (!%p194_p4, %s193_s27), 71 }
 0x14c   : > { %v686_v44 = vpop.f32.mrf.mxu1  ;;  %3647 = vmatmul.mubr.bf16.gmra.mxu1 %v2074_v20  ;;  %v897_v8 = vpop.f32.mrf.mxu0  ;;  %3703 = vmatmul.mubr.bf16.gmra.mxu0 %v2325_v42  ;;  %v2103_v42 = vshrl.u32 %v3851_v0, 16  ;;  %v2106_v7 = vshll.u32 %v3851_v0, 16  ;;  %s2768_s16 = sshll.u32 %s4968_s27, 2 }
 0x14d   : > { %v687_v28 = vadd.f32 %v686_v44, %v4592_v22  ;;  %3650 = vmatprep.mubr.msk.bf16.mxu1 %vm3861_vm0, %v3860_v1  ;;  %3706 = vmatprep.mubr.msk.bf16.mxu0 %vm3861_vm0, %v3860_v1  ;;  %s4903_s8 = scalar_lea.vmem %s4966_s4, %s2768_s16 }
 0x14e   : > { %v3348_v19 = vpop.f32.mrf.mxu1  ;;  %v3404_v41 = vpop.f32.mrf.mxu0  ;;  %v2105_v21 = vrot.slane %v2103_v42, 2 }
 0x14f   : > { %v4740_v38 = vadd.f32 %v889_v51, %v687_v28  ;;  %v2108_v19 = vrot.slane %v2106_v7, 3 }
 0x150   : > { %v689_v17 = vpop.f32.mrf.mxu1  ;;  %v900_v22 = vpop.f32.mrf.mxu0 }
 0x151   : > { %v690_v31 = vadd.f32 %v689_v17, %v4602_v23  ;;  %v2091_v23 = vor.u32 %v2090_v59, %v2087_v37  ;;  %v2109_v37 = vor.u32 %v2108_v19, %v2105_v21 }
 0x152   : > { %v3349_v43 = vpop.f32.mrf.mxu1  ;;  %v3405_v61 = vpop.f32.mrf.mxu0 }
 0x153   : > { %v4745_v56 = vadd.f32 %v892_v39, %v690_v31  ;;  %v2101_v28 = vsel %vm2021_vm6, %v2091_v23, %v2100_v3  ;;  %v2110_v25 = vsel %vm2021_vm6, %v2100_v3, %v2109_v37 }
 0x154   : > { %v694_v46 = vpop.f32.mrf.mxu1  ;;  %3651 = vmatmul.mubr.bf16.gmra.mxu1 %v2083_v48  ;;  %v1407_v5 = vpop.f32.mrf.mxu0  ;;  %3707 = vmatmul.mubr.bf16.gmra.mxu0 %v2327_v9 }
 0x155   : > { %v695_v58 = vadd.f32 %v694_v46, %v4610_v47  ;;  %3654 = vmatprep.mubr.msk.bf16.mxu1 %vm3861_vm0, %v3860_v1  ;;  %3710 = vmatprep.mubr.msk.bf16.mxu0 %vm3861_vm0, %v3860_v1  ;;  %v2092_v47 = vsel %vm2021_vm6, %v2082_v12, %v2091_v23 }
 0x156   : > { %v3352_v50 = vpop.f32.mrf.mxu1  ;;  %v3476_v54 = vpop.f32.mrf.mxu0 }
 0x157   : > { %v4755_v51 = vadd.f32 %v897_v8, %v695_v58 }
 0x158   : > { %v697_v60 = vpop.f32.mrf.mxu1  ;;  %v1410_v35 = vpop.f32.mrf.mxu0 }
 0x159   : > { %v698_v27 = vadd.f32 %v697_v60, %v4618_v52  ;;  %v2330_v52 = vrot.slane %v3851_v0, 3 }
 0x15a   : > { %v3353_v55 = vpop.f32.mrf.mxu1  ;;  %v3477_v39 = vpop.f32.mrf.mxu0 }
 0x15b   : > { %v4761_v57 = vadd.f32 %v900_v22, %v698_v27 }
 0x15c   : > { %v1116_v10 = vpop.f32.mrf.mxu1  ;;  %3655 = vmatmul.mubr.bf16.gmra.mxu1 %v2092_v47  ;;  %v1415_v11 = vpop.f32.mrf.mxu0  ;;  %3711 = vmatmul.mubr.bf16.gmra.mxu0 %v2329_v36 }
 0x15d   : > { %v1187_v20 = vadd.f32 %v1116_v10, %v4629_v15  ;;  %3658 = vmatprep.mubr.msk.bf16.mxu1 %vm3861_vm0, %v3860_v1  ;;  %3714 = vmatprep.mubr.msk.bf16.mxu0 %vm3861_vm0, %v3860_v1  ;;  %v2331_v15 = vsel %vm2312_vm5, %v2328_v34, %v2330_v52 }
 0x15e   : > { %v3424_v14 = vpop.f32.mrf.mxu1  ;;  %v3480_v44 = vpop.f32.mrf.mxu0 }
 0x15f   : > { %v4768_v8 = vadd.f32 %v1407_v5, %v1187_v20 }
 0x160   : > { %v1119_v12 = vpop.f32.mrf.mxu1  ;;  %v1418_v24 = vpop.f32.mrf.mxu0 }
 0x161   : > { %v1188_v29 = vadd.f32 %v1119_v12, %v4635_v33 }
 0x162   : > { %v3425_v41 = vpop.f32.mrf.mxu1  ;;  %v3481_v17 = vpop.f32.mrf.mxu0 }
 0x163   : > { %v4773_v48 = vadd.f32 %v1410_v35, %v1188_v29 }
 0x164   : > { %v1124_v22 = vpop.f32.mrf.mxu1  ;;  %3659 = vmatmul.mubr.bf16.gmra.mxu1 %v2101_v28  ;;  %v1423_v31 = vpop.f32.mrf.mxu0  ;;  %3715 = vmatmul.mubr.bf16.gmra.mxu0 %v2331_v15 }
 0x165   : > { %v1189_v9 = vadd.f32 %v1124_v22, %v4648_v4  ;;  %3662 = vmatprep.mubr.msk.bf16.mxu1 %vm3861_vm0, %v3860_v1 }
 0x166   : > { %v3428_v59 = vpop.f32.mrf.mxu1  ;;  %v3484_v33 = vpop.f32.mrf.mxu0 }
 0x167   : > { %v4778_v43 = vadd.f32 %v1415_v11, %v1189_v9 }
 0x168   : > { %v1127_v61 = vpop.f32.mrf.mxu1  ;;  %v1426_v46 = vpop.f32.mrf.mxu0 }
 0x169   : > { %v1190_v5 = vadd.f32 %v1127_v61, %v4655_v16 }
 0x16a   : > { %v3429_v26 = vpop.f32.mrf.mxu1  ;;  %v3485_v58 = vpop.f32.mrf.mxu0 }
 0x16b   : > { %v4782_v23 = vadd.f32 %v1418_v24, %v1190_v5 }
 0x16c   : > { %v1132_v34 = vpop.f32.mrf.mxu1  ;;  %3663 = vmatmul.mubr.bf16.gmra.mxu1 %v2110_v25  ;;  %v1431_v4 = vpop.f32.mrf.mxu0 }
 0x16d   : > { %v1191_v1 = vadd.f32 %v1132_v34, %v4665_v45 }
 0x16e   : > { %v3432_v50 = vpop.f32.mrf.mxu1  ;;  %v3488_v54 = vpop.f32.mrf.mxu0 }
 0x16f   : > { %v4785_v60 = vadd.f32 %v1423_v31, %v1191_v1 }
 0x170   : > { %v1135_v35 = vpop.f32.mrf.mxu1  ;;  %v1434_v30 = vpop.f32.mrf.mxu0 }
 0x171   : > { %v1192_v2 = vadd.f32 %v1135_v35, %v4670_v49 }
 0x172   : > { %v3433_v16 = vpop.f32.mrf.mxu1  ;;  %v3489_v27 = vpop.f32.mrf.mxu0 }
 0x173   : > { %v4788_v47 = vadd.f32 %v1426_v46, %v1192_v2 }
 0x174   : > { %v1140_v36 = vpop.f32.mrf.mxu1  ;;  %v1439_v0 = vpop.f32.mrf.mxu0 }
 0x175   : > { %v1193_v55 = vadd.f32 %v1140_v36, %v4680_v13 }
 0x176   : > { %v3436_v39 = vpop.f32.mrf.mxu1  ;;  %v3492_v10 = vpop.f32.mrf.mxu0 }
 0x177   : > { %v4791_v11 = vadd.f32 %v1431_v4, %v1193_v55 }
 0x178   : > { %v1143_v45 = vpop.f32.mrf.mxu1  ;;  %v1442_v3 = vpop.f32.mrf.mxu0 }
 0x179   : > { %v1194_v20 = vadd.f32 %v1143_v45, %v4685_v63 }
 0x17a   : > { %v3437_v52 = vpop.f32.mrf.mxu1  ;;  %v3493_v42 = vpop.f32.mrf.mxu0 }
 0x17b   : > { %v4794_v7 = vadd.f32 %v1434_v30, %v1194_v20 }
 0x17c   : > { %v1148_v49 = vpop.f32.mrf.mxu1  ;;  %v1447_v14 = vpop.f32.mrf.mxu0 }
 0x17d   : > { %v1195_v44 = vadd.f32 %v1148_v49, %v4695_v40 }
 0x17e   : > { %v3440_v12 = vpop.f32.mrf.mxu1  ;;  %v3496_v28 = vpop.f32.mrf.mxu0 }
 0x17f   : > { %v4797_v24 = vadd.f32 %v1439_v0, %v1195_v44 }
 0x180   : > { %v1151_v13 = vpop.f32.mrf.mxu1  ;;  %v1450_v29 = vpop.f32.mrf.mxu0 }
 0x181   : > { %v1196_v15 = vadd.f32 %v1151_v13, %v4700_v32 }
 0x182   : > { %v3441_v21 = vpop.f32.mrf.mxu1  ;;  %v3497_v19 = vpop.f32.mrf.mxu0 }
 0x183   : > { %v4800_v41 = vadd.f32 %v1442_v3, %v1196_v15 }
 0x184   : > { %v1156_v63 = vpop.f32.mrf.mxu1  ;;  %v1455_v17 = vpop.f32.mrf.mxu0 }
 0x185   : > { %v1197_v22 = vadd.f32 %v1156_v63, %v4710_v18 }
 0x186   : > { %v3444_v31 = vpop.f32.mrf.mxu1  ;;  %v3500_v9 = vpop.f32.mrf.mxu0 }
 0x187   : > { %v4803_v37 = vadd.f32 %v1447_v14, %v1197_v22 }
 0x188   : > { %v1159_v40 = vpop.f32.mrf.mxu1  ;;  %v1458_v59 = vpop.f32.mrf.mxu0 }
 0x189   : > { %v1198_v33 = vadd.f32 %v1159_v40, %v4715_v53 }
 0x18a   : > { %v3445_v61 = vpop.f32.mrf.mxu1  ;;  %v3501_v46 = vpop.f32.mrf.mxu0 }
 0x18b   : > { %v4806_v5 = vadd.f32 %v1450_v29, %v1198_v33 }
 0x18c   : > { %v1164_v32 = vpop.f32.mrf.mxu1  ;;  %v1463_v25 = vpop.f32.mrf.mxu0 }
 0x18d   : > { %v1199_v26 = vadd.f32 %v1164_v32, %v4725_v62 }
 0x18e   : > { %v3448_v58 = vpop.f32.mrf.mxu1  ;;  %v3504_v34 = vpop.f32.mrf.mxu0 }
 0x18f   : > { %v4809_v4 = vadd.f32 %v1455_v17, %v1199_v26 }
 0x190   : > { %v1167_v18 = vpop.f32.mrf.mxu1  ;;  %v1466_v1 = vpop.f32.mrf.mxu0 }
 0x191   : > { %v1200_v50 = vadd.f32 %v1167_v18, %v4730_v6 }
 0x192   : > { %v3449_v54 = vpop.f32.mrf.mxu1  ;;  %v3505_v35 = vpop.f32.mrf.mxu0 }
 0x193   : > { %v4812_v30 = vadd.f32 %v1458_v59, %v1200_v50 }
 0x194   : > { %v1172_v53 = vpop.f32.mrf.mxu1  ;;  %v1471_v2 = vpop.f32.mrf.mxu0 }
 0x195   : > { %v1201_v16 = vadd.f32 %v1172_v53, %v4740_v38 }
 0x196   : > { %v3452_v27 = vpop.f32.mrf.mxu1  ;;  %v3508_v36 = vpop.f32.mrf.mxu0 }
 0x197   : > { %v4815_v0 = vadd.f32 %v1463_v25, %v1201_v16 }
 0x198   : > { %v1175_v62 = vpop.f32.mrf.mxu1  ;;  %v1474_v55 = vpop.f32.mrf.mxu0 }
 0x199   : > { %v1202_v39 = vadd.f32 %v1175_v62, %v4745_v56 }
 0x19a   : > { %v3453_v10 = vpop.f32.mrf.mxu1  ;;  %v3509_v45 = vpop.f32.mrf.mxu0 }
 0x19b   : > { %v4818_v3 = vadd.f32 %v1466_v1, %v1202_v39 }
 0x19c   : > { %v1180_v6 = vpop.f32.mrf.mxu1  ;;  %v1911_v20 = vpop.f32.mrf.mxu0 }
 0x19d   : > { %v1203_v52 = vadd.f32 %v1180_v6, %v4755_v51 }
 0x19e   : > { %v3456_v42 = vpop.f32.mrf.mxu1  ;;  %v3580_v49 = vpop.f32.mrf.mxu0 }
 0x19f   : > { %v4821_v14 = vadd.f32 %v1471_v2, %v1203_v52 }
 0x1a0   : > { %v1183_v38 = vpop.f32.mrf.mxu1  ;;  %v1914_v44 = vpop.f32.mrf.mxu0 }
 0x1a1   : > { %v1204_v12 = vadd.f32 %v1183_v38, %v4761_v57 }
 0x1a2   : > { %v3457_v28 = vpop.f32.mrf.mxu1  ;;  %v3581_v13 = vpop.f32.mrf.mxu0 }
 0x1a3   : > { %v4824_v29 = vadd.f32 %v1474_v55, %v1204_v12 }
 0x1a4   : > { %v1628_v56 = vpop.f32.mrf.mxu1  ;;  %v1919_v15 = vpop.f32.mrf.mxu0 }
 0x1a5   : > { %v1699_v21 = vadd.f32 %v1628_v56, %v4768_v8 }
 0x1a6   : > { %v3528_v19 = vpop.f32.mrf.mxu1  ;;  %v3584_v63 = vpop.f32.mrf.mxu0 }
 0x1a7   : > { %v4827_v17 = vadd.f32 %v1911_v20, %v1699_v21 }
 0x1a8   : > { %v1631_v51 = vpop.f32.mrf.mxu1  ;;  %v1922_v22 = vpop.f32.mrf.mxu0 }
 0x1a9   : > { %v1700_v31 = vadd.f32 %v1631_v51, %v4773_v48 }
 0x1aa   : > { %v3529_v9 = vpop.f32.mrf.mxu1  ;;  %v3585_v40 = vpop.f32.mrf.mxu0 }
 0x1ab   : > { %v4830_v59 = vadd.f32 %v1914_v44, %v1700_v31 }
 0x1ac   : > { %v1636_v57 = vpop.f32.mrf.mxu1  ;;  %v1927_v33 = vpop.f32.mrf.mxu0 }
 0x1ad   : > { %v1701_v61 = vadd.f32 %v1636_v57, %v4778_v43 }
 0x1ae   : > { %v3532_v46 = vpop.f32.mrf.mxu1  ;;  %v3588_v32 = vpop.f32.mrf.mxu0 }
 0x1af   : > { %v4833_v25 = vadd.f32 %v1919_v15, %v1701_v61 }
 0x1b0   : > { %v1639_v8 = vpop.f32.mrf.mxu1  ;;  %v1930_v26 = vpop.f32.mrf.mxu0 }
 0x1b1   : > { %v1702_v58 = vadd.f32 %v1639_v8, %v4782_v23 }
 0x1b2   : > { %v3533_v34 = vpop.f32.mrf.mxu1  ;;  %v3589_v18 = vpop.f32.mrf.mxu0 }
 0x1b3   : > { %v4836_v1 = vadd.f32 %v1922_v22, %v1702_v58 }
 0x1b4   : > { %v1644_v48 = vpop.f32.mrf.mxu1  ;;  %v1935_v50 = vpop.f32.mrf.mxu0 }
 0x1b5   : > { %v1703_v54 = vadd.f32 %v1644_v48, %v4785_v60 }
 0x1b6   : > { %v3536_v35 = vpop.f32.mrf.mxu1  ;;  %v3592_v53 = vpop.f32.mrf.mxu0 }
 0x1b7   : > { %v4839_v2 = vadd.f32 %v1927_v33, %v1703_v54 }
 0x1b8   : > { %v1647_v43 = vpop.f32.mrf.mxu1  ;;  %v1938_v16 = vpop.f32.mrf.mxu0 }
 0x1b9   : > { %v1704_v27 = vadd.f32 %v1647_v43, %v4788_v47 }
 0x1ba   : > { %v3537_v36 = vpop.f32.mrf.mxu1  ;;  %v3593_v62 = vpop.f32.mrf.mxu0 }
 0x1bb   : > { %v4842_v55 = vadd.f32 %v1930_v26, %v1704_v27 }
 0x1bc   : > { %v1652_v23 = vpop.f32.mrf.mxu1  ;;  %v1943_v39 = vpop.f32.mrf.mxu0 }
 0x1bd   : > { %v1705_v10 = vadd.f32 %v1652_v23, %v4791_v11 }
 0x1be   : > { %v3540_v45 = vpop.f32.mrf.mxu1  ;;  %v3596_v6 = vpop.f32.mrf.mxu0 }
 0x1bf   : > { %v4845_v20 = vadd.f32 %v1935_v50, %v1705_v10 }
 0x1c0   : > { %v1655_v60 = vpop.f32.mrf.mxu1  ;;  %v1946_v52 = vpop.f32.mrf.mxu0 }
 0x1c1   : > { %v1706_v42 = vadd.f32 %v1655_v60, %v4794_v7 }
 0x1c2   : > { %v3541_v49 = vpop.f32.mrf.mxu1  ;;  %v3597_v38 = vpop.f32.mrf.mxu0 }
 0x1c3   : > { %v4848_v44 = vadd.f32 %v1938_v16, %v1706_v42 }
 0x1c4   : > { %v1660_v47 = vpop.f32.mrf.mxu1  ;;  %v1951_v12 = vpop.f32.mrf.mxu0 }
 0x1c5   : > { %v1707_v28 = vadd.f32 %v1660_v47, %v4797_v24 }
 0x1c6   : > { %v3544_v13 = vpop.f32.mrf.mxu1  ;;  %v3600_v56 = vpop.f32.mrf.mxu0 }
 0x1c7   : > { %v4851_v15 = vadd.f32 %v1943_v39, %v1707_v28 }
 0x1c8   : > { %v1663_v11 = vpop.f32.mrf.mxu1  ;;  %v1954_v21 = vpop.f32.mrf.mxu0 }
 0x1c9   : > { %v1708_v19 = vadd.f32 %v1663_v11, %v4800_v41 }
 0x1ca   : > { %v3545_v63 = vpop.f32.mrf.mxu1  ;;  %v3601_v51 = vpop.f32.mrf.mxu0 }
 0x1cb   : > { %v4854_v22 = vadd.f32 %v1946_v52, %v1708_v19 }
 0x1cc   : > { %v1668_v7 = vpop.f32.mrf.mxu1  ;;  %v1959_v31 = vpop.f32.mrf.mxu0 }
 0x1cd   : > { %v1709_v9 = vadd.f32 %v1668_v7, %v4803_v37 }
 0x1ce   : > { %v3548_v40 = vpop.f32.mrf.mxu1  ;;  %v3604_v57 = vpop.f32.mrf.mxu0 }
 0x1cf   : > { %v4857_v33 = vadd.f32 %v1951_v12, %v1709_v9 }
 0x1d0   : > { %v1671_v24 = vpop.f32.mrf.mxu1  ;;  %v1962_v61 = vpop.f32.mrf.mxu0 }
 0x1d1   : > { %v1710_v46 = vadd.f32 %v1671_v24, %v4806_v5 }
 0x1d2   : > { %v3549_v32 = vpop.f32.mrf.mxu1  ;;  %v3605_v8 = vpop.f32.mrf.mxu0 }
 0x1d3   : > { %v4860_v26 = vadd.f32 %v1954_v21, %v1710_v46 }
 0x1d4   : > { %v1676_v41 = vpop.f32.mrf.mxu1  ;;  %v1967_v58 = vpop.f32.mrf.mxu0 }
 0x1d5   : > { %v1711_v34 = vadd.f32 %v1676_v41, %v4809_v4 }
 0x1d6   : > { %v3552_v18 = vpop.f32.mrf.mxu1  ;;  %v3608_v48 = vpop.f32.mrf.mxu0 }
 0x1d7   : > { %v4863_v50 = vadd.f32 %v1959_v31, %v1711_v34 }
 0x1d8   : > { %v1679_v37 = vpop.f32.mrf.mxu1  ;;  %v1970_v54 = vpop.f32.mrf.mxu0 }
 0x1d9   : > { %v1712_v35 = vadd.f32 %v1679_v37, %v4812_v30 }
 0x1da   : > { %v3553_v53 = vpop.f32.mrf.mxu1  ;;  %v3609_v43 = vpop.f32.mrf.mxu0 }
 0x1db   : > { %v4866_v16 = vadd.f32 %v1962_v61, %v1712_v35 }
 0x1dc   : > { %v1684_v5 = vpop.f32.mrf.mxu1  ;;  %v1975_v27 = vpop.f32.mrf.mxu0 }
 0x1dd   : > { %v1713_v36 = vadd.f32 %v1684_v5, %v4815_v0 }
 0x1de   : > { %v3556_v62 = vpop.f32.mrf.mxu1  ;;  %v3612_v23 = vpop.f32.mrf.mxu0 }
 0x1df   : > { %v4869_v39 = vadd.f32 %v1967_v58, %v1713_v36 }
 0x1e0   : > { %v1687_v4 = vpop.f32.mrf.mxu1  ;;  %v1978_v10 = vpop.f32.mrf.mxu0 }
 0x1e1   : > { %v1714_v45 = vadd.f32 %v1687_v4, %v4818_v3 }
 0x1e2   : > { %v3557_v6 = vpop.f32.mrf.mxu1  ;;  %v3613_v60 = vpop.f32.mrf.mxu0 }
 0x1e3   : > { %v4872_v30 = vadd.f32 %v1970_v54, %v1714_v45 }
 0x1e4   : > { %v1692_v52 = vpop.f32.mrf.mxu1  ;;  %v2423_v42 = vpop.f32.mrf.mxu0 }
 0x1e5   : > { %v1715_v49 = vadd.f32 %v1692_v52, %v4821_v14  ;;  %v4885_v14 = vld [vmem:[%s4964_s2] ss:$0 sm:$0xff] }
 0x1e6   : > { %v3560_v38 = vpop.f32.mrf.mxu1  ;;  %v3684_v47 = vpop.f32.mrf.mxu0 }
 0x1e7   : > { %v4875_v0 = vadd.f32 %v1975_v27, %v1715_v49 }
 0x1e8   : > { %v1695_v12 = vpop.f32.mrf.mxu1  ;;  %v2426_v28 = vpop.f32.mrf.mxu0 }
 0x1e9   : > { %v1716_v13 = vadd.f32 %v1695_v12, %v4824_v29  ;;  %v4890_v29 = vld [vmem:[%s4965_s3] ss:$0 sm:$0xff] }
 0x1ea   : > { %v3561_v56 = vpop.f32.mrf.mxu1  ;;  %v3685_v11 = vpop.f32.mrf.mxu0 }
 0x1eb   : > { %v4878_v3 = vadd.f32 %v1978_v10, %v1716_v13 }
 0x1ec   : > { %v2202_v21 = vpop.f32.mrf.mxu1  ;;  %v2431_v19 = vpop.f32.mrf.mxu0 }
 0x1ed   : > { %v2273_v63 = vadd.f32 %v2202_v21, %v4827_v17 }
 0x1ee   : > { %v3632_v51 = vpop.f32.mrf.mxu1  ;;  %v3688_v7 = vpop.f32.mrf.mxu0 }
 0x1ef   : > { %v2494_v31 = vadd.f32 %v2423_v42, %v2273_v63 }
 0x1f0   : > { %v2205_v9 = vpop.f32.mrf.mxu1  ;;  %v2434_v40 = vpop.f32.mrf.mxu0 }
 0x1f1   : > { %v2519_v57 = vmul.f32 %v4885_v14, %v2494_v31  ;;  %v2274_v17 = vadd.f32 %v2205_v9, %v4830_v59 }
 0x1f2   : > { %v3633_v24 = vpop.f32.mrf.mxu1  ;;  %v3689_v61 = vpop.f32.mrf.mxu0 }
 0x1f3   : > { %v2544_v46 = vadd.f32 %v4890_v29, %v2519_v57  ;;  %v2495_v32 = vadd.f32 %v2426_v28, %v2274_v17 }
 0x1f4   : > { %v2210_v8 = vpop.f32.mrf.mxu1  ;;  %v2439_v41 = vpop.f32.mrf.mxu0 }
 0x1f5   : > { %v2520_v58 = vmul.f32 %v4885_v14, %v2495_v32  ;;  %v2275_v34 = vadd.f32 %v2210_v8, %v4833_v25  ;;  %v2580_v37 = vmul.f32 0.0, %v2544_v46  ;;  %vm2562_vm7 = vcmp.gt.f32.partialorder %v2544_v46, 0.0 }
 0x1f6   : > { %v3636_v18 = vpop.f32.mrf.mxu1  ;;  %v3692_v48 = vpop.f32.mrf.mxu0 }
 0x1f7   : > { %v2545_v54 = vadd.f32 %v4890_v29, %v2520_v58  ;;  %v2496_v35 = vadd.f32 %v2431_v19, %v2275_v34  ;;  %v2598_v23 = vsel %vm2562_vm7, %v2544_v46, %v2580_v37 }
 0x1f8   : > { %v2213_v59 = vpop.f32.mrf.mxu1  ;;  %v2442_v53 = vpop.f32.mrf.mxu0 }
 0x1f9   : > { %vm2563_vm8 = vcmp.gt.f32.partialorder %v2545_v54, 0.0  ;;  %v2581_v43 = vmul.f32 0.0, %v2545_v54  ;;  %v2521_v5 = vmul.f32 %v4885_v14, %v2496_v35  ;;  %v2276_v27 = vadd.f32 %v2213_v59, %v4836_v1 }
 0x1fa   : > { %v3637_v36 = vpop.f32.mrf.mxu1  ;;  %v3693_v62 = vpop.f32.mrf.mxu0 }
 0x1fb   : > { %v2599_v25 = vsel %vm2563_vm8, %v2545_v54, %v2581_v43  ;;  %v2546_v4 = vadd.f32 %v4890_v29, %v2521_v5  ;;  %v2497_v10 = vadd.f32 %v2434_v40, %v2276_v27 }
 0x1fc   : > { %v3047_v45 = vpack.c.bf16 %v2599_v25, %v2598_v23  ;;  %v2218_v6 = vpop.f32.mrf.mxu1  ;;  %v2447_v60 = vpop.f32.mrf.mxu0 }
 0x1fd   : > { %v2522_v52 = vmul.f32 %v4885_v14, %v2497_v10  ;;  %v2277_v1 = vadd.f32 %v2218_v6, %v4839_v2  ;;  %v2582_v38 = vmul.f32 0.0, %v2546_v4  ;;  %vm2564_vm9 = vcmp.gt.f32.partialorder %v2546_v4, 0.0 }
 0x1fe   : > { %3048 = vst [vmem:[%s4903_s8] sm:$0xff] %v3047_v45   ;;  %v3640_v42 = vpop.f32.mrf.mxu1  ;;  %v3696_v49 = vpop.f32.mrf.mxu0 }
 0x1ff   : > { %v2547_v47 = vadd.f32 %v4890_v29, %v2522_v52  ;;  %v2498_v12 = vadd.f32 %v2439_v41, %v2277_v1  ;;  %v2600_v2 = vsel %vm2564_vm9, %v2546_v4, %v2582_v38 }
 0x200   : > { %v2221_v28 = vpop.f32.mrf.mxu1  ;;  %v2450_v13 = vpop.f32.mrf.mxu0 }
 0x201   : > { %vm2565_vm10 = vcmp.gt.f32.partialorder %v2547_v47, 0.0  ;;  %v2583_v56 = vmul.f32 0.0, %v2547_v47  ;;  %v2523_v11 = vmul.f32 %v4885_v14, %v2498_v12  ;;  %v2278_v21 = vadd.f32 %v2221_v28, %v4842_v55 }
 0x202   : > { %v3641_v19 = vpop.f32.mrf.mxu1  ;;  %v3697_v63 = vpop.f32.mrf.mxu0 }
 0x203   : > { %v2601_v51 = vsel %vm2565_vm10, %v2547_v47, %v2583_v56  ;;  %v2548_v7 = vadd.f32 %v4890_v29, %v2523_v11  ;;  %v2499_v31 = vadd.f32 %v2442_v53, %v2278_v21 }
 0x204   : > { %v3052_v9 = vpack.c.bf16 %v2601_v51, %v2600_v2  ;;  %v2226_v40 = vpop.f32.mrf.mxu1  ;;  %v2455_v57 = vpop.f32.mrf.mxu0 }
 0x205   : > { %v2524_v17 = vmul.f32 %v4885_v14, %v2499_v31  ;;  %v2279_v24 = vadd.f32 %v2226_v40, %v4845_v20  ;;  %v2584_v32 = vmul.f32 0.0, %v2548_v7  ;;  %vm2566_vm11 = vcmp.gt.f32.partialorder %v2548_v7, 0.0 }
 0x206   : > { %3089 = vst [vmem:[%s4903_s8 + $0x8] sm:$0xff] %v3052_v9   ;;  %v3644_v61 = vpop.f32.mrf.mxu1  ;;  %v3700_v46 = vpop.f32.mrf.mxu0 }
 0x207   : > { %v2549_v55 = vadd.f32 %v4890_v29, %v2524_v17  ;;  %v2500_v8 = vadd.f32 %v2447_v60, %v2279_v24  ;;  %v2602_v20 = vsel %vm2566_vm11, %v2548_v7, %v2584_v32 }
 0x208   : > { %v2229_v41 = vpop.f32.mrf.mxu1  ;;  %v2458_v58 = vpop.f32.mrf.mxu0 }
 0x209   : > { %vm2567_vm12 = vcmp.gt.f32.partialorder %v2549_v55, 0.0  ;;  %v2585_v34 = vmul.f32 0.0, %v2549_v55  ;;  %v2525_v18 = vmul.f32 %v4885_v14, %v2500_v8  ;;  %v2280_v48 = vadd.f32 %v2229_v41, %v4848_v44 }
 0x20a   : > { %v3645_v37 = vpop.f32.mrf.mxu1  ;;  %v3701_v54 = vpop.f32.mrf.mxu0 }
 0x20b   : > { %v2603_v35 = vsel %vm2567_vm12, %v2549_v55, %v2585_v34  ;;  %v2550_v59 = vadd.f32 %v4890_v29, %v2525_v18  ;;  %v2501_v53 = vadd.f32 %v2450_v13, %v2280_v48 }
 0x20c   : > { %v3057_v43 = vpack.c.bf16 %v2603_v35, %v2602_v20  ;;  %v2234_v5 = vpop.f32.mrf.mxu1  ;;  %v2463_v27 = vpop.f32.mrf.mxu0 }
 0x20d   : > { %v2526_v36 = vmul.f32 %v4885_v14, %v2501_v53  ;;  %v2281_v62 = vadd.f32 %v2234_v5, %v4851_v15  ;;  %v2586_v4 = vmul.f32 0.0, %v2550_v59  ;;  %vm2568_vm13 = vcmp.gt.f32.partialorder %v2550_v59, 0.0 }
 0x20e   : > { %3090 = vst [vmem:[%s4903_s8 + $0x10] sm:$0xff] %v3057_v43   ;;  %v3648_v23 = vpop.f32.mrf.mxu1  ;;  %v3704_v25 = vpop.f32.mrf.mxu0 }
 0x20f   : > { %v2551_v44 = vadd.f32 %v4890_v29, %v2526_v36  ;;  %v2502_v10 = vadd.f32 %v2455_v57, %v2281_v62  ;;  %v2604_v15 = vsel %vm2568_vm13, %v2550_v59, %v2586_v4 }
 0x210   : > { %v2237_v45 = vpop.f32.mrf.mxu1  ;;  %v2466_v6 = vpop.f32.mrf.mxu0 }
 0x211   : > { %vm2569_vm14 = vcmp.gt.f32.partialorder %v2551_v44, 0.0  ;;  %v2587_v60 = vmul.f32 0.0, %v2551_v44  ;;  %v2527_v52 = vmul.f32 %v4885_v14, %v2502_v10  ;;  %v2282_v1 = vadd.f32 %v2237_v45, %v4854_v22 }
 0x212   : > { %v3649_v42 = vpop.f32.mrf.mxu1  ;;  %v3705_v49 = vpop.f32.mrf.mxu0 }
 0x213   : > { %v2605_v38 = vsel %vm2569_vm14, %v2551_v44, %v2587_v60  ;;  %v2552_v47 = vadd.f32 %v4890_v29, %v2527_v52  ;;  %v2503_v12 = vadd.f32 %v2458_v58, %v2282_v1 }
 0x214   : > { %v3062_v28 = vpack.c.bf16 %v2605_v38, %v2604_v15  ;;  %v2242_v13 = vpop.f32.mrf.mxu1  ;;  %v2471_v56 = vpop.f32.mrf.mxu0 }
 0x215   : > { %v2528_v11 = vmul.f32 %v4885_v14, %v2503_v12  ;;  %v2283_v21 = vadd.f32 %v2242_v13, %v4857_v33  ;;  %v2588_v2 = vmul.f32 0.0, %v2552_v47  ;;  %vm2570_vm15 = vcmp.gt.f32.partialorder %v2552_v47, 0.0 }
 0x216   : > { %3091 = vst [vmem:[%s4903_s8 + $0x18] sm:$0xff] %v3062_v28   ;;  %v3652_v19 = vpop.f32.mrf.mxu1  ;;  %v3708_v63 = vpop.f32.mrf.mxu0 }
 0x217   : > { %v2553_v22 = vadd.f32 %v4890_v29, %v2528_v11  ;;  %v2504_v51 = vadd.f32 %v2463_v27, %v2283_v21  ;;  %v2606_v33 = vsel %vm2570_vm15, %v2552_v47, %v2588_v2 }
 0x218   : > { %v2245_v7 = vpop.f32.mrf.mxu1  ;;  %v2474_v31 = vpop.f32.mrf.mxu0 }
 0x219   : > { %vm2571_vm0 = vcmp.gt.f32.partialorder %v2553_v22, 0.0  ;;  %v2589_v9 = vmul.f32 0.0, %v2553_v22  ;;  %v2529_v40 = vmul.f32 %v4885_v14, %v2504_v51  ;;  %v2284_v57 = vadd.f32 %v2245_v7, %v4860_v26 }
 0x21a   : > { %v3653_v17 = vpop.f32.mrf.mxu1  ;;  %v3709_v24 = vpop.f32.mrf.mxu0 }
 0x21b   : > { %v2607_v61 = vsel %vm2571_vm0, %v2553_v22, %v2589_v9  ;;  %v2554_v46 = vadd.f32 %v4890_v29, %v2529_v40  ;;  %v2505_v32 = vadd.f32 %v2466_v6, %v2284_v57 }
 0x21c   : > { %v3067_v55 = vpack.c.bf16 %v2607_v61, %v2606_v33  ;;  %v2250_v8 = vpop.f32.mrf.mxu1  ;;  %v2479_v41 = vpop.f32.mrf.mxu0 }
 0x21d   : > { %v2530_v58 = vmul.f32 %v4885_v14, %v2505_v32  ;;  %v2285_v34 = vadd.f32 %v2250_v8, %v4863_v50  ;;  %v2590_v37 = vmul.f32 0.0, %v2554_v46  ;;  %vm2572_vm1 = vcmp.gt.f32.partialorder %v2554_v46, 0.0 }
 0x21e   : > { %3092 = vst [vmem:[%s4903_s8 + $0x20] sm:$0xff] %v3067_v55   ;;  %v3656_v18 = vpop.f32.mrf.mxu1  ;;  %v3712_v48 = vpop.f32.mrf.mxu0 }
 0x21f   : > { %v2555_v26 = vadd.f32 %v4890_v29, %v2530_v58  ;;  %v2506_v54 = vadd.f32 %v2471_v56, %v2285_v34  ;;  %v2608_v50 = vsel %vm2572_vm1, %v2554_v46, %v2590_v37 }
 0x220   : > { %v2253_v20 = vpop.f32.mrf.mxu1  ;;  %v2482_v35 = vpop.f32.mrf.mxu0 }
 0x221   : > { %vm2573_vm2 = vcmp.gt.f32.partialorder %v2555_v26, 0.0  ;;  %v2591_v59 = vmul.f32 0.0, %v2555_v26  ;;  %v2531_v53 = vmul.f32 %v4885_v14, %v2506_v54  ;;  %v2286_v43 = vadd.f32 %v2253_v20, %v4866_v16 }
 0x222   : > { %v3657_v5 = vpop.f32.mrf.mxu1  ;;  %v3713_v27 = vpop.f32.mrf.mxu0 }
 0x223   : > { %v2609_v36 = vsel %vm2573_vm2, %v2555_v26, %v2591_v59  ;;  %v2556_v62 = vadd.f32 %v4890_v29, %v2531_v53  ;;  %v2507_v23 = vadd.f32 %v2474_v31, %v2286_v43 }
 0x224   : > { %v3072_v25 = vpack.c.bf16 %v2609_v36, %v2608_v50  ;;  %v2258_v4 = vpop.f32.mrf.mxu1  ;;  %v2487_v44 = vpop.f32.mrf.mxu0 }
 0x225   : > { %v2532_v10 = vmul.f32 %v4885_v14, %v2507_v23  ;;  %v2287_v45 = vadd.f32 %v2258_v4, %v4869_v39  ;;  %v2592_v52 = vmul.f32 0.0, %v2556_v62  ;;  %vm2574_vm3 = vcmp.gt.f32.partialorder %v2556_v62, 0.0 }
 0x226   : > { %3093 = vst [vmem:[%s4903_s8 + $0x28] sm:$0xff] %v3072_v25   ;;  %v3660_v6 = vpop.f32.mrf.mxu1  ;;  %v3716_v60 = vpop.f32.mrf.mxu0 }
 0x227   : > { %v2557_v16 = vadd.f32 %v4890_v29, %v2532_v10  ;;  %v2508_v1 = vadd.f32 %v2479_v41, %v2287_v45  ;;  %v2610_v39 = vsel %vm2574_vm3, %v2556_v62, %v2592_v52 }
 0x228   : > { %v2261_v42 = vpop.f32.mrf.mxu1  ;;  %v2490_v49 = vpop.f32.mrf.mxu0 }
 0x229   : > { %vm2575_vm4 = vcmp.gt.f32.partialorder %v2557_v16, 0.0  ;;  %v2593_v15 = vmul.f32 0.0, %v2557_v16  ;;  %v2533_v38 = vmul.f32 %v4885_v14, %v2508_v1  ;;  %v2288_v47 = vadd.f32 %v2261_v42, %v4872_v30 }
 0x22a   : > { %v3661_v12 = vpop.f32.mrf.mxu1  ;;  %v3717_v28 = vpop.f32.mrf.mxu0 }
 0x22b   : > { %v2611_v13 = vsel %vm2575_vm4, %v2557_v16, %v2593_v15  ;;  %v2558_v56 = vadd.f32 %v4890_v29, %v2533_v38  ;;  %v2509_v11 = vadd.f32 %v2482_v35, %v2288_v47 }
 0x22c   : > { %v3077_v21 = vpack.c.bf16 %v2611_v13, %v2610_v39  ;;  %v2266_v19 = vpop.f32.mrf.mxu1 }
 0x22d   : > { %v2534_v63 = vmul.f32 %v4885_v14, %v2509_v11  ;;  %v2289_v2 = vadd.f32 %v2266_v19, %v4875_v0  ;;  %v2594_v51 = vmul.f32 0.0, %v2558_v56  ;;  %vm2576_vm5 = vcmp.gt.f32.partialorder %v2558_v56, 0.0 }
 0x22e   : > { %3094 = vst [vmem:[%s4903_s8 + $0x30] sm:$0xff] %v3077_v21   ;;  %v3664_v22 = vpop.f32.mrf.mxu1 }
 0x22f   : > { %v2559_v7 = vadd.f32 %v4890_v29, %v2534_v63  ;;  %v2510_v30 = vadd.f32 %v2487_v44, %v2289_v2  ;;  %v2612_v24 = vsel %vm2576_vm5, %v2558_v56, %v2594_v51 }
 0x230   : > { %v2269_v31 = vpop.f32.mrf.mxu1 }
 0x231   : > { %vm2577_vm6 = vcmp.gt.f32.partialorder %v2559_v7, 0.0  ;;  %v2595_v9 = vmul.f32 0.0, %v2559_v7  ;;  %v2535_v40 = vmul.f32 %v4885_v14, %v2510_v30  ;;  %v2290_v57 = vadd.f32 %v2269_v31, %v4878_v3 }
 0x232   : > { %v3665_v17 = vpop.f32.mrf.mxu1 }
 0x233   : > { %v2613_v33 = vsel %vm2577_vm6, %v2559_v7, %v2595_v9  ;;  %v2560_v0 = vadd.f32 %v4890_v29, %v2535_v40  ;;  %v2511_v61 = vadd.f32 %v2490_v49, %v2290_v57 }
 0x234   : > { %v3082_v46 = vpack.c.bf16 %v2613_v33, %v2612_v24 }
 0x235   : > { %v2536_v32 = vmul.f32 %v4885_v14, %v2511_v61  ;;  %v2596_v55 = vmul.f32 0.0, %v2560_v0  ;;  %vm2578_vm7 = vcmp.gt.f32.partialorder %v2560_v0, 0.0 }
 0x236   : > { %3095 = vst [vmem:[%s4903_s8 + $0x38] sm:$0xff] %v3082_v46  }
 0x237   : > { %v2561_v8 = vadd.f32 %v4890_v29, %v2536_v32  ;;  %v2614_v58 = vsel %vm2578_vm7, %v2560_v0, %v2596_v55 }
 0x239   : > { %vm2579_vm8 = vcmp.gt.f32.partialorder %v2561_v8, 0.0  ;;  %v2597_v41 = vmul.f32 0.0, %v2561_v8 }
 0x23b   : > { %v2615_v34 = vsel %vm2579_vm8, %v2561_v8, %v2597_v41 }
 0x23c   : > { %v3087_v3 = vpack.c.bf16 %v2615_v34, %v2614_v58 }
 0x23e   : > { %3096 = vst [vmem:[%s4903_s8 + $0x40] sm:$0xff] %v3087_v3  }
 0x23f PF: > { %s14_s15 = sadd.s32 1, %s3858_s15  }
 0x240   : > { %p11_p5 = scmp.ge.s32.totalorder %s14_s15, 6  }
 0x242   :  { %13 = sbr.rel (!%p11_p5) target bundleno = 1 (0x1), region = 74 }

</bundles_post_ra>
